<compile_context>
chip_gen: v7x
topology: tpu7x:2x2x1
jax: 0.10.0
libtpu: 0.0.40
codegen_flags: <defaults>
</compile_context>

<pallas_src>
import functools

import jax
import jax.numpy as jnp
from jax.experimental import pallas as pl
from jax.experimental.pallas import tpu as pltpu

EPS = 1e-5


# ----------------------------------------------------------------------------
# One-time parameter preparation (all folding / permutation hoisted here)
# ----------------------------------------------------------------------------
def _band_conv_matrix(w_taps, L_in, L_out, stride, pad, channel_major_rows):
    """Dense banded matrix expressing a strided 1-D conv as a single matmul.

    w_taps: (K, C_in, C_out) fused depthwise*pointwise*BN-scale tap weights.
    Returns W of shape (L_in*C_in, L_out*C_out).
      rows    : (c*L_in + l) if channel_major_rows (PyTorch NCL flatten),
                else (l*C_in + c) (the layout produced by the previous conv).
      columns : (j*C_out + co)  -- the layout consumed by the next layer.
    Zero padding of the conv is folded in by simply dropping out-of-range taps.
    """
    K, C_in, C_out = w_taps.shape
    j = jnp.arange(L_out)[:, None]
    k = jnp.arange(K)[None, :]
    l_idx = j * stride + k - pad                                        # (L_out, K)
    onehot = (l_idx[:, :, None] == jnp.arange(L_in)[None, None, :])     # (L_out, K, L_in)
    onehot = onehot.astype(w_taps.dtype)
    if channel_major_rows:
        W = jnp.einsum("jkl,kco->cljo", onehot, w_taps)
        return W.reshape(C_in * L_in, L_out * C_out)
    W = jnp.einsum("jkl,kco->lcjo", onehot, w_taps)
    return W.reshape(L_in * C_in, L_out * C_out)


def prepare_params(params, raw_size, mxu_dtype=jnp.float32):
    """Fold the whole network into 5 dense (W, b) layers.  Run once, off the hot path."""
    layers = []
    L = raw_size
    first = True
    C_last = L_last = None
    for conv in params["convs"]:
        K, s, p = conv["cfg"]
        C_in = conv["w_dw"].shape[0]
        C_out = conv["w_pw"].shape[0]
        L_out = (L + 2 * p - K) // s + 1

        # Fold depthwise * pointwise * BN(eval) into per-tap GEMM weights + one bias.
        a = conv["gamma"] / jnp.sqrt(conv["var"] + EPS)                 # (C_out,)
        wdw = conv["w_dw"].reshape(C_in, K)                             # (C_in, K)
        wpw = conv["w_pw"].reshape(C_out, C_in)                         # (C_out, C_in)
        w_taps = wdw.T[:, :, None] * wpw.T[None, :, :] * a[None, None, :]   # (K, C_in, C_out)
        b_fused = (a * (wpw @ conv["b_dw"] + conv["b_pw"])
                   + conv["beta"] - a * conv["mean"])                   # (C_out,)

        W = _band_conv_matrix(w_taps, L, L_out, s, p, channel_major_rows=first)
        b = jnp.tile(b_fused, L_out).reshape(1, L_out * C_out)          # bias per (j, co)
        layers.append((W.astype(mxu_dtype), b.astype(jnp.float32)))
        L, first = L_out, False
        C_last, L_last = C_out, L_out

    fc = params["fc"]
    H = fc["w1"].shape[0]
    flat_in = fc["w1"].shape[1]
    assert flat_in == C_last * L_last, (flat_in, C_last, L_last)
    # PyTorch Flatten of the conv-3 output is channel-major (c*L3 + l); our banded-conv
    # output layout is length-major (l*C3 + c) -> permute Linear-1 input columns.
    w1 = fc["w1"].reshape(H, C_last, L_last).transpose(0, 2, 1).reshape(H, flat_in)
    a1 = fc["gamma"] / jnp.sqrt(fc["var"] + EPS)
    w1f = w1.T * a1[None, :]                                            # BN scale folded
    b1f = (a1 * fc["b1"] + fc["beta"] - a1 * fc["mean"]).reshape(1, H)
    layers.append((w1f.astype(mxu_dtype), b1f.astype(jnp.float32)))
    layers.append((fc["w2"].T.astype(mxu_dtype),
                   fc["b2"].reshape(1, -1).astype(jnp.float32)))
    return layers


# ----------------------------------------------------------------------------
# Fused whole-network kernel: 5 x (matmul -> bias -> [ReLU])
# ----------------------------------------------------------------------------
def _fused_net_kernel(*refs, n_layers):
    x_ref = refs[0]
    o_ref = refs[-1]
    h = x_ref[...].astype(jnp.float32)
    for i in range(n_layers):
        w = refs[1 + 2 * i][...]
        b = refs[2 + 2 * i][...]
        # MXU matmul (operands may be bf16 on v6e/v7x); accumulate + epilogue in f32.
        h = jnp.dot(h.astype(w.dtype), w, preferred_element_type=jnp.float32) + b
        if i < n_layers - 1:
            h = jnp.maximum(h, 0.0)
    o_ref[...] = h.astype(o_ref.dtype)


def classifier_forward(x_ncl, prepared, *, tile_n=128):
    """x_ncl: (N, raw_ni, raw_size) PyTorch NCL layout.  prepared: prepare_params() output."""
    N, C0, L0 = x_ncl.shape
    F0 = C0 * L0
    # Channel-major flatten (pure view); W1's rows were permuted to match, so no transpose.
    x_flat = x_ncl.reshape(N, F0).astype(jnp.float32)

    tn = N if N <= tile_n else tile_n
    n_pad = -(-N // tn) * tn
    if n_pad != N:
        x_flat = jnp.pad(x_flat, ((0, n_pad - N), (0, 0)))

    n_layers = len(prepared)
    n_out = prepared[-1][0].shape[1]

    in_specs = [pl.BlockSpec((tn, F0), lambda i: (i, 0))]
    operands = [x_flat]
    flops = 0
    w_bytes = 0
    for (W, b) in prepared:
        in_specs.append(pl.BlockSpec(W.shape, lambda i: (0, 0)))   # VMEM-resident weight
        in_specs.append(pl.BlockSpec(b.shape, lambda i: (0, 0)))
        operands += [W, b]
        flops += 2 * n_pad * W.shape[0] * W.shape[1]
        w_bytes += W.size * W.dtype.itemsize + b.size * b.dtype.itemsize

    out = pl.pallas_call(
        functools.partial(_fused_net_kernel, n_layers=n_layers),
        out_shape=jax.ShapeDtypeStruct((n_pad, n_out), jnp.float32),
        grid_spec=pltpu.PrefetchScalarGridSpec(
            num_scalar_prefetch=0,
            grid=(n_pad // tn,),
            in_specs=in_specs,
            out_specs=pl.BlockSpec((tn, n_out), lambda i: (i, 0)),
        ),
        compiler_params=pltpu.CompilerParams(
            dimension_semantics=("parallel",),           # megacore splits batch blocks
            vmem_limit_bytes=32 * 1024 * 1024,           # headroom, still v7x-safe
        ),
        cost_estimate=pl.CostEstimate(
            flops=flops,
            transcendentals=0,
            bytes_accessed=int(x_flat.size * 4 + w_bytes + n_pad * n_out * 4),
        ),
    )(*operands)
    return out[:N]


# ----------------------------------------------------------------------------
# Pure-JAX reference (PyTorch eval-mode semantics)
# ----------------------------------------------------------------------------
def _ref_forward(x_ncl, params):
    hp = jax.lax.Precision.HIGHEST
    h = x_ncl
    for conv in params["convs"]:
        k, s, p = conv["cfg"]
        C = h.shape[1]
        h = jax.lax.conv_general_dilated(
            h, conv["w_dw"], window_strides=(s,), padding=[(p, p)],
            dimension_numbers=("NCH", "OIH", "NCH"),
            feature_group_count=C, precision=hp) + conv["b_dw"][None, :, None]
        h = jax.lax.conv_general_dilated(
            h, conv["w_pw"], window_strides=(1,), padding=[(0, 0)],
            dimension_numbers=("NCH", "OIH", "NCH"),
            precision=hp) + conv["b_pw"][None, :, None]
        a = conv["gamma"] / jnp.sqrt(conv["var"] + EPS)
        h = a[None, :, None] * (h - conv["mean"][None, :, None]) + conv["beta"][None, :, None]
        h = jnp.maximum(h, 0.0)
    hf = h.reshape(h.shape[0], -1)                       # PyTorch Flatten (channel-major)
    fc = params["fc"]
    z = jnp.dot(hf, fc["w1"].T, precision=hp) + fc["b1"]
    a1 = fc["gamma"] / jnp.sqrt(fc["var"] + EPS)
    z = a1 * (z - fc["mean"]) + fc["beta"]
    z = jnp.maximum(z, 0.0)
    return jnp.dot(z, fc["w2"].T, precision=hp) + fc["b2"]


# ----------------------------------------------------------------------------
# Deterministic synthetic parameters (PyTorch shapes)
# ----------------------------------------------------------------------------
def _make_params(key, raw_ni, n_classes, raw_size):
    assert raw_size % 32 == 0, "Classifier_1d_3_conv_2FC assumes raw_size divisible by 32"
    cfgs = [(raw_ni, 32, 8, 2, 3), (32, 64, 8, 4, 2), (64, 128, 8, 4, 2)]
    params = {"convs": []}
    for (ci, co, k, s, p) in cfgs:
        key, *ks = jax.random.split(key, 9)
        params["convs"].append(dict(
            w_dw=jax.random.normal(ks[0], (ci, 1, k), jnp.float32) / jnp.sqrt(float(k)),
            b_dw=0.1 * jax.random.normal(ks[1], (ci,), jnp.float32),
            w_pw=jax.random.normal(ks[2], (co, ci, 1), jnp.float32) / jnp.sqrt(float(ci)),
            b_pw=0.1 * jax.random.normal(ks[3], (co,), jnp.float32),
            gamma=1.0 + 0.1 * jax.random.normal(ks[4], (co,), jnp.float32),
            beta=0.1 * jax.random.normal(ks[5], (co,), jnp.float32),
            mean=0.1 * jax.random.normal(ks[6], (co,), jnp.float32),
            var=jax.random.uniform(ks[7], (co,), jnp.float32, 0.5, 1.5),
            cfg=(k, s, p),
        ))
    flat_in = 128 * int(raw_size / (2 * 4 * 4))
    key, *ks = jax.random.split(key, 9)
    params["fc"] = dict(
        w1=jax.random.normal(ks[0], (512, flat_in), jnp.float32) / jnp.sqrt(float(flat_in)),
        b1=0.1 * jax.random.normal(ks[1], (512,), jnp.float32),
        gamma=1.0 + 0.1 * jax.random.normal(ks[2], (512,), jnp.float32),
        beta=0.1 * jax.random.normal(ks[3], (512,), jnp.float32),
        mean=0.1 * jax.random.normal(ks[4], (512,), jnp.float32),
        var=jax.random.uniform(ks[5], (512,), jnp.float32, 0.5, 1.5),
        w2=jax.random.normal(ks[6], (n_classes, 512), jnp.float32) / jnp.sqrt(512.0),
        b2=0.1 * jax.random.normal(ks[7], (n_classes,), jnp.float32),
    )
    return params


if __name__ == "__main__":
    # Classifier_1d_3_conv_2FC(raw_ni=4, no=5, raw_size=64): flat_in = 128*2 = 256
    N, raw_ni, n_classes, raw_size = 2, 4, 5, 64

    key = jax.random.PRNGKey(0)
    key, kx = jax.random.split(key)
    x = jax.random.normal(kx, (N, raw_ni, raw_size), dtype=jnp.float32)
    params = _make_params(key, raw_ni, n_classes, raw_size)

    # One-time weight folding (hoisted out of the hot path).
    # For v6e/v7x, pass mxu_dtype=jnp.bfloat16 here (loosen tolerance to ~1e-2).
    prepared = prepare_params(params, raw_size, mxu_dtype=jnp.float32)

    out = classifier_forward(x, prepared)
    out = jax.block_until_ready(out)

    ref = _ref_forward(x, params)
    assert out.shape == (N, n_classes), out.shape
    max_err = float(jnp.max(jnp.abs(out - ref)))
    assert jnp.allclose(out, ref, atol=3e-3, rtol=3e-3), max_err

    print("KERNEL_OK")
</pallas_src>

<mosaic_0001>
module attributes {stable_mosaic.version = 11 : i64} {
  func.func @_fused_net_kernel(%arg0: i32, %arg1: memref<2x256xf32, #tpu.memory_space<vmem>>, %arg2: memref<256x1024xf32, #tpu.memory_space<vmem>>, %arg3: memref<1x1024xf32, #tpu.memory_space<vmem>>, %arg4: memref<1024x512xf32, #tpu.memory_space<vmem>>, %arg5: memref<1x512xf32, #tpu.memory_space<vmem>>, %arg6: memref<512x256xf32, #tpu.memory_space<vmem>>, %arg7: memref<1x256xf32, #tpu.memory_space<vmem>>, %arg8: memref<256x512xf32, #tpu.memory_space<vmem>>, %arg9: memref<1x512xf32, #tpu.memory_space<vmem>>, %arg10: memref<512x5xf32, #tpu.memory_space<vmem>>, %arg11: memref<1x5xf32, #tpu.memory_space<vmem>>, %arg12: memref<2x5xf32, #tpu.memory_space<vmem>>) attributes {dimension_semantics = [#tpu.dimension_semantics<parallel>], iteration_bounds = array<i64: 1>, scalar_prefetch = 0 : i64, scratch_operands = 0 : i64, tpu.core_type = #tpu.core_type<tc>, window_params = [{transform_indices = @transform_0, window_bounds = array<i64: 2, 256>}, {pipeline_mode = #tpu.pipeline_mode<synchronous>, transform_indices = @transform_1, window_bounds = array<i64: 256, 1024>}, {pipeline_mode = #tpu.pipeline_mode<synchronous>, transform_indices = @transform_2, window_bounds = array<i64: 1, 1024>}, {pipeline_mode = #tpu.pipeline_mode<synchronous>, transform_indices = @transform_3, window_bounds = array<i64: 1024, 512>}, {pipeline_mode = #tpu.pipeline_mode<synchronous>, transform_indices = @transform_4, window_bounds = array<i64: 1, 512>}, {pipeline_mode = #tpu.pipeline_mode<synchronous>, transform_indices = @transform_5, window_bounds = array<i64: 512, 256>}, {pipeline_mode = #tpu.pipeline_mode<synchronous>, transform_indices = @transform_6, window_bounds = array<i64: 1, 256>}, {pipeline_mode = #tpu.pipeline_mode<synchronous>, transform_indices = @transform_7, window_bounds = array<i64: 256, 512>}, {pipeline_mode = #tpu.pipeline_mode<synchronous>, transform_indices = @transform_8, window_bounds = array<i64: 1, 512>}, {pipeline_mode = #tpu.pipeline_mode<synchronous>, transform_indices = @transform_9, window_bounds = array<i64: 512, 5>}, {pipeline_mode = #tpu.pipeline_mode<synchronous>, transform_indices = @transform_10, window_bounds = array<i64: 1, 5>}, {transform_indices = @transform_11, window_bounds = array<i64: 2, 5>}]} {
    %c0 = arith.constant 0 : index
    %c0_0 = arith.constant 0 : index
    %0 = vector.load %arg1[%c0, %c0_0] : memref<2x256xf32, #tpu.memory_space<vmem>>, vector<2x256xf32>
    %c0_1 = arith.constant 0 : index
    %c0_2 = arith.constant 0 : index
    %1 = vector.load %arg2[%c0_1, %c0_2] : memref<256x1024xf32, #tpu.memory_space<vmem>>, vector<256x1024xf32>
    %c0_3 = arith.constant 0 : index
    %c0_4 = arith.constant 0 : index
    %2 = vector.load %arg3[%c0_3, %c0_4] : memref<1x1024xf32, #tpu.memory_space<vmem>>, vector<1x1024xf32>
    %cst = arith.constant dense<0.000000e+00> : vector<2x1024xf32>
    %3 = tpu.matmul %0, %1, %cst {dimension_numbers = #tpu.dot_dimension_numbers<[1], [0], [0], [1], [0, 0, 1, 1], [], []>} : vector<2x256xf32>, vector<256x1024xf32>, vector<2x1024xf32> -> vector<2x1024xf32>
    %4 = vector.broadcast %2 : vector<1x1024xf32> to vector<2x1024xf32>
    %5 = arith.addf %3, %4 : vector<2x1024xf32>
    %cst_5 = arith.constant 0.000000e+00 : f32
    %6 = vector.broadcast %cst_5 : f32 to vector<2x1024xf32>
    %7 = arith.maximumf %5, %6 : vector<2x1024xf32>
    %c0_6 = arith.constant 0 : index
    %c0_7 = arith.constant 0 : index
    %8 = vector.load %arg4[%c0_6, %c0_7] : memref<1024x512xf32, #tpu.memory_space<vmem>>, vector<1024x512xf32>
    %c0_8 = arith.constant 0 : index
    %c0_9 = arith.constant 0 : index
    %9 = vector.load %arg5[%c0_8, %c0_9] : memref<1x512xf32, #tpu.memory_space<vmem>>, vector<1x512xf32>
    %cst_10 = arith.constant dense<0.000000e+00> : vector<2x512xf32>
    %10 = tpu.matmul %7, %8, %cst_10 {dimension_numbers = #tpu.dot_dimension_numbers<[1], [0], [0], [1], [0, 0, 1, 1], [], []>} : vector<2x1024xf32>, vector<1024x512xf32>, vector<2x512xf32> -> vector<2x512xf32>
    %11 = vector.broadcast %9 : vector<1x512xf32> to vector<2x512xf32>
    %12 = arith.addf %10, %11 : vector<2x512xf32>
    %cst_11 = arith.constant 0.000000e+00 : f32
    %13 = vector.broadcast %cst_11 : f32 to vector<2x512xf32>
    %14 = arith.maximumf %12, %13 : vector<2x512xf32>
    %c0_12 = arith.constant 0 : index
    %c0_13 = arith.constant 0 : index
    %15 = vector.load %arg6[%c0_12, %c0_13] : memref<512x256xf32, #tpu.memory_space<vmem>>, vector<512x256xf32>
    %c0_14 = arith.constant 0 : index
    %c0_15 = arith.constant 0 : index
    %16 = vector.load %arg7[%c0_14, %c0_15] : memref<1x256xf32, #tpu.memory_space<vmem>>, vector<1x256xf32>
    %cst_16 = arith.constant dense<0.000000e+00> : vector<2x256xf32>
    %17 = tpu.matmul %14, %15, %cst_16 {dimension_numbers = #tpu.dot_dimension_numbers<[1], [0], [0], [1], [0, 0, 1, 1], [], []>} : vector<2x512xf32>, vector<512x256xf32>, vector<2x256xf32> -> vector<2x256xf32>
    %18 = vector.broadcast %16 : vector<1x256xf32> to vector<2x256xf32>
    %19 = arith.addf %17, %18 : vector<2x256xf32>
    %cst_17 = arith.constant 0.000000e+00 : f32
    %20 = vector.broadcast %cst_17 : f32 to vector<2x256xf32>
    %21 = arith.maximumf %19, %20 : vector<2x256xf32>
    %c0_18 = arith.constant 0 : index
    %c0_19 = arith.constant 0 : index
    %22 = vector.load %arg8[%c0_18, %c0_19] : memref<256x512xf32, #tpu.memory_space<vmem>>, vector<256x512xf32>
    %c0_20 = arith.constant 0 : index
    %c0_21 = arith.constant 0 : index
    %23 = vector.load %arg9[%c0_20, %c0_21] : memref<1x512xf32, #tpu.memory_space<vmem>>, vector<1x512xf32>
    %cst_22 = arith.constant dense<0.000000e+00> : vector<2x512xf32>
    %24 = tpu.matmul %21, %22, %cst_22 {dimension_numbers = #tpu.dot_dimension_numbers<[1], [0], [0], [1], [0, 0, 1, 1], [], []>} : vector<2x256xf32>, vector<256x512xf32>, vector<2x512xf32> -> vector<2x512xf32>
    %25 = vector.broadcast %23 : vector<1x512xf32> to vector<2x512xf32>
    %26 = arith.addf %24, %25 : vector<2x512xf32>
    %cst_23 = arith.constant 0.000000e+00 : f32
    %27 = vector.broadcast %cst_23 : f32 to vector<2x512xf32>
    %28 = arith.maximumf %26, %27 : vector<2x512xf32>
    %c0_24 = arith.constant 0 : index
    %c0_25 = arith.constant 0 : index
    %29 = vector.load %arg10[%c0_24, %c0_25] : memref<512x5xf32, #tpu.memory_space<vmem>>, vector<512x5xf32>
    %c0_26 = arith.constant 0 : index
    %c0_27 = arith.constant 0 : index
    %30 = vector.load %arg11[%c0_26, %c0_27] : memref<1x5xf32, #tpu.memory_space<vmem>>, vector<1x5xf32>
    %cst_28 = arith.constant dense<0.000000e+00> : vector<2x5xf32>
    %31 = tpu.matmul %28, %29, %cst_28 {dimension_numbers = #tpu.dot_dimension_numbers<[1], [0], [0], [1], [0, 0, 1, 1], [], []>} : vector<2x512xf32>, vector<512x5xf32>, vector<2x5xf32> -> vector<2x5xf32>
    %32 = vector.broadcast %30 : vector<1x5xf32> to vector<2x5xf32>
    %33 = arith.addf %31, %32 : vector<2x5xf32>
    %c0_29 = arith.constant 0 : index
    %c0_30 = arith.constant 0 : index
    %34 = vector.load %arg12[%c0_29, %c0_30] : memref<2x5xf32, #tpu.memory_space<vmem>>, vector<2x5xf32>
    tpu.vector_store %arg12[%c0_29, %c0_30], %33 {strides = array<i32>} : memref<2x5xf32, #tpu.memory_space<vmem>>, vector<2x5xf32>,
    return
  }
  func.func @transform_0(%arg0: i32) -> (i32, i32) {
    %c0_i32 = arith.constant 0 : i32
    %c0_i32_0 = arith.constant 0 : i32
    return %arg0, %c0_i32 : i32, i32
  }
  func.func @transform_1(%arg0: i32) -> (i32, i32) {
    %c0_i32 = arith.constant 0 : i32
    %c0_i32_0 = arith.constant 0 : i32
    %c0_i32_1 = arith.constant 0 : i32
    return %c0_i32, %c0_i32_0 : i32, i32
  }
  func.func @transform_2(%arg0: i32) -> (i32, i32) {
    %c0_i32 = arith.constant 0 : i32
    %c0_i32_0 = arith.constant 0 : i32
    %c0_i32_1 = arith.constant 0 : i32
    return %c0_i32, %c0_i32_0 : i32, i32
  }
  func.func @transform_3(%arg0: i32) -> (i32, i32) {
    %c0_i32 = arith.constant 0 : i32
    %c0_i32_0 = arith.constant 0 : i32
    %c0_i32_1 = arith.constant 0 : i32
    return %c0_i32, %c0_i32_0 : i32, i32
  }
  func.func @transform_4(%arg0: i32) -> (i32, i32) {
    %c0_i32 = arith.constant 0 : i32
    %c0_i32_0 = arith.constant 0 : i32
    %c0_i32_1 = arith.constant 0 : i32
    return %c0_i32, %c0_i32_0 : i32, i32
  }
  func.func @transform_5(%arg0: i32) -> (i32, i32) {
    %c0_i32 = arith.constant 0 : i32
    %c0_i32_0 = arith.constant 0 : i32
    %c0_i32_1 = arith.constant 0 : i32
    return %c0_i32, %c0_i32_0 : i32, i32
  }
  func.func @transform_6(%arg0: i32) -> (i32, i32) {
    %c0_i32 = arith.constant 0 : i32
    %c0_i32_0 = arith.constant 0 : i32
    %c0_i32_1 = arith.constant 0 : i32
    return %c0_i32, %c0_i32_0 : i32, i32
  }
  func.func @transform_7(%arg0: i32) -> (i32, i32) {
    %c0_i32 = arith.constant 0 : i32
    %c0_i32_0 = arith.constant 0 : i32
    %c0_i32_1 = arith.constant 0 : i32
    return %c0_i32, %c0_i32_0 : i32, i32
  }
  func.func @transform_8(%arg0: i32) -> (i32, i32) {
    %c0_i32 = arith.constant 0 : i32
    %c0_i32_0 = arith.constant 0 : i32
    %c0_i32_1 = arith.constant 0 : i32
    return %c0_i32, %c0_i32_0 : i32, i32
  }
  func.func @transform_9(%arg0: i32) -> (i32, i32) {
    %c0_i32 = arith.constant 0 : i32
    %c0_i32_0 = arith.constant 0 : i32
    %c0_i32_1 = arith.constant 0 : i32
    return %c0_i32, %c0_i32_0 : i32, i32
  }
  func.func @transform_10(%arg0: i32) -> (i32, i32) {
    %c0_i32 = arith.constant 0 : i32
    %c0_i32_0 = arith.constant 0 : i32
    %c0_i32_1 = arith.constant 0 : i32
    return %c0_i32, %c0_i32_0 : i32, i32
  }
  func.func @transform_11(%arg0: i32) -> (i32, i32) {
    %c0_i32 = arith.constant 0 : i32
    %c0_i32_0 = arith.constant 0 : i32
    return %arg0, %c0_i32 : i32, i32
  }
}

</mosaic_0001>

<bundles_post_ra>
// kernel: tpu_custom_call.1
= control target key start
LH: loop header
LB: loop body
LE: loop exit
PB: predicated region body
PF: predicated region fallthrough
CT: control target
= control target key end

     0   :  { %16 = vsyncpa [#allocation3], 0  ;;  %s4631_s0 = inlined_call_operand.hbm [shape: f32[2,256], index: 0, kind: input, shape index: {}]   ;;  %s4632_s1 = inlined_call_operand.hbm [shape: f32[256,1024], index: 1, kind: input, shape index: {}]   ;;  %s4633_s2 = inlined_call_operand.hbm [shape: f32[1,1024], index: 2, kind: input, shape index: {}]   ;;  %s4634_s3 = inlined_call_operand.hbm [shape: f32[1024,512], index: 3, kind: input, shape index: {}]   ;;  %s4635_s4 = inlined_call_operand.hbm [shape: f32[1,512], index: 4, kind: input, shape index: {}]   ;;  %s4636_s5 = inlined_call_operand.hbm [shape: f32[512,256], index: 5, kind: input, shape index: {}]   ;;  %s4637_s6 = inlined_call_operand.hbm [shape: f32[1,256], index: 6, kind: input, shape index: {}]   ;;  %s4638_s7 = inlined_call_operand.hbm [shape: f32[256,512], index: 7, kind: input, shape index: {}]   ;;  %s4639_s8 = inlined_call_operand.hbm [shape: f32[1,512], index: 8, kind: input, shape index: {}]   ;;  %s4640_s9 = inlined_call_operand.vmem [shape: f32[512,5], index: 9, kind: input, shape index: {}]   ;;  %s4641_s10 = inlined_call_operand.hbm [shape: f32[1,5], index: 10, kind: input, shape index: {}]   ;;  %s4642_s11 = inlined_call_operand.hbm [shape: f32[2,5], index: 11, kind: output, shape index: {}]  }
   0x1   :  { %17 = vsyncpa [#allocation6], 0 }
   0x2   :  { %18 = vsyncpa [#allocation9], 0 }
   0x3   :  { %19 = vsyncpa [#allocation12], 0 }
   0x4   :  { %20 = vsyncpa [#allocation15], 0 }
   0x5   :  { %21 = vsyncpa [#allocation18], 0 }
   0x6   :  { %22 = vsyncpa [#allocation4], 0  ;;  %s4139_s17 = smov [#allocation5]   ;;  %s3883_s21 = scalar_lea.hbm %s4632_s1, 32768 }
   0x7   :  { %s38_s18 = sshll.u32 %s4139_s17, 4  ;;  %p3884_p0 = scmp.ne.s32.totalorder %s4632_s1, %s3883_s21  ;;  %s39_s18 = int_to_ptr.vmem [resolvable:$true] %s38_s18 }
   0x8   :  { %p3887_p1 = scmp.lt.u32.totalorder %s3883_s21, %s4632_s1 }
   0xa   :  { %p3889_p2 = pnand %p3887_p1, %p3884_p0 }
   0xc   :  { %3892 = shalt.err (!%p3889_p2)
}
   0xd   :  { %s3893_s26 = scalar_lea.vmem %s39_s18, 32768  ;;  %p3898_p4 = scmp.lt.s32.totalorder %s39_s18, %s39_s18 }
   0xe   :  { %p3894_p3 = scmp.ne.s32.totalorder %s39_s18, %s3893_s26  ;;  %p3899_p5 = scmp.lt.s32.totalorder %s3893_s26, %s3893_s26 }
  0x10   :  { %p3900_p6 = por %p3899_p5, %p3898_p4 }
  0x12   :  { %p3901_p7 = pnand %p3900_p6, %p3894_p3 }
  0x14   :  { %3904 = shalt.err (!%p3901_p7)
}
  0x15   :  { %s4140_s27 = smov 1024   ;;  %s4141_s28 = smov 64  }
  0x16   :  { %44 = dma.hbm_to_vmem [thread:$0]  %s4632_s1, 32768, %s39_s18, [#allocation6], %s4140_s27, %s4140_s27, %s4141_s28  }
  0x17   :  { %s4142_s12 = smov [#allocation8]   ;;  %s3905_s16 = scalar_lea.hbm %s4634_s3, 65536 }
  0x18   :  { %s60_s13 = sshll.u32 %s4142_s12, 4  ;;  %p3906_p8 = scmp.ne.s32.totalorder %s4634_s3, %s3905_s16  ;;  %s61_s13 = int_to_ptr.vmem [resolvable:$true] %s60_s13 }
  0x19   :  { %p3909_p9 = scmp.lt.u32.totalorder %s3905_s16, %s4634_s3 }
  0x1b   :  { %p3911_p10 = pnand %p3909_p9, %p3906_p8 }
  0x1d   :  { %3914 = shalt.err (!%p3911_p10)
}
  0x1e   :  { %s3915_s22 = scalar_lea.vmem %s61_s13, 65536  ;;  %p3920_p12 = scmp.lt.s32.totalorder %s61_s13, %s61_s13 }
  0x1f   :  { %p3916_p11 = scmp.ne.s32.totalorder %s61_s13, %s3915_s22  ;;  %p3921_p13 = scmp.lt.s32.totalorder %s3915_s22, %s3915_s22 }
  0x21   :  { %p3922_p0 = por %p3921_p13, %p3920_p12 }
  0x23   :  { %p3923_p1 = pnand %p3922_p0, %p3916_p11 }
  0x25   :  { %3926 = shalt.err (!%p3923_p1)
}
  0x26   :  { %s4143_s1 = smov 512   ;;  %s4144_s18 = smov 32  }
  0x27   :  { %66 = dma.hbm_to_vmem [thread:$0]  %s4634_s3, 65536, %s61_s13, [#allocation9], %s4143_s1, %s4143_s1, %s4144_s18  }
  0x28   :  { %s4145_s25 = smov [#allocation11]   ;;  %s3927_s29 = scalar_lea.hbm %s4636_s5, 16384 }
  0x29   :  { %s82_s26 = sshll.u32 %s4145_s25, 4  ;;  %p3928_p2 = scmp.ne.s32.totalorder %s4636_s5, %s3927_s29  ;;  %s83_s26 = int_to_ptr.vmem [resolvable:$true] %s82_s26 }
  0x2a   :  { %p3931_p3 = scmp.lt.u32.totalorder %s3927_s29, %s4636_s5 }
  0x2c   :  { %p3933_p4 = pnand %p3931_p3, %p3928_p2 }
  0x2e   :  { %3936 = shalt.err (!%p3933_p4)
}
  0x2f   :  { %s3937_s16 = scalar_lea.vmem %s83_s26, 16384  ;;  %p3942_p6 = scmp.lt.s32.totalorder %s83_s26, %s83_s26 }
  0x30   :  { %p3938_p5 = scmp.ne.s32.totalorder %s83_s26, %s3937_s16  ;;  %p3943_p7 = scmp.lt.s32.totalorder %s3937_s16, %s3937_s16 }
  0x32   :  { %p3944_p8 = por %p3943_p7, %p3942_p6 }
  0x34   :  { %p3945_p9 = pnand %p3944_p8, %p3938_p5 }
  0x36   :  { %3948 = shalt.err (!%p3945_p9)
}
  0x37   :  { %s4146_s3 = smov 256   ;;  %s4147_s13 = smov 16  }
  0x38   :  { %88 = dma.hbm_to_vmem [thread:$0]  %s4636_s5, 16384, %s83_s26, [#allocation12], %s4146_s3, %s4146_s3, %s4147_s13  }
  0x39   :  { %s4148_s20 = smov [#allocation14]   ;;  %s4149_s22 = smov [#allocation2]  }
  0x3a   :  { %s104_s21 = sshll.u32 %s4148_s20, 4  ;;  %s29_s23 = sshll.u32 %s4149_s22, 4  ;;  %s105_s21 = int_to_ptr.vmem [resolvable:$true] %s104_s21  ;;  %s30_s23 = int_to_ptr.vmem [resolvable:$true] %s29_s23 }
  0x3b   :  { %s3949_s27 = scalar_lea.hbm %s4638_s7, 16384 }
  0x3c   :  { %p3950_p10 = scmp.ne.s32.totalorder %s4638_s7, %s3949_s27  ;;  %p3953_p11 = scmp.lt.u32.totalorder %s3949_s27, %s4638_s7 }
  0x3e   :  { %p3955_p12 = pnand %p3953_p11, %p3950_p10 }
  0x40   :  { %3958 = shalt.err (!%p3955_p12)
}
  0x41   :  { %s3959_s5 = scalar_lea.vmem %s105_s21, 16384  ;;  %p3964_p0 = scmp.lt.s32.totalorder %s105_s21, %s105_s21 }
  0x42   :  { %p3960_p13 = scmp.ne.s32.totalorder %s105_s21, %s3959_s5  ;;  %p3965_p1 = scmp.lt.s32.totalorder %s3959_s5, %s3959_s5 }
  0x44   :  { %p3966_p2 = por %p3965_p1, %p3964_p0 }
  0x46   :  { %p3967_p3 = pnand %p3966_p2, %p3960_p13 }
  0x48   :  { %3970 = shalt.err (!%p3967_p3)
}
  0x49   :  { %110 = dma.hbm_to_vmem [thread:$0]  %s4638_s7, 16384, %s105_s21, [#allocation15], %s4143_s1, %s4143_s1, %s4144_s18  }
  0x4a   :  { %s3971_s3 = scalar_lea.hbm %s4631_s0, 64 }
  0x4b   :  { %p3972_p4 = scmp.ne.s32.totalorder %s4631_s0, %s3971_s3  ;;  %p3975_p5 = scmp.lt.u32.totalorder %s3971_s3, %s4631_s0 }
  0x4d   :  { %p3977_p6 = pnand %p3975_p5, %p3972_p4 }
  0x4f   :  { %3980 = shalt.err (!%p3977_p6)
}
  0x50   :  { %s3981_s22 = scalar_lea.vmem %s30_s23, 64  ;;  %p3986_p8 = scmp.lt.s32.totalorder %s30_s23, %s30_s23 }
  0x51   :  { %p3982_p7 = scmp.ne.s32.totalorder %s30_s23, %s3981_s22  ;;  %p3987_p9 = scmp.lt.s32.totalorder %s3981_s22, %s3981_s22 }
  0x53   :  { %p3988_p10 = por %p3987_p9, %p3986_p8 }
  0x55   :  { %p3989_p11 = pnand %p3988_p10, %p3982_p7 }
  0x57   :  { %3992 = shalt.err (!%p3989_p11)
}
  0x58   :  { %32 = dma.hbm_to_vmem [thread:$0]  %s4631_s0, 64, %s30_s23, [#allocation3]  }
  0x59   :  { %s4150_s18 = smov [#allocation7]   ;;  %s4151_s24 = smov [#allocation10]  }
  0x5a   :  { %s51_s21 = sshll.u32 %s4150_s18, 4  ;;  %s73_s25 = sshll.u32 %s4151_s24, 4  ;;  %s52_s21 = int_to_ptr.vmem [resolvable:$true] %s51_s21  ;;  %s74_s25 = int_to_ptr.vmem [resolvable:$true] %s73_s25 }
  0x5b   :  { %s3993_s29 = scalar_lea.hbm %s4633_s2, 128 }
  0x5c   :  { %p3994_p12 = scmp.ne.s32.totalorder %s4633_s2, %s3993_s29  ;;  %p3997_p13 = scmp.lt.u32.totalorder %s3993_s29, %s4633_s2 }
  0x5e   :  { %p3999_p0 = pnand %p3997_p13, %p3994_p12 }
  0x60   :  { %4002 = shalt.err (!%p3999_p0)
}
  0x61   :  { %s4003_s0 = scalar_lea.vmem %s52_s21, 128  ;;  %p4008_p2 = scmp.lt.s32.totalorder %s52_s21, %s52_s21 }
  0x62   :  { %p4004_p1 = scmp.ne.s32.totalorder %s52_s21, %s4003_s0  ;;  %p4009_p3 = scmp.lt.s32.totalorder %s4003_s0, %s4003_s0 }
  0x64   :  { %p4010_p4 = por %p4009_p3, %p4008_p2 }
  0x66   :  { %p4011_p5 = pnand %p4010_p4, %p4004_p1 }
  0x68   :  { %4014 = shalt.err (!%p4011_p5)
}
  0x69   :  { %54 = dma.hbm_to_vmem [thread:$0]  %s4633_s2, 128, %s52_s21, [#allocation6]  }
  0x6a   :  { %s4015_s3 = scalar_lea.hbm %s4635_s4, 64 }
  0x6b   :  { %p4016_p6 = scmp.ne.s32.totalorder %s4635_s4, %s4015_s3  ;;  %p4019_p7 = scmp.lt.u32.totalorder %s4015_s3, %s4635_s4 }
  0x6d   :  { %p4021_p8 = pnand %p4019_p7, %p4016_p6 }
  0x6f   :  { %4024 = shalt.err (!%p4021_p8)
}
  0x70   :  { %s4025_s22 = scalar_lea.vmem %s74_s25, 64  ;;  %p4030_p10 = scmp.lt.s32.totalorder %s74_s25, %s74_s25 }
  0x71   :  { %p4026_p9 = scmp.ne.s32.totalorder %s74_s25, %s4025_s22  ;;  %p4031_p11 = scmp.lt.s32.totalorder %s4025_s22, %s4025_s22 }
  0x73   :  { %p4032_p12 = por %p4031_p11, %p4030_p10 }
  0x75   :  { %p4033_p13 = pnand %p4032_p12, %p4026_p9 }
  0x77   :  { %4036 = shalt.err (!%p4033_p13)
}
  0x78   :  { %76 = dma.hbm_to_vmem [thread:$0]  %s4635_s4, 64, %s74_s25, [#allocation9]  }
  0x79   :  { %s4152_s1 = smov [#allocation13]   ;;  %s4153_s21 = smov [#allocation16]  }
  0x7a   :  { %s95_s18 = sshll.u32 %s4152_s1, 4  ;;  %s117_s24 = sshll.u32 %s4153_s21, 4  ;;  %s96_s18 = int_to_ptr.vmem [resolvable:$true] %s95_s18  ;;  %s118_s24 = int_to_ptr.vmem [resolvable:$true] %s117_s24 }
  0x7b   :  { %s4037_s29 = scalar_lea.hbm %s4637_s6, 32 }
  0x7c   :  { %p4038_p0 = scmp.ne.s32.totalorder %s4637_s6, %s4037_s29  ;;  %p4041_p1 = scmp.lt.u32.totalorder %s4037_s29, %s4637_s6 }
  0x7e   :  { %p4043_p2 = pnand %p4041_p1, %p4038_p0 }
  0x80   :  { %4046 = shalt.err (!%p4043_p2)
}
  0x81   :  { %s4047_s4 = scalar_lea.vmem %s96_s18, 32  ;;  %p4052_p4 = scmp.lt.s32.totalorder %s96_s18, %s96_s18 }
  0x82   :  { %p4048_p3 = scmp.ne.s32.totalorder %s96_s18, %s4047_s4  ;;  %p4053_p5 = scmp.lt.s32.totalorder %s4047_s4, %s4047_s4 }
  0x84   :  { %p4054_p6 = por %p4053_p5, %p4052_p4 }
  0x86   :  { %p4055_p7 = pnand %p4054_p6, %p4048_p3 }
  0x88   :  { %4058 = shalt.err (!%p4055_p7)
}
  0x89   :  { %98 = dma.hbm_to_vmem [thread:$0]  %s4637_s6, 32, %s96_s18, [#allocation12]  }
  0x8a   :  { %s4059_s15 = scalar_lea.hbm %s4639_s8, 64 }
  0x8b   :  { %p4060_p8 = scmp.ne.s32.totalorder %s4639_s8, %s4059_s15  ;;  %p4063_p9 = scmp.lt.u32.totalorder %s4059_s15, %s4639_s8 }
  0x8d   :  { %p4065_p10 = pnand %p4063_p9, %p4060_p8 }
  0x8f   :  { %4068 = shalt.err (!%p4065_p10)
}
  0x90   :  { %s4069_s19 = scalar_lea.vmem %s118_s24, 64  ;;  %p4074_p12 = scmp.lt.s32.totalorder %s118_s24, %s118_s24 }
  0x91   :  { %p4070_p11 = scmp.ne.s32.totalorder %s118_s24, %s4069_s19  ;;  %p4075_p13 = scmp.lt.s32.totalorder %s4069_s19, %s4069_s19 }
  0x93   :  { %p4076_p0 = por %p4075_p13, %p4074_p12 }
  0x95   :  { %p4077_p1 = pnand %p4076_p0, %p4070_p11 }
  0x97   :  { %4080 = shalt.err (!%p4077_p1)
}
  0x98   :  { %120 = dma.hbm_to_vmem [thread:$0]  %s4639_s8, 64, %s118_s24, [#allocation15]  }
  0x99   :  { %s4154_s22 = smov [#allocation17]   ;;  %s4081_s18 = scalar_lea.hbm %s4641_s10, 16 }
  0x9a   :  { %s129_s2 = sshll.u32 %s4154_s22, 4  ;;  %p4082_p2 = scmp.ne.s32.totalorder %s4641_s10, %s4081_s18  ;;  %s130_s2 = int_to_ptr.vmem [resolvable:$true] %s129_s2 }
  0x9b   :  { %p4085_p3 = scmp.lt.u32.totalorder %s4081_s18, %s4641_s10 }
  0x9d   :  { %p4087_p4 = pnand %p4085_p3, %p4082_p2 }
  0x9f   :  { %4090 = shalt.err (!%p4087_p4)
}
  0xa0   :  { %s4091_s30 = scalar_lea.vmem %s130_s2, 16  ;;  %s4095_s8 = scalar_lea.vmem %s130_s2, 32 }
  0xa1   :  { %p4092_p5 = scmp.ne.s32.totalorder %s130_s2, %s4091_s30  ;;  %p4096_p6 = scmp.lt.s32.totalorder %s130_s2, %s130_s2 }
  0xa2   :  { %p4097_p7 = scmp.lt.s32.totalorder %s4095_s8, %s4091_s30 }
  0xa4   :  { %p4098_p8 = por %p4097_p7, %p4096_p6 }
  0xa6   :  { %p4099_p9 = pnand %p4098_p8, %p4092_p5 }
  0xa8   :  { %4102 = shalt.err (!%p4099_p9)
}
  0xa9   :  { %132 = dma.hbm_to_vmem [thread:$0]  %s4641_s10, 16, %s130_s2, [#allocation18]  }
  0xaa   :  { %4125 = dma.done.wait [#allocation3], 64  }
  0xab   :  { %4126 = vsyncadd [#allocation3], 4294967232 }
  0xac   :  { %4127 = dma.done.wait [#allocation6], 32896  }
  0xad   :  { %4128 = vsyncadd [#allocation6], 4294934400 }
  0xae   :  { %4129 = dma.done.wait [#allocation9], 65600  }
  0xaf   :  { %4130 = vsyncadd [#allocation9], 4294901696 }
  0xb0   :  { %4131 = dma.done.wait [#allocation12], 16416  }
  0xb1   :  { %4132 = vsyncadd [#allocation12], 4294950880 }
  0xb2   :  { %4133 = dma.done.wait [#allocation15], 16448  }
  0xb3   :  { %4134 = vsyncadd [#allocation15], 4294950848 }
  0xb4   :  { %4135 = dma.done.wait [#allocation18], 16  }
  0xb5   :  { %4136 = vsyncadd [#allocation18], 4294967280  ;;  %v165_v0 = vld [vmem:[#allocation5 + $0x8] sm:$0xff]  ;;  %v164_v2 = vld [vmem:[#allocation5] sm:$0xff]  ;;  %vm2662_vm0 = vcmask 33792  }
  0xb6   :  { %v173_v1 = vld [vmem:[#allocation5 + $0x48] sm:$0xff]  ;;  %v172_v4 = vld [vmem:[#allocation5 + $0x40] sm:$0xff]  ;;  %v4342_v43 = vld.sshfl [vmem:[#allocation2] sm:$0x33 pattern:$0x76325410] }
  0xb7   :  { %v2756_v3 = vpack.c.bf16 %v173_v1, %v165_v0  ;;  %v181_v5 = vld [vmem:[#allocation5 + $0x88] sm:$0xff]  ;;  %v2758_v7 = vpack.c.bf16 %v172_v4, %v164_v2  ;;  %v180_v9 = vld [vmem:[#allocation5 + $0x80] sm:$0xff]  ;;  %v167_v44 = vld [vmem:[#allocation5 + $0x18] sm:$0xff]  ;;  %v4346_v45 = vcombine.high %v4342_v43, %v4342_v43 }
  0xb8   :  { %v189_v6 = vld [vmem:[#allocation5 + $0xc8] sm:$0xff]  ;;  %v188_v10 = vld [vmem:[#allocation5 + $0xc0] sm:$0xff]  ;;  %v175_v46 = vld [vmem:[#allocation5 + $0x58] sm:$0xff] }
  0xb9   :  { %v2760_v8 = vpack.c.bf16 %v189_v6, %v181_v5  ;;  %v197_v11 = vld [vmem:[#allocation5 + $0x108] sm:$0xff]  ;;  %2757 = vmatprep.subr.bf16.mxu0 %v2756_v3  ;;  %v2762_v13 = vpack.c.bf16 %v188_v10, %v180_v9  ;;  %v196_v15 = vld [vmem:[#allocation5 + $0x100] sm:$0xff]  ;;  %v166_v47 = vld [vmem:[#allocation5 + $0x10] sm:$0xff]  ;;  %v2820_v49 = vpack.c.bf16 %v175_v46, %v167_v44  ;;  %537 = vmatprep.mubr.f32.mxu0 %v4346_v45 }
  0xba   :  { %v205_v12 = vld [vmem:[#allocation5 + $0x148] sm:$0xff]  ;;  %2759 = vmatpush1.bf16.msra.mxu0 %v2758_v7  ;;  %v204_v16 = vld [vmem:[#allocation5 + $0x140] sm:$0xff]  ;;  %v174_v48 = vld [vmem:[#allocation5 + $0x50] sm:$0xff]  ;;  %608 = vmatprep.mubr.f32.mxu1 %v4346_v45 }
  0xbb   :  { %2761 = vmatprep.subr.bf16.mxu0 %v2760_v8  ;;  %v2764_v14 = vpack.c.bf16 %v205_v12, %v197_v11  ;;  %v213_v17 = vld [vmem:[#allocation5 + $0x188] sm:$0xff]  ;;  %v2766_v19 = vpack.c.bf16 %v204_v16, %v196_v15  ;;  %v212_v21 = vld [vmem:[#allocation5 + $0x180] sm:$0xff]  ;;  %v2822_v50 = vpack.c.bf16 %v174_v48, %v166_v47  ;;  %v183_v51 = vld [vmem:[#allocation5 + $0x98] sm:$0xff]  ;;  %2821 = vmatprep.subr.bf16.mxu1 %v2820_v49 }
  0xbc   :  { %v221_v18 = vld [vmem:[#allocation5 + $0x1c8] sm:$0xff]  ;;  %v220_v22 = vld [vmem:[#allocation5 + $0x1c0] sm:$0xff]  ;;  %v191_v52 = vld [vmem:[#allocation5 + $0xd8] sm:$0xff] }
  0xbd   :  { %v2768_v20 = vpack.c.bf16 %v221_v18, %v213_v17  ;;  %v229_v23 = vld [vmem:[#allocation5 + $0x208] sm:$0xff]  ;;  %v2770_v25 = vpack.c.bf16 %v220_v22, %v212_v21  ;;  %v228_v27 = vld [vmem:[#allocation5 + $0x200] sm:$0xff]  ;;  %v182_v53 = vld [vmem:[#allocation5 + $0x90] sm:$0xff]  ;;  %v2824_v55 = vpack.c.bf16 %v191_v52, %v183_v51  ;;  %2823 = vmatpush1.bf16.msra.mxu1 %v2822_v50 }
  0xbe   :  { %2763 = vmatpush1.bf16.msra.mxu0 %v2762_v13  ;;  %v237_v24 = vld [vmem:[#allocation5 + $0x248] sm:$0xff]  ;;  %v236_v28 = vld [vmem:[#allocation5 + $0x240] sm:$0xff]  ;;  %v190_v56 = vld [vmem:[#allocation5 + $0xd0] sm:$0xff] }
  0xbf   :  { %2765 = vmatprep.subr.bf16.mxu0 %v2764_v14  ;;  %v2772_v26 = vpack.c.bf16 %v237_v24, %v229_v23  ;;  %v245_v29 = vld [vmem:[#allocation5 + $0x288] sm:$0xff]  ;;  %v2774_v31 = vpack.c.bf16 %v236_v28, %v228_v27  ;;  %v244_v33 = vld [vmem:[#allocation5 + $0x280] sm:$0xff]  ;;  %v199_v57 = vld [vmem:[#allocation5 + $0x118] sm:$0xff]  ;;  %v2826_v0 = vpack.c.bf16 %v190_v56, %v182_v53  ;;  %2825 = vmatprep.subr.bf16.mxu1 %v2824_v55 }
  0xc0   :  { %v253_v30 = vld [vmem:[#allocation5 + $0x2c8] sm:$0xff]  ;;  %v252_v34 = vld [vmem:[#allocation5 + $0x2c0] sm:$0xff]  ;;  %v207_v58 = vld [vmem:[#allocation5 + $0x158] sm:$0xff] }
  0xc1   :  { %v2776_v32 = vpack.c.bf16 %v253_v30, %v245_v29  ;;  %v261_v35 = vld [vmem:[#allocation5 + $0x308] sm:$0xff]  ;;  %v2778_v37 = vpack.c.bf16 %v252_v34, %v244_v33  ;;  %v260_v38 = vld [vmem:[#allocation5 + $0x300] sm:$0xff]  ;;  %v2828_v1 = vpack.c.bf16 %v207_v58, %v199_v57  ;;  %v198_v2 = vld [vmem:[#allocation5 + $0x110] sm:$0xff]  ;;  %2827 = vmatpush1.bf16.msra.mxu1 %v2826_v0 }
  0xc2   :  { %2767 = vmatpush1.bf16.msra.mxu0 %v2766_v19  ;;  %v269_v36 = vld [vmem:[#allocation5 + $0x348] sm:$0xff]  ;;  %v268_v39 = vld [vmem:[#allocation5 + $0x340] sm:$0xff]  ;;  %v206_v3 = vld [vmem:[#allocation5 + $0x150] sm:$0xff] }
  0xc3   :  { %2769 = vmatprep.subr.bf16.mxu0 %v2768_v20  ;;  %v277_v40 = vld [vmem:[#allocation5 + $0x388] sm:$0xff]  ;;  %v2780_v41 = vpack.c.bf16 %v269_v36, %v261_v35  ;;  %v2782_v54 = vpack.c.bf16 %v268_v39, %v260_v38  ;;  %v276_v60 = vld [vmem:[#allocation5 + $0x380] sm:$0xff]  ;;  %v215_v5 = vld [vmem:[#allocation5 + $0x198] sm:$0xff]  ;;  %v2830_v12 = vpack.c.bf16 %v206_v3, %v198_v2  ;;  %2829 = vmatprep.subr.bf16.mxu1 %v2828_v1 }
  0xc4   :  { %v285_v42 = vld [vmem:[#allocation5 + $0x3c8] sm:$0xff]  ;;  %v284_v61 = vld [vmem:[#allocation5 + $0x3c0] sm:$0xff]  ;;  %v223_v6 = vld [vmem:[#allocation5 + $0x1d8] sm:$0xff] }
  0xc5   :  { %v2784_v59 = vpack.c.bf16 %v285_v42, %v277_v40  ;;  %v293_v62 = vld [vmem:[#allocation5 + $0x408] sm:$0xff]  ;;  %v2786_v4 = vpack.c.bf16 %v284_v61, %v276_v60  ;;  %v292_v8 = vld [vmem:[#allocation5 + $0x400] sm:$0xff]  ;;  %v2832_v13 = vpack.c.bf16 %v223_v6, %v215_v5  ;;  %v214_v14 = vld [vmem:[#allocation5 + $0x190] sm:$0xff]  ;;  %2831 = vmatpush1.bf16.msra.mxu1 %v2830_v12 }
  0xc6   :  { %2771 = vmatpush1.bf16.msra.mxu0 %v2770_v25  ;;  %v301_v63 = vld [vmem:[#allocation5 + $0x448] sm:$0xff]  ;;  %v300_v9 = vld [vmem:[#allocation5 + $0x440] sm:$0xff]  ;;  %v222_v15 = vld [vmem:[#allocation5 + $0x1d0] sm:$0xff] }
  0xc7   :  { %2773 = vmatprep.subr.bf16.mxu0 %v2772_v26  ;;  %v2788_v7 = vpack.c.bf16 %v301_v63, %v293_v62  ;;  %v309_v10 = vld [vmem:[#allocation5 + $0x488] sm:$0xff]  ;;  %v2790_v16 = vpack.c.bf16 %v300_v9, %v292_v8  ;;  %v231_v17 = vld [vmem:[#allocation5 + $0x218] sm:$0xff]  ;;  %v308_v20 = vld [vmem:[#allocation5 + $0x480] sm:$0xff]  ;;  %v2834_v24 = vpack.c.bf16 %v222_v15, %v214_v14  ;;  %2833 = vmatprep.subr.bf16.mxu1 %v2832_v13 }
  0xc8   :  { %v317_v11 = vld [vmem:[#allocation5 + $0x4c8] sm:$0xff]  ;;  %v239_v18 = vld [vmem:[#allocation5 + $0x258] sm:$0xff]  ;;  %v316_v21 = vld [vmem:[#allocation5 + $0x4c0] sm:$0xff] }
  0xc9   :  { %v2792_v19 = vpack.c.bf16 %v317_v11, %v309_v10  ;;  %v325_v22 = vld [vmem:[#allocation5 + $0x508] sm:$0xff]  ;;  %v2836_v25 = vpack.c.bf16 %v239_v18, %v231_v17  ;;  %v230_v26 = vld [vmem:[#allocation5 + $0x210] sm:$0xff]  ;;  %v2794_v28 = vpack.c.bf16 %v316_v21, %v308_v20  ;;  %v247_v29 = vld [vmem:[#allocation5 + $0x298] sm:$0xff]  ;;  %2835 = vmatpush1.bf16.msra.mxu1 %v2834_v24 }
  0xca   :  { %2775 = vmatpush1.bf16.msra.mxu0 %v2774_v31  ;;  %v333_v23 = vld [vmem:[#allocation5 + $0x548] sm:$0xff]  ;;  %v238_v27 = vld [vmem:[#allocation5 + $0x250] sm:$0xff]  ;;  %v255_v30 = vld [vmem:[#allocation5 + $0x2d8] sm:$0xff] }
  0xcb   :  { %2777 = vmatprep.subr.bf16.mxu0 %v2776_v32  ;;  %v2796_v31 = vpack.c.bf16 %v333_v23, %v325_v22  ;;  %v324_v32 = vld [vmem:[#allocation5 + $0x500] sm:$0xff]  ;;  %v341_v34 = vld [vmem:[#allocation5 + $0x588] sm:$0xff]  ;;  %v2838_v36 = vpack.c.bf16 %v238_v27, %v230_v26  ;;  %2837 = vmatprep.subr.bf16.mxu1 %v2836_v25  ;;  %v246_v38 = vld [vmem:[#allocation5 + $0x290] sm:$0xff] }
  0xcc   :  { %v332_v33 = vld [vmem:[#allocation5 + $0x540] sm:$0xff]  ;;  %v349_v35 = vld [vmem:[#allocation5 + $0x5c8] sm:$0xff]  ;;  %v254_v39 = vld [vmem:[#allocation5 + $0x2d0] sm:$0xff] }
  0xcd   :  { %v2798_v40 = vpack.c.bf16 %v332_v33, %v324_v32  ;;  %v271_v42 = vld [vmem:[#allocation5 + $0x358] sm:$0xff]  ;;  %v2800_v44 = vpack.c.bf16 %v349_v35, %v341_v34  ;;  %v340_v46 = vld [vmem:[#allocation5 + $0x580] sm:$0xff]  ;;  %v357_v48 = vld [vmem:[#allocation5 + $0x608] sm:$0xff]  ;;  %2839 = vmatpush1.bf16.msra.mxu1 %v2838_v36  ;;  %v2842_v50 = vpack.c.bf16 %v254_v39, %v246_v38 }
  0xce   :  { %2779 = vmatpush1.bf16.msra.mxu0 %v2778_v37  ;;  %v2840_v37 = vpack.c.bf16 %v255_v30, %v247_v29  ;;  %v348_v47 = vld [vmem:[#allocation5 + $0x5c0] sm:$0xff]  ;;  %v365_v49 = vld [vmem:[#allocation5 + $0x648] sm:$0xff]  ;;  %v262_v52 = vld [vmem:[#allocation5 + $0x310] sm:$0xff] }
  0xcf   :  { %2781 = vmatprep.subr.bf16.mxu0 %v2780_v41  ;;  %v263_v41 = vld [vmem:[#allocation5 + $0x318] sm:$0xff]  ;;  %v270_v53 = vld [vmem:[#allocation5 + $0x350] sm:$0xff]  ;;  %v2804_v57 = vpack.c.bf16 %v365_v49, %v357_v48  ;;  %v356_v58 = vld [vmem:[#allocation5 + $0x600] sm:$0xff] }
  0xd0   :  { %2841 = vmatprep.subr.bf16.mxu1 %v2840_v37  ;;  %v2844_v51 = vpack.c.bf16 %v271_v42, %v263_v41  ;;  %v279_v55 = vld [vmem:[#allocation5 + $0x398] sm:$0xff]  ;;  %v373_v60 = vld [vmem:[#allocation5 + $0x688] sm:$0xff]  ;;  %v2846_v62 = vpack.c.bf16 %v270_v53, %v262_v52  ;;  %v278_v0 = vld [vmem:[#allocation5 + $0x390] sm:$0xff] }
  0xd1   :  { %v287_v56 = vld [vmem:[#allocation5 + $0x3d8] sm:$0xff]  ;;  %v381_v61 = vld [vmem:[#allocation5 + $0x6c8] sm:$0xff]  ;;  %2843 = vmatpush1.bf16.msra.mxu1 %v2842_v50  ;;  %v286_v1 = vld [vmem:[#allocation5 + $0x3d0] sm:$0xff] }
  0xd2   :  { %2783 = vmatpush1.bf16.msra.mxu0 %v2782_v54  ;;  %v2802_v54 = vpack.c.bf16 %v348_v47, %v340_v46  ;;  %2845 = vmatprep.subr.bf16.mxu1 %v2844_v51  ;;  %v2848_v63 = vpack.c.bf16 %v287_v56, %v279_v55  ;;  %v295_v3 = vld [vmem:[#allocation5 + $0x418] sm:$0xff]  ;;  %v2808_v5 = vpack.c.bf16 %v381_v61, %v373_v60  ;;  %v372_v6 = vld [vmem:[#allocation5 + $0x680] sm:$0xff]  ;;  %v389_v8 = vld [vmem:[#allocation5 + $0x708] sm:$0xff] }
  0xd3   :  { %2785 = vmatprep.subr.bf16.mxu0 %v2784_v59  ;;  %v364_v59 = vld [vmem:[#allocation5 + $0x640] sm:$0xff]  ;;  %v397_v9 = vld [vmem:[#allocation5 + $0x748] sm:$0xff]  ;;  %v2850_v10 = vpack.c.bf16 %v286_v1, %v278_v0  ;;  %v294_v12 = vld [vmem:[#allocation5 + $0x410] sm:$0xff] }
  0xd4   :  { %v2806_v2 = vpack.c.bf16 %v364_v59, %v356_v58  ;;  %v302_v13 = vld [vmem:[#allocation5 + $0x450] sm:$0xff]  ;;  %v311_v15 = vld [vmem:[#allocation5 + $0x498] sm:$0xff]  ;;  %v2812_v17 = vpack.c.bf16 %v397_v9, %v389_v8  ;;  %v388_v18 = vld [vmem:[#allocation5 + $0x700] sm:$0xff] }
  0xd5   :  { %2847 = vmatpush1.bf16.msra.mxu1 %v2846_v62  ;;  %v405_v20 = vld [vmem:[#allocation5 + $0x788] sm:$0xff]  ;;  %v2854_v22 = vpack.c.bf16 %v302_v13, %v294_v12  ;;  %v310_v24 = vld [vmem:[#allocation5 + $0x490] sm:$0xff]  ;;  %v327_v27 = vld [vmem:[#allocation5 + $0x518] sm:$0xff] }
  0xd6   :  { %2787 = vmatpush1.bf16.msra.mxu0 %v2786_v4  ;;  %v303_v4 = vld [vmem:[#allocation5 + $0x458] sm:$0xff]  ;;  %2849 = vmatprep.subr.bf16.mxu1 %v2848_v63  ;;  %v413_v21 = vld [vmem:[#allocation5 + $0x7c8] sm:$0xff]  ;;  %v318_v25 = vld [vmem:[#allocation5 + $0x4d0] sm:$0xff] }
  0xd7   :  { %2789 = vmatprep.subr.bf16.mxu0 %v2788_v7  ;;  %v380_v7 = vld [vmem:[#allocation5 + $0x6c0] sm:$0xff]  ;;  %v2852_v11 = vpack.c.bf16 %v303_v4, %v295_v3  ;;  %v2816_v29 = vpack.c.bf16 %v413_v21, %v405_v20  ;;  %v2858_v32 = vpack.c.bf16 %v318_v25, %v310_v24  ;;  %v169_v33 = vld [vmem:[#allocation5 + $0x28] sm:$0xff]  ;;  %v326_v36 = vld [vmem:[#allocation5 + $0x510] sm:$0xff] }
  0xd8   :  { %v2810_v14 = vpack.c.bf16 %v380_v7, %v372_v6  ;;  %v404_v30 = vld [vmem:[#allocation5 + $0x780] sm:$0xff]  ;;  %v177_v34 = vld [vmem:[#allocation5 + $0x68] sm:$0xff]  ;;  %v334_v37 = vld [vmem:[#allocation5 + $0x550] sm:$0xff] }
  0xd9   :  { %2851 = vmatpush1.bf16.msra.mxu1 %v2850_v10  ;;  %v343_v39 = vld [vmem:[#allocation5 + $0x598] sm:$0xff]  ;;  %v2884_v41 = vpack.c.bf16 %v177_v34, %v169_v33  ;;  %v168_v42 = vld [vmem:[#allocation5 + $0x20] sm:$0xff]  ;;  %v2862_v46 = vpack.c.bf16 %v334_v37, %v326_v36  ;;  %v185_v47 = vld [vmem:[#allocation5 + $0xa8] sm:$0xff] }
  0xda   :  { %2791 = vmatpush1.bf16.msra.mxu0 %v2790_v16  ;;  %v319_v16 = vld [vmem:[#allocation5 + $0x4d8] sm:$0xff]  ;;  %2853 = vmatprep.subr.bf16.mxu1 %v2852_v11  ;;  %v193_v48 = vld [vmem:[#allocation5 + $0xe8] sm:$0xff]  ;;  %v342_v50 = vld [vmem:[#allocation5 + $0x590] sm:$0xff] }
  0xdb   :  { %2793 = vmatprep.subr.bf16.mxu0 %v2792_v19  ;;  %v396_v19 = vld [vmem:[#allocation5 + $0x740] sm:$0xff]  ;;  %v2856_v23 = vpack.c.bf16 %v319_v16, %v311_v15  ;;  %v350_v51 = vld [vmem:[#allocation5 + $0x5d0] sm:$0xff]  ;;  %v359_v52 = vld [vmem:[#allocation5 + $0x618] sm:$0xff]  ;;  %v2888_v55 = vpack.c.bf16 %v193_v48, %v185_v47 }
  0xdc   :  { %v2814_v26 = vpack.c.bf16 %v396_v19, %v388_v18  ;;  %v367_v53 = vld [vmem:[#allocation5 + $0x658] sm:$0xff]  ;;  %v184_v56 = vld [vmem:[#allocation5 + $0xa0] sm:$0xff]  ;;  %v2866_v58 = vpack.c.bf16 %v350_v51, %v342_v50  ;;  %v201_v59 = vld [vmem:[#allocation5 + $0x128] sm:$0xff] }
  0xdd   :  { %2855 = vmatpush1.bf16.msra.mxu1 %v2854_v22  ;;  %v209_v60 = vld [vmem:[#allocation5 + $0x168] sm:$0xff]  ;;  %v2868_v61 = vpack.c.bf16 %v367_v53, %v359_v52  ;;  %v358_v62 = vld [vmem:[#allocation5 + $0x610] sm:$0xff]  ;;  %v375_v0 = vld [vmem:[#allocation5 + $0x698] sm:$0xff] }
  0xde   :  { %2795 = vmatpush1.bf16.msra.mxu0 %v2794_v28  ;;  %v335_v28 = vld [vmem:[#allocation5 + $0x558] sm:$0xff]  ;;  %2857 = vmatprep.subr.bf16.mxu1 %v2856_v23  ;;  %v366_v63 = vld [vmem:[#allocation5 + $0x650] sm:$0xff]  ;;  %v2892_v3 = vpack.c.bf16 %v209_v60, %v201_v59  ;;  %v200_v4 = vld [vmem:[#allocation5 + $0x120] sm:$0xff] }
  0xdf   :  { %2797 = vmatprep.subr.bf16.mxu0 %v2796_v31  ;;  %v412_v31 = vld [vmem:[#allocation5 + $0x7c0] sm:$0xff]  ;;  %v2860_v35 = vpack.c.bf16 %v335_v28, %v327_v27  ;;  %v383_v1 = vld [vmem:[#allocation5 + $0x6d8] sm:$0xff]  ;;  %v2870_v6 = vpack.c.bf16 %v366_v63, %v358_v62  ;;  %v217_v7 = vld [vmem:[#allocation5 + $0x1a8] sm:$0xff] }
  0xe0   :  { %v2818_v38 = vpack.c.bf16 %v412_v31, %v404_v30  ;;  %v225_v8 = vld [vmem:[#allocation5 + $0x1e8] sm:$0xff]  ;;  %v2872_v9 = vpack.c.bf16 %v383_v1, %v375_v0  ;;  %v374_v10 = vld [vmem:[#allocation5 + $0x690] sm:$0xff]  ;;  %v391_v12 = vld [vmem:[#allocation5 + $0x718] sm:$0xff] }
  0xe1   :  { %2859 = vmatpush1.bf16.msra.mxu1 %v2858_v32  ;;  %v382_v11 = vld [vmem:[#allocation5 + $0x6d0] sm:$0xff]  ;;  %v399_v13 = vld [vmem:[#allocation5 + $0x758] sm:$0xff]  ;;  %v2896_v15 = vpack.c.bf16 %v225_v8, %v217_v7  ;;  %v216_v16 = vld [vmem:[#allocation5 + $0x1a0] sm:$0xff] }
  0xe2   :  { %2799 = vmatpush1.bf16.msra.mxu0 %v2798_v40  ;;  %v351_v40 = vld [vmem:[#allocation5 + $0x5d8] sm:$0xff]  ;;  %2861 = vmatprep.subr.bf16.mxu1 %v2860_v35  ;;  %v2874_v18 = vpack.c.bf16 %v382_v11, %v374_v10  ;;  %v233_v19 = vld [vmem:[#allocation5 + $0x228] sm:$0xff]  ;;  %v2876_v21 = vpack.c.bf16 %v399_v13, %v391_v12  ;;  %v390_v22 = vld [vmem:[#allocation5 + $0x710] sm:$0xff] }
  0xe3   :  { %2801 = vmatprep.subr.bf16.mxu0 %v2800_v44  ;;  %v176_v44 = vld [vmem:[#allocation5 + $0x60] sm:$0xff]  ;;  %v2864_v49 = vpack.c.bf16 %v351_v40, %v343_v39  ;;  %v241_v20 = vld [vmem:[#allocation5 + $0x268] sm:$0xff]  ;;  %v398_v23 = vld [vmem:[#allocation5 + $0x750] sm:$0xff] }
  0xe4   :  { %v407_v24 = vld [vmem:[#allocation5 + $0x798] sm:$0xff]  ;;  %v2900_v27 = vpack.c.bf16 %v241_v20, %v233_v19  ;;  %v232_v28 = vld [vmem:[#allocation5 + $0x220] sm:$0xff]  ;;  %v2878_v30 = vpack.c.bf16 %v398_v23, %v390_v22  ;;  %v249_v31 = vld [vmem:[#allocation5 + $0x2a8] sm:$0xff] }
  0xe5   :  { %2863 = vmatpush1.bf16.msra.mxu1 %v2862_v46  ;;  %v415_v25 = vld [vmem:[#allocation5 + $0x7d8] sm:$0xff]  ;;  %v257_v32 = vld [vmem:[#allocation5 + $0x2e8] sm:$0xff]  ;;  %v406_v34 = vld [vmem:[#allocation5 + $0x790] sm:$0xff] }
  0xe6   :  { %2803 = vmatpush1.bf16.msra.mxu0 %v2802_v54  ;;  %v2886_v54 = vpack.c.bf16 %v176_v44, %v168_v42  ;;  %2865 = vmatprep.subr.bf16.mxu1 %v2864_v49  ;;  %v2880_v33 = vpack.c.bf16 %v415_v25, %v407_v24  ;;  %v414_v35 = vld [vmem:[#allocation5 + $0x7d0] sm:$0xff]  ;;  %v171_v37 = vld [vmem:[#allocation5 + $0x38] sm:$0xff]  ;;  %v2904_v39 = vpack.c.bf16 %v257_v32, %v249_v31  ;;  %v248_v40 = vld [vmem:[#allocation5 + $0x2a0] sm:$0xff] }
  0xe7   :  { %2805 = vmatprep.subr.bf16.mxu0 %v2804_v57  ;;  %v192_v57 = vld [vmem:[#allocation5 + $0xe0] sm:$0xff]  ;;  %v2882_v42 = vpack.c.bf16 %v414_v35, %v406_v34  ;;  %v265_v44 = vld [vmem:[#allocation5 + $0x328] sm:$0xff]  ;;  %v170_v48 = vld [vmem:[#allocation5 + $0x30] sm:$0xff] }
  0xe8   :  { %v273_v46 = vld [vmem:[#allocation5 + $0x368] sm:$0xff]  ;;  %v178_v49 = vld [vmem:[#allocation5 + $0x70] sm:$0xff]  ;;  %v187_v51 = vld [vmem:[#allocation5 + $0xb8] sm:$0xff] }
  0xe9   :  { %2867 = vmatpush1.bf16.msra.mxu1 %v2866_v58  ;;  %v195_v52 = vld [vmem:[#allocation5 + $0xf8] sm:$0xff]  ;;  %v2908_v53 = vpack.c.bf16 %v273_v46, %v265_v44  ;;  %v289_v58 = vld [vmem:[#allocation5 + $0x3e8] sm:$0xff]  ;;  %v186_v60 = vld [vmem:[#allocation5 + $0xb0] sm:$0xff] }
  0xea   :  { %2807 = vmatpush1.bf16.msra.mxu0 %v2806_v2  ;;  %v2890_v2 = vpack.c.bf16 %v192_v57, %v184_v56  ;;  %2869 = vmatprep.subr.bf16.mxu1 %v2868_v61  ;;  %v2950_v56 = vpack.c.bf16 %v178_v49, %v170_v48  ;;  %v281_v57 = vld [vmem:[#allocation5 + $0x3a8] sm:$0xff]  ;;  %v2952_v59 = vpack.c.bf16 %v195_v52, %v187_v51  ;;  %v194_v61 = vld [vmem:[#allocation5 + $0xf0] sm:$0xff]  ;;  %v203_v63 = vld [vmem:[#allocation5 + $0x138] sm:$0xff] }
  0xeb   :  { %2809 = vmatprep.subr.bf16.mxu0 %v2808_v5  ;;  %v208_v5 = vld [vmem:[#allocation5 + $0x160] sm:$0xff]  ;;  %v211_v0 = vld [vmem:[#allocation5 + $0x178] sm:$0xff]  ;;  %v2912_v1 = vpack.c.bf16 %v289_v58, %v281_v57  ;;  %v202_v8 = vld [vmem:[#allocation5 + $0x130] sm:$0xff] }
  0xec   :  { %v2956_v7 = vpack.c.bf16 %v211_v0, %v203_v63  ;;  %v219_v11 = vld [vmem:[#allocation5 + $0x1b8] sm:$0xff]  ;;  %v218_v20 = vld [vmem:[#allocation5 + $0x1b0] sm:$0xff]  ;;  %v312_v25 = vld [vmem:[#allocation5 + $0x4a0] sm:$0xff] }
  0xed   :  { %2871 = vmatpush1.bf16.msra.mxu1 %v2870_v6  ;;  %v305_v6 = vld [vmem:[#allocation5 + $0x468] sm:$0xff]  ;;  %v227_v12 = vld [vmem:[#allocation5 + $0x1f8] sm:$0xff]  ;;  %v234_v31 = vld [vmem:[#allocation5 + $0x230] sm:$0xff] }
  0xee   :  { %2811 = vmatpush1.bf16.msra.mxu0 %v2810_v14  ;;  %v2894_v14 = vpack.c.bf16 %v208_v5, %v200_v4  ;;  %2873 = vmatprep.subr.bf16.mxu1 %v2872_v9  ;;  %v2954_v4 = vpack.c.bf16 %v194_v61, %v186_v60  ;;  %v297_v5 = vld [vmem:[#allocation5 + $0x428] sm:$0xff]  ;;  %v210_v9 = vld [vmem:[#allocation5 + $0x170] sm:$0xff]  ;;  %v2960_v19 = vpack.c.bf16 %v227_v12, %v219_v11  ;;  %v235_v22 = vld [vmem:[#allocation5 + $0x238] sm:$0xff] }
  0xef   :  { %2813 = vmatprep.subr.bf16.mxu0 %v2812_v17  ;;  %v224_v17 = vld [vmem:[#allocation5 + $0x1e0] sm:$0xff]  ;;  %v2916_v13 = vpack.c.bf16 %v305_v6, %v297_v5  ;;  %v243_v23 = vld [vmem:[#allocation5 + $0x278] sm:$0xff]  ;;  %v242_v32 = vld [vmem:[#allocation5 + $0x270] sm:$0xff] }
  0xf0   :  { %v251_v34 = vld [vmem:[#allocation5 + $0x2b8] sm:$0xff]  ;;  %v250_v44 = vld [vmem:[#allocation5 + $0x2b0] sm:$0xff]  ;;  %v344_v51 = vld [vmem:[#allocation5 + $0x5a0] sm:$0xff] }
  0xf1   :  { %2875 = vmatpush1.bf16.msra.mxu1 %v2874_v18  ;;  %v321_v18 = vld [vmem:[#allocation5 + $0x4e8] sm:$0xff]  ;;  %v259_v35 = vld [vmem:[#allocation5 + $0x2f8] sm:$0xff]  ;;  %v258_v46 = vld [vmem:[#allocation5 + $0x2f0] sm:$0xff] }
  0xf2   :  { %2815 = vmatpush1.bf16.msra.mxu0 %v2814_v26  ;;  %v2898_v26 = vpack.c.bf16 %v224_v17, %v216_v16  ;;  %2877 = vmatprep.subr.bf16.mxu1 %v2876_v21  ;;  %v2958_v16 = vpack.c.bf16 %v210_v9, %v202_v8  ;;  %v313_v17 = vld [vmem:[#allocation5 + $0x4a8] sm:$0xff]  ;;  %v267_v48 = vld [vmem:[#allocation5 + $0x338] sm:$0xff]  ;;  %v352_v52 = vld [vmem:[#allocation5 + $0x5e0] sm:$0xff] }
  0xf3   :  { %2817 = vmatprep.subr.bf16.mxu0 %v2816_v29  ;;  %v240_v29 = vld [vmem:[#allocation5 + $0x260] sm:$0xff]  ;;  %v2920_v24 = vpack.c.bf16 %v321_v18, %v313_v17  ;;  %v275_v49 = vld [vmem:[#allocation5 + $0x378] sm:$0xff]  ;;  %v266_v57 = vld [vmem:[#allocation5 + $0x330] sm:$0xff] }
  0xf4   :  { %v2902_v36 = vpack.c.bf16 %v240_v29, %v232_v28  ;;  %v329_v28 = vld [vmem:[#allocation5 + $0x528] sm:$0xff]  ;;  %v274_v58 = vld [vmem:[#allocation5 + $0x370] sm:$0xff]  ;;  %v283_v60 = vld [vmem:[#allocation5 + $0x3b8] sm:$0xff] }
  0xf5   :  { %2879 = vmatpush1.bf16.msra.mxu1 %v2878_v30  ;;  %v337_v29 = vld [vmem:[#allocation5 + $0x568] sm:$0xff]  ;;  %v2964_v30 = vpack.c.bf16 %v243_v23, %v235_v22  ;;  %v291_v61 = vld [vmem:[#allocation5 + $0x3f8] sm:$0xff]  ;;  %v360_v63 = vld [vmem:[#allocation5 + $0x620] sm:$0xff] }
  0xf6   :  { %2819 = vmatpush1.bf16.msra.mxu0 %v2818_v38  ;;  %v179_v38 = vld [vmem:[#allocation5 + $0x78] sm:$0xff]  ;;  %2881 = vmatprep.subr.bf16.mxu1 %v2880_v33  ;;  %v368_v0 = vld [vmem:[#allocation5 + $0x660] sm:$0xff]  ;;  %v282_v5 = vld [vmem:[#allocation5 + $0x3b0] sm:$0xff] }
  0xf7   :  { %2885 = vmatprep.subr.bf16.mxu0 %v2884_v41  ;;  %v256_v41 = vld [vmem:[#allocation5 + $0x2e0] sm:$0xff]  ;;  %v2948_v47 = vpack.c.bf16 %v179_v38, %v171_v37  ;;  %v290_v6 = vld [vmem:[#allocation5 + $0x3f0] sm:$0xff]  ;;  %v299_v8 = vld [vmem:[#allocation5 + $0x438] sm:$0xff] }
  0xf8   :  { %v2906_v50 = vpack.c.bf16 %v256_v41, %v248_v40  ;;  %v328_v37 = vld [vmem:[#allocation5 + $0x520] sm:$0xff]  ;;  %v345_v40 = vld [vmem:[#allocation5 + $0x5a8] sm:$0xff]  ;;  %v307_v9 = vld [vmem:[#allocation5 + $0x478] sm:$0xff] }
  0xf9   :  { %538 = vmatmul.mubr.f32.vlgmr.msra.gmra.mrb[0].mxu0 %v4342_v43  ;;  %2883 = vmatpush1.bf16.msra.mxu1 %v2882_v42  ;;  %v336_v38 = vld [vmem:[#allocation5 + $0x560] sm:$0xff]  ;;  %v353_v41 = vld [vmem:[#allocation5 + $0x5e8] sm:$0xff]  ;;  %v2968_v42 = vpack.c.bf16 %v259_v35, %v251_v34  ;;  %v298_v17 = vld [vmem:[#allocation5 + $0x430] sm:$0xff] }
  0xfa   :  { %2887 = vmatpush1.bf16.msra.mxu0 %v2886_v54  ;;  %679 = vmatprep.mubr.f32.mxu0 %v4346_v45  ;;  %v264_v54 = vld [vmem:[#allocation5 + $0x320] sm:$0xff]  ;;  %v306_v18 = vld [vmem:[#allocation5 + $0x470] sm:$0xff] }
  0xfb   :  { %2889 = vmatprep.subr.bf16.mxu0 %v2888_v55  ;;  %v272_v55 = vld [vmem:[#allocation5 + $0x360] sm:$0xff]  ;;  %2949 = vmatprep.subr.bf16.mxu1 %v2948_v47  ;;  %v2926_v47 = vpack.c.bf16 %v336_v38, %v328_v37  ;;  %v766_v37 = vld [vmem:[#allocation8 + $0x8] sm:$0xff] }
  0xfc   :  { %v2910_v62 = vpack.c.bf16 %v272_v55, %v264_v54  ;;  %609 = vmatmul.mubr.f32.vlgmr.msra.gmra.mrb[0].mxu1 %v4342_v43  ;;  %v361_v54 = vld [vmem:[#allocation5 + $0x628] sm:$0xff]  ;;  %v376_v11 = vld [vmem:[#allocation5 + $0x6a0] sm:$0xff]  ;;  %v770_v38 = vld [vmem:[#allocation8 + $0x28] sm:$0xff] }
  0xfd   :  { %2951 = vmatpush1.bf16.msra.mxu1 %v2950_v56  ;;  %750 = vmatprep.mubr.f32.mxu1 %v4346_v45  ;;  %v226_v45 = vld [vmem:[#allocation5 + $0x1f0] sm:$0xff]  ;;  %v369_v55 = vld [vmem:[#allocation5 + $0x668] sm:$0xff]  ;;  %v2972_v56 = vpack.c.bf16 %v275_v49, %v267_v48  ;;  %v384_v12 = vld [vmem:[#allocation5 + $0x6e0] sm:$0xff] }
  0xfe   :  { %2891 = vmatpush1.bf16.msra.mxu0 %v2890_v2  ;;  %v280_v2 = vld [vmem:[#allocation5 + $0x3a0] sm:$0xff]  ;;  %2953 = vmatprep.subr.bf16.mxu1 %v2952_v59  ;;  %v2930_v59 = vpack.c.bf16 %v352_v52, %v344_v51  ;;  %v765_v48 = vld [vmem:[#allocation8] sm:$0xff]  ;;  %v774_v51 = vld [vmem:[#allocation8 + $0x48] sm:$0xff] }
  0xff   :  { %2893 = vmatprep.subr.bf16.mxu0 %v2892_v3  ;;  %v288_v3 = vld [vmem:[#allocation5 + $0x3e0] sm:$0xff]  ;;  %v769_v49 = vld [vmem:[#allocation8 + $0x20] sm:$0xff]  ;;  %v778_v52 = vld [vmem:[#allocation8 + $0x68] sm:$0xff] }
 0x100   :  { %v2914_v10 = vpack.c.bf16 %v288_v3, %v280_v2  ;;  %v377_v2 = vld [vmem:[#allocation5 + $0x6a8] sm:$0xff]  ;;  %v392_v22 = vld [vmem:[#allocation5 + $0x720] sm:$0xff] }
 0x101   :  { %2955 = vmatpush1.bf16.msra.mxu1 %v2954_v4  ;;  %v385_v3 = vld [vmem:[#allocation5 + $0x6e8] sm:$0xff]  ;;  %v2976_v4 = vpack.c.bf16 %v291_v61, %v283_v60  ;;  %v400_v23 = vld [vmem:[#allocation5 + $0x760] sm:$0xff] }
 0x102   :  { %2895 = vmatpush1.bf16.msra.mxu0 %v2894_v14  ;;  %v296_v14 = vld [vmem:[#allocation5 + $0x420] sm:$0xff]  ;;  %2957 = vmatprep.subr.bf16.mxu1 %v2956_v7  ;;  %v2934_v7 = vpack.c.bf16 %v368_v0, %v360_v63  ;;  %v773_v60 = vld [vmem:[#allocation8 + $0x40] sm:$0xff]  ;;  %v782_v63 = vld [vmem:[#allocation8 + $0x88] sm:$0xff] }
 0x103   :  { %2897 = vmatprep.subr.bf16.mxu0 %v2896_v15  ;;  %v304_v15 = vld [vmem:[#allocation5 + $0x460] sm:$0xff]  ;;  %v777_v61 = vld [vmem:[#allocation8 + $0x60] sm:$0xff]  ;;  %v786_v0 = vld [vmem:[#allocation8 + $0xa8] sm:$0xff] }
 0x104   :  { %v2918_v21 = vpack.c.bf16 %v304_v15, %v296_v14  ;;  %v393_v14 = vld [vmem:[#allocation5 + $0x728] sm:$0xff]  ;;  %v408_v34 = vld [vmem:[#allocation5 + $0x7a0] sm:$0xff] }
 0x105   :  { %2959 = vmatpush1.bf16.msra.mxu1 %v2958_v16  ;;  %v401_v15 = vld [vmem:[#allocation5 + $0x768] sm:$0xff]  ;;  %v2980_v16 = vpack.c.bf16 %v307_v9, %v299_v8  ;;  %v416_v35 = vld [vmem:[#allocation5 + $0x7e0] sm:$0xff] }
 0x106   :  { %2899 = vmatpush1.bf16.msra.mxu0 %v2898_v26  ;;  %v320_v26 = vld [vmem:[#allocation5 + $0x4e0] sm:$0xff]  ;;  %2961 = vmatprep.subr.bf16.mxu1 %v2960_v19  ;;  %v2938_v19 = vpack.c.bf16 %v384_v12, %v376_v11  ;;  %v781_v8 = vld [vmem:[#allocation8 + $0x80] sm:$0xff]  ;;  %v790_v11 = vld [vmem:[#allocation8 + $0xc8] sm:$0xff] }
 0x107   :  { %2901 = vmatprep.subr.bf16.mxu0 %v2900_v27  ;;  %v2962_v27 = vpack.c.bf16 %v226_v45, %v218_v20  ;;  %v2922_v33 = vpack.c.bf16 %v320_v26, %v312_v25  ;;  %v315_v20 = vld [vmem:[#allocation5 + $0x4b8] sm:$0xff]  ;;  %v409_v25 = vld [vmem:[#allocation5 + $0x7a8] sm:$0xff]  ;;  %v794_v12 = vld [vmem:[#allocation8 + $0xe8] sm:$0xff] }
 0x108   :  { %v323_v45 = vld [vmem:[#allocation5 + $0x4f8] sm:$0xff]  ;;  %v417_v26 = vld [vmem:[#allocation5 + $0x7e8] sm:$0xff] }
 0x109   :  { %2963 = vmatpush1.bf16.msra.mxu1 %v2962_v27  ;;  %v2984_v27 = vpack.c.bf16 %v323_v45, %v315_v20  ;;  %v785_v9 = vld [vmem:[#allocation8 + $0xa0] sm:$0xff] }
 0x10a   :  { %2903 = vmatpush1.bf16.msra.mxu0 %v2902_v36  ;;  %v2924_v36 = vpack.c.bf16 %v337_v29, %v329_v28  ;;  %2965 = vmatprep.subr.bf16.mxu1 %v2964_v30  ;;  %v314_v28 = vld [vmem:[#allocation5 + $0x4b0] sm:$0xff]  ;;  %v2942_v30 = vpack.c.bf16 %v400_v23, %v392_v22  ;;  %v793_v20 = vld [vmem:[#allocation8 + $0xe0] sm:$0xff] }
 0x10b   :  { %2905 = vmatprep.subr.bf16.mxu0 %v2904_v39  ;;  %v2966_v39 = vpack.c.bf16 %v242_v32, %v234_v31  ;;  %v322_v29 = vld [vmem:[#allocation5 + $0x4f0] sm:$0xff]  ;;  %v331_v31 = vld [vmem:[#allocation5 + $0x538] sm:$0xff] }
 0x10c   :  { %v339_v32 = vld [vmem:[#allocation5 + $0x578] sm:$0xff]  ;;  %v802_v22 = vld [vmem:[#allocation8 + $0x128] sm:$0xff] }
 0x10d   :  { %2967 = vmatpush1.bf16.msra.mxu1 %v2966_v39  ;;  %v2988_v39 = vpack.c.bf16 %v339_v32, %v331_v31  ;;  %v801_v31 = vld [vmem:[#allocation8 + $0x120] sm:$0xff] }
 0x10e   :  { %2907 = vmatpush1.bf16.msra.mxu0 %v2906_v50  ;;  %v2928_v50 = vpack.c.bf16 %v353_v41, %v345_v40  ;;  %2969 = vmatprep.subr.bf16.mxu1 %v2968_v42  ;;  %v330_v40 = vld [vmem:[#allocation5 + $0x530] sm:$0xff]  ;;  %v2946_v42 = vpack.c.bf16 %v416_v35, %v408_v34 }
 0x10f   :  { %2909 = vmatprep.subr.bf16.mxu0 %v2908_v53  ;;  %v2970_v53 = vpack.c.bf16 %v258_v46, %v250_v44  ;;  %v338_v41 = vld [vmem:[#allocation5 + $0x570] sm:$0xff]  ;;  %v347_v44 = vld [vmem:[#allocation5 + $0x5b8] sm:$0xff] }
 0x110   :  { %v355_v46 = vld [vmem:[#allocation5 + $0x5f8] sm:$0xff]  ;;  %v810_v34 = vld [vmem:[#allocation8 + $0x168] sm:$0xff] }
 0x111   :  { %2971 = vmatpush1.bf16.msra.mxu1 %v2970_v53  ;;  %v2992_v53 = vpack.c.bf16 %v355_v46, %v347_v44  ;;  %v809_v44 = vld [vmem:[#allocation8 + $0x160] sm:$0xff] }
 0x112   :  { %2911 = vmatpush1.bf16.msra.mxu0 %v2910_v62  ;;  %v2932_v62 = vpack.c.bf16 %v369_v55, %v361_v54  ;;  %2973 = vmatprep.subr.bf16.mxu1 %v2972_v56  ;;  %v346_v54 = vld [vmem:[#allocation5 + $0x5b0] sm:$0xff]  ;;  %v363_v56 = vld [vmem:[#allocation5 + $0x638] sm:$0xff] }
 0x113   :  { %2913 = vmatprep.subr.bf16.mxu0 %v2912_v1  ;;  %v2974_v1 = vpack.c.bf16 %v274_v58, %v266_v57  ;;  %v354_v55 = vld [vmem:[#allocation5 + $0x5f0] sm:$0xff]  ;;  %v371_v57 = vld [vmem:[#allocation5 + $0x678] sm:$0xff]  ;;  %v3014_v58 = vpack.c.bf16 %v769_v49, %v765_v48 }
 0x114   :  { %v818_v48 = vld [vmem:[#allocation8 + $0x1a8] sm:$0xff] }
 0x115   :  { %2975 = vmatpush1.bf16.msra.mxu1 %v2974_v1  ;;  %v2996_v1 = vpack.c.bf16 %v371_v57, %v363_v56  ;;  %v813_v56 = vld [vmem:[#allocation8 + $0x180] sm:$0xff] }
 0x116   :  { %2915 = vmatpush1.bf16.msra.mxu0 %v2914_v10  ;;  %v2936_v10 = vpack.c.bf16 %v385_v3, %v377_v2  ;;  %2977 = vmatprep.subr.bf16.mxu1 %v2976_v4  ;;  %v362_v2 = vld [vmem:[#allocation5 + $0x630] sm:$0xff]  ;;  %v379_v4 = vld [vmem:[#allocation5 + $0x6b8] sm:$0xff]  ;;  %v817_v57 = vld [vmem:[#allocation8 + $0x1a0] sm:$0xff] }
 0x117   :  { %2917 = vmatprep.subr.bf16.mxu0 %v2916_v13  ;;  %v2978_v13 = vpack.c.bf16 %v290_v6, %v282_v5  ;;  %v370_v3 = vld [vmem:[#allocation5 + $0x670] sm:$0xff]  ;;  %v387_v5 = vld [vmem:[#allocation5 + $0x6f8] sm:$0xff]  ;;  %v3018_v6 = vpack.c.bf16 %v777_v61, %v773_v60 }
 0x118   :  { %v826_v60 = vld [vmem:[#allocation8 + $0x1e8] sm:$0xff] }
 0x119   :  { %2979 = vmatpush1.bf16.msra.mxu1 %v2978_v13  ;;  %v3000_v13 = vpack.c.bf16 %v387_v5, %v379_v4  ;;  %v821_v5 = vld [vmem:[#allocation8 + $0x1c0] sm:$0xff] }
 0x11a   :  { %2919 = vmatpush1.bf16.msra.mxu0 %v2918_v21  ;;  %v2940_v21 = vpack.c.bf16 %v401_v15, %v393_v14  ;;  %2981 = vmatprep.subr.bf16.mxu1 %v2980_v16  ;;  %v378_v14 = vld [vmem:[#allocation5 + $0x6b0] sm:$0xff]  ;;  %v395_v15 = vld [vmem:[#allocation5 + $0x738] sm:$0xff] }
 0x11b   :  { %2921 = vmatprep.subr.bf16.mxu0 %v2920_v24  ;;  %v2982_v24 = vpack.c.bf16 %v306_v18, %v298_v17  ;;  %v403_v16 = vld [vmem:[#allocation5 + $0x778] sm:$0xff]  ;;  %v3022_v17 = vpack.c.bf16 %v785_v9, %v781_v8  ;;  %v3024_v18 = vpack.c.bf16 %v794_v12, %v790_v11  ;;  %v830_v8 = vld [vmem:[#allocation8 + $0x208] sm:$0xff] }
 0x11c   :  { %v3004_v23 = vpack.c.bf16 %v403_v16, %v395_v15  ;;  %v834_v9 = vld [vmem:[#allocation8 + $0x228] sm:$0xff]  ;;  %v783_v11 = vld [vmem:[#allocation8 + $0x90] sm:$0xff]  ;;  %v829_v16 = vld [vmem:[#allocation8 + $0x200] sm:$0xff] }
 0x11d   :  { %2983 = vmatpush1.bf16.msra.mxu1 %v2982_v24  ;;  %v394_v24 = vld [vmem:[#allocation5 + $0x730] sm:$0xff]  ;;  %v787_v12 = vld [vmem:[#allocation8 + $0xb0] sm:$0xff]  ;;  %v3044_v15 = vpack.c.bf16 %v834_v9, %v830_v8  ;;  %v832_v9 = vld [vmem:[#allocation8 + $0x218] sm:$0xff] }
 0x11e   :  { %2923 = vmatpush1.bf16.msra.mxu0 %v2922_v33  ;;  %v2944_v33 = vpack.c.bf16 %v417_v26, %v409_v25  ;;  %2985 = vmatprep.subr.bf16.mxu1 %v2984_v27  ;;  %v402_v25 = vld [vmem:[#allocation5 + $0x770] sm:$0xff]  ;;  %v411_v26 = vld [vmem:[#allocation5 + $0x7b8] sm:$0xff] }
 0x11f   :  { %2925 = vmatprep.subr.bf16.mxu0 %v2924_v36  ;;  %v2986_v36 = vpack.c.bf16 %v322_v29, %v314_v28  ;;  %v419_v27 = vld [vmem:[#allocation5 + $0x7f8] sm:$0xff]  ;;  %v3006_v32 = vpack.c.bf16 %v402_v25, %v394_v24  ;;  %v804_v24 = vld [vmem:[#allocation8 + $0x138] sm:$0xff] }
 0x120   :  { %v3008_v35 = vpack.c.bf16 %v419_v27, %v411_v26  ;;  %v837_v27 = vld [vmem:[#allocation8 + $0x240] sm:$0xff]  ;;  %v827_v8 = vld [vmem:[#allocation8 + $0x1f0] sm:$0xff] }
 0x121   :  { %2987 = vmatpush1.bf16.msra.mxu1 %v2986_v36  ;;  %v410_v36 = vld [vmem:[#allocation5 + $0x7b0] sm:$0xff] }
 0x122   :  { %2927 = vmatpush1.bf16.msra.mxu0 %v2926_v47  ;;  %v3012_v47 = vpack.c.bf16 %v770_v38, %v766_v37  ;;  %2989 = vmatprep.subr.bf16.mxu1 %v2988_v39  ;;  %v418_v37 = vld [vmem:[#allocation5 + $0x7f0] sm:$0xff]  ;;  %v768_v38 = vld [vmem:[#allocation8 + $0x18] sm:$0xff] }
 0x123   :  { %2929 = vmatprep.subr.bf16.mxu0 %v2928_v50  ;;  %v2990_v50 = vpack.c.bf16 %v338_v41, %v330_v40  ;;  %v772_v39 = vld [vmem:[#allocation8 + $0x38] sm:$0xff]  ;;  %v3010_v46 = vpack.c.bf16 %v418_v37, %v410_v36 }
 0x124   :  { %v3268_v49 = vpack.c.bf16 %v772_v39, %v768_v38  ;;  %v812_v36 = vld [vmem:[#allocation8 + $0x178] sm:$0xff]  ;;  %v845_v39 = vld [vmem:[#allocation8 + $0x280] sm:$0xff] }
 0x125   :  { %2991 = vmatpush1.bf16.msra.mxu1 %v2990_v50  ;;  %v767_v50 = vld [vmem:[#allocation8 + $0x10] sm:$0xff] }
 0x126   :  { %2931 = vmatpush1.bf16.msra.mxu0 %v2930_v59  ;;  %v3016_v59 = vpack.c.bf16 %v778_v52, %v774_v51  ;;  %2993 = vmatprep.subr.bf16.mxu1 %v2992_v53  ;;  %v771_v51 = vld [vmem:[#allocation8 + $0x30] sm:$0xff]  ;;  %v776_v52 = vld [vmem:[#allocation8 + $0x58] sm:$0xff] }
 0x127   :  { %2933 = vmatprep.subr.bf16.mxu0 %v2932_v62  ;;  %v2994_v62 = vpack.c.bf16 %v354_v55, %v346_v54  ;;  %v780_v53 = vld [vmem:[#allocation8 + $0x78] sm:$0xff] }
 0x128   :  { %v3272_v61 = vpack.c.bf16 %v780_v53, %v776_v52  ;;  %v853_v53 = vld [vmem:[#allocation8 + $0x2c0] sm:$0xff] }
 0x129   :  { %2995 = vmatpush1.bf16.msra.mxu1 %v2994_v62  ;;  %v775_v62 = vld [vmem:[#allocation8 + $0x50] sm:$0xff] }
 0x12a   :  { %2935 = vmatpush1.bf16.msra.mxu0 %v2934_v7  ;;  %v3020_v7 = vpack.c.bf16 %v786_v0, %v782_v63  ;;  %2997 = vmatprep.subr.bf16.mxu1 %v2996_v1  ;;  %v779_v63 = vld [vmem:[#allocation8 + $0x70] sm:$0xff]  ;;  %v784_v0 = vld [vmem:[#allocation8 + $0x98] sm:$0xff] }
 0x12b   :  { %2937 = vmatprep.subr.bf16.mxu0 %v2936_v10  ;;  %v2998_v10 = vpack.c.bf16 %v370_v3, %v362_v2  ;;  %v788_v1 = vld [vmem:[#allocation8 + $0xb8] sm:$0xff]  ;;  %v3038_v2 = vpack.c.bf16 %v817_v57, %v813_v56  ;;  %v3881_v3 = vld.sshfl [vmem:[#allocation2] sm:$0x33 pattern:$0x76325410]  ;;  %v862_v56 = vld [vmem:[#allocation8 + $0x308] sm:$0xff] }
 0x12c   :  { %v866_v57 = vld [vmem:[#allocation8 + $0x328] sm:$0xff] }
 0x12d   :  { %2999 = vmatpush1.bf16.msra.mxu1 %v2998_v10  ;;  %v3276_v10 = vpack.c.bf16 %v788_v1, %v784_v0  ;;  %v3060_v0 = vpack.c.bf16 %v866_v57, %v862_v56  ;;  %v861_v1 = vld [vmem:[#allocation8 + $0x300] sm:$0xff]  ;;  %v863_v57 = vld [vmem:[#allocation8 + $0x310] sm:$0xff] }
 0x12e   :  { %2939 = vmatpush1.bf16.msra.mxu0 %v2938_v19  ;;  %v789_v19 = vld [vmem:[#allocation8 + $0xc0] sm:$0xff]  ;;  %3001 = vmatprep.subr.bf16.mxu1 %v3000_v13  ;;  %v792_v13 = vld [vmem:[#allocation8 + $0xd8] sm:$0xff] }
 0x12f   :  { %2941 = vmatprep.subr.bf16.mxu0 %v2940_v21  ;;  %v798_v21 = vld [vmem:[#allocation8 + $0x108] sm:$0xff]  ;;  %v3026_v28 = vpack.c.bf16 %v793_v20, %v789_v19 }
 0x130   :  { %v3028_v29 = vpack.c.bf16 %v802_v22, %v798_v21  ;;  %v838_v19 = vld [vmem:[#allocation8 + $0x248] sm:$0xff]  ;;  %v791_v21 = vld [vmem:[#allocation8 + $0xd0] sm:$0xff] }
 0x131   :  { %v842_v20 = vld [vmem:[#allocation8 + $0x268] sm:$0xff]  ;;  %v795_v22 = vld [vmem:[#allocation8 + $0xf0] sm:$0xff] }
 0x132   :  { %2943 = vmatpush1.bf16.msra.mxu0 %v2942_v30  ;;  %v797_v30 = vld [vmem:[#allocation8 + $0x100] sm:$0xff]  ;;  %v3048_v26 = vpack.c.bf16 %v842_v20, %v838_v19  ;;  %v835_v19 = vld [vmem:[#allocation8 + $0x230] sm:$0xff]  ;;  %v840_v20 = vld [vmem:[#allocation8 + $0x258] sm:$0xff] }
 0x133   :  { %2945 = vmatprep.subr.bf16.mxu0 %v2944_v33  ;;  %v806_v33 = vld [vmem:[#allocation8 + $0x148] sm:$0xff]  ;;  %v3030_v40 = vpack.c.bf16 %v801_v31, %v797_v30 }
 0x134   :  { %v3032_v41 = vpack.c.bf16 %v810_v34, %v806_v33  ;;  %v846_v30 = vld [vmem:[#allocation8 + $0x288] sm:$0xff]  ;;  %v799_v33 = vld [vmem:[#allocation8 + $0x110] sm:$0xff] }
 0x135   :  { %v850_v31 = vld [vmem:[#allocation8 + $0x2a8] sm:$0xff]  ;;  %v803_v34 = vld [vmem:[#allocation8 + $0x130] sm:$0xff] }
 0x136   :  { %2947 = vmatpush1.bf16.msra.mxu0 %v2946_v42  ;;  %v805_v42 = vld [vmem:[#allocation8 + $0x140] sm:$0xff]  ;;  %v3052_v38 = vpack.c.bf16 %v850_v31, %v846_v30  ;;  %v843_v30 = vld [vmem:[#allocation8 + $0x270] sm:$0xff]  ;;  %v848_v31 = vld [vmem:[#allocation8 + $0x298] sm:$0xff] }
 0x137   :  { %3013 = vmatprep.subr.bf16.mxu0 %v3012_v47  ;;  %v814_v47 = vld [vmem:[#allocation8 + $0x188] sm:$0xff]  ;;  %v3034_v54 = vpack.c.bf16 %v809_v44, %v805_v42 }
 0x138   :  { %v3036_v55 = vpack.c.bf16 %v818_v48, %v814_v47  ;;  %v854_v42 = vld [vmem:[#allocation8 + $0x2c8] sm:$0xff]  ;;  %v807_v47 = vld [vmem:[#allocation8 + $0x150] sm:$0xff] }
 0x139   :  { %680 = vmatmul.mubr.f32.vlgmr.msra.gmra.mrb[2].mxu0 %v4342_v43  ;;  %v386_v43 = vld [vmem:[#allocation5 + $0x6f0] sm:$0xff]  ;;  %v811_v48 = vld [vmem:[#allocation8 + $0x170] sm:$0xff] }
 0x13a   :  { %3015 = vmatpush1.bf16.msra.mxu0 %v3014_v58  ;;  %v3002_v45 = vpack.c.bf16 %v386_v43, %v378_v14  ;;  %v3270_v58 = vpack.c.bf16 %v771_v51, %v767_v50  ;;  %v796_v14 = vld [vmem:[#allocation8 + $0xf8] sm:$0xff]  ;;  %v858_v44 = vld [vmem:[#allocation8 + $0x2e8] sm:$0xff] }
 0x13b   :  { %3017 = vmatprep.subr.bf16.mxu0 %v3016_v59  ;;  %v822_v59 = vld [vmem:[#allocation8 + $0x1c8] sm:$0xff]  ;;  %v820_v50 = vld [vmem:[#allocation8 + $0x1b8] sm:$0xff]  ;;  %v3056_v52 = vpack.c.bf16 %v858_v44, %v854_v42  ;;  %v851_v42 = vld [vmem:[#allocation8 + $0x2b0] sm:$0xff] }
 0x13c   :  { %3003 = vmatpush1.bf16.msra.mxu1 %v3002_v45  ;;  %v3040_v4 = vpack.c.bf16 %v826_v60, %v822_v59  ;;  %v3280_v45 = vpack.c.bf16 %v796_v14, %v792_v13  ;;  %v815_v59 = vld [vmem:[#allocation8 + $0x190] sm:$0xff]  ;;  %v869_v13 = vld [vmem:[#allocation8 + $0x340] sm:$0xff]  ;;  %v856_v44 = vld [vmem:[#allocation8 + $0x2d8] sm:$0xff] }
 0x13d   :  { %3005 = vmatprep.subr.bf16.mxu1 %v3004_v23  ;;  %v800_v23 = vld [vmem:[#allocation8 + $0x118] sm:$0xff]  ;;  %v819_v60 = vld [vmem:[#allocation8 + $0x1b0] sm:$0xff]  ;;  %v873_v14 = vld [vmem:[#allocation8 + $0x360] sm:$0xff] }
 0x13e   :  { %3019 = vmatpush1.bf16.msra.mxu0 %v3018_v6  ;;  %v825_v6 = vld [vmem:[#allocation8 + $0x1e0] sm:$0xff] }
 0x13f   :  { %3021 = vmatprep.subr.bf16.mxu0 %v3020_v7  ;;  %v3274_v7 = vpack.c.bf16 %v779_v63, %v775_v62  ;;  %v3042_v43 = vpack.c.bf16 %v825_v6, %v821_v5  ;;  %v828_v62 = vld [vmem:[#allocation8 + $0x1f8] sm:$0xff]  ;;  %v874_v5 = vld [vmem:[#allocation8 + $0x368] sm:$0xff] }
 0x140   :  { %3007 = vmatpush1.bf16.msra.mxu1 %v3006_v32  ;;  %v3284_v32 = vpack.c.bf16 %v804_v24, %v800_v23  ;;  %v877_v23 = vld [vmem:[#allocation8 + $0x380] sm:$0xff] }
 0x141   :  { %3009 = vmatprep.subr.bf16.mxu1 %v3008_v35  ;;  %v808_v35 = vld [vmem:[#allocation8 + $0x158] sm:$0xff]  ;;  %v881_v24 = vld [vmem:[#allocation8 + $0x3a0] sm:$0xff] }
 0x142   :  { %3023 = vmatpush1.bf16.msra.mxu0 %v3022_v17  ;;  %v833_v17 = vld [vmem:[#allocation8 + $0x220] sm:$0xff] }
 0x143   :  { %3025 = vmatprep.subr.bf16.mxu0 %v3024_v18  ;;  %v3278_v18 = vpack.c.bf16 %v787_v12, %v783_v11  ;;  %v3046_v25 = vpack.c.bf16 %v833_v17, %v829_v16  ;;  %v882_v16 = vld [vmem:[#allocation8 + $0x3a8] sm:$0xff] }
 0x144   :  { %3011 = vmatpush1.bf16.msra.mxu1 %v3010_v46  ;;  %v3288_v46 = vpack.c.bf16 %v812_v36, %v808_v35  ;;  %v885_v35 = vld [vmem:[#allocation8 + $0x3c0] sm:$0xff] }
 0x145   :  { %3269 = vmatprep.subr.bf16.mxu1 %v3268_v49  ;;  %v816_v49 = vld [vmem:[#allocation8 + $0x198] sm:$0xff]  ;;  %v889_v36 = vld [vmem:[#allocation8 + $0x3e0] sm:$0xff] }
 0x146   :  { %3027 = vmatpush1.bf16.msra.mxu0 %v3026_v28  ;;  %v841_v28 = vld [vmem:[#allocation8 + $0x260] sm:$0xff] }
 0x147   :  { %3029 = vmatprep.subr.bf16.mxu0 %v3028_v29  ;;  %751 = vmatmul.mubr.f32.vlgmr.msra.gmra.mrb[2].mxu1 %v3881_v3  ;;  %v3282_v29 = vpack.c.bf16 %v795_v22, %v791_v21  ;;  %v3050_v37 = vpack.c.bf16 %v841_v28, %v837_v27  ;;  %v3294_v3 = vpack.c.bf16 %v819_v60, %v815_v59  ;;  %v890_v27 = vld [vmem:[#allocation8 + $0x3e8] sm:$0xff]  ;;  %v872_v59 = vld [vmem:[#allocation8 + $0x358] sm:$0xff] }
 0x148   :  { %3271 = vmatpush1.bf16.msra.mxu1 %v3270_v58  ;;  %v3292_v58 = vpack.c.bf16 %v820_v50, %v816_v49  ;;  %v3066_v21 = vpack.c.bf16 %v873_v14, %v869_v13  ;;  %v876_v60 = vld [vmem:[#allocation8 + $0x378] sm:$0xff] }
 0x149   :  { %3273 = vmatprep.subr.bf16.mxu1 %v3272_v61  ;;  %v824_v61 = vld [vmem:[#allocation8 + $0x1d8] sm:$0xff] }
 0x14a   :  { %3031 = vmatpush1.bf16.msra.mxu0 %v3030_v40  ;;  %v849_v40 = vld [vmem:[#allocation8 + $0x2a0] sm:$0xff]  ;;  %v3296_v6 = vpack.c.bf16 %v828_v62, %v824_v61  ;;  %v3320_v62 = vpack.c.bf16 %v876_v60, %v872_v59  ;;  %v896_v13 = vld [vmem:[#allocation8 + $0x418] sm:$0xff]  ;;  %v922_v59 = vld [vmem:[#allocation8 + $0x4e8] sm:$0xff] }
 0x14b   :  { %3033 = vmatprep.subr.bf16.mxu0 %v3032_v41  ;;  %v3286_v41 = vpack.c.bf16 %v803_v34, %v799_v33  ;;  %v3054_v51 = vpack.c.bf16 %v849_v40, %v845_v39  ;;  %v3070_v33 = vpack.c.bf16 %v881_v24, %v877_v23  ;;  %v898_v39 = vld [vmem:[#allocation8 + $0x428] sm:$0xff]  ;;  %v900_v14 = vld [vmem:[#allocation8 + $0x438] sm:$0xff]  ;;  %v893_v23 = vld [vmem:[#allocation8 + $0x400] sm:$0xff] }
 0x14c   :  { %3275 = vmatpush1.bf16.msra.mxu1 %v3274_v7  ;;  %v823_v7 = vld [vmem:[#allocation8 + $0x1d0] sm:$0xff]  ;;  %v897_v24 = vld [vmem:[#allocation8 + $0x420] sm:$0xff]  ;;  %v920_v60 = vld [vmem:[#allocation8 + $0x4d8] sm:$0xff] }
 0x14d   :  { %3277 = vmatprep.subr.bf16.mxu1 %v3276_v10  ;;  %v836_v10 = vld [vmem:[#allocation8 + $0x238] sm:$0xff] }
 0x14e   :  { %3035 = vmatpush1.bf16.msra.mxu0 %v3034_v54  ;;  %v857_v54 = vld [vmem:[#allocation8 + $0x2e0] sm:$0xff]  ;;  %v3300_v17 = vpack.c.bf16 %v836_v10, %v832_v9 }
 0x14f   :  { %3037 = vmatprep.subr.bf16.mxu0 %v3036_v55  ;;  %v3290_v55 = vpack.c.bf16 %v811_v48, %v807_v47  ;;  %v3058_v63 = vpack.c.bf16 %v857_v54, %v853_v53  ;;  %v3074_v47 = vpack.c.bf16 %v889_v36, %v885_v35  ;;  %v864_v53 = vld [vmem:[#allocation8 + $0x318] sm:$0xff]  ;;  %v3078_v35 = vpack.c.bf16 %v897_v24, %v893_v23 }
 0x150   :  { %3279 = vmatpush1.bf16.msra.mxu1 %v3278_v18  ;;  %v831_v18 = vld [vmem:[#allocation8 + $0x210] sm:$0xff]  ;;  %v868_v54 = vld [vmem:[#allocation8 + $0x338] sm:$0xff] }
 0x151   :  { %3281 = vmatprep.subr.bf16.mxu1 %v3280_v45  ;;  %v844_v45 = vld [vmem:[#allocation8 + $0x278] sm:$0xff]  ;;  %v3316_v56 = vpack.c.bf16 %v868_v54, %v864_v53  ;;  %v913_v53 = vld [vmem:[#allocation8 + $0x4a0] sm:$0xff] }
 0x152   :  { %3039 = vmatpush1.bf16.msra.mxu0 %v3038_v2  ;;  %v865_v2 = vld [vmem:[#allocation8 + $0x320] sm:$0xff]  ;;  %v3304_v28 = vpack.c.bf16 %v844_v45, %v840_v20  ;;  %v936_v23 = vld [vmem:[#allocation8 + $0x558] sm:$0xff] }
 0x153   :  { %3041 = vmatprep.subr.bf16.mxu0 %v3040_v4  ;;  %v870_v4 = vld [vmem:[#allocation8 + $0x348] sm:$0xff]  ;;  %v3062_v11 = vpack.c.bf16 %v865_v2, %v861_v1  ;;  %v880_v1 = vld [vmem:[#allocation8 + $0x398] sm:$0xff] }
 0x154   :  { %3283 = vmatpush1.bf16.msra.mxu1 %v3282_v29  ;;  %v3064_v12 = vpack.c.bf16 %v874_v5, %v870_v4  ;;  %v839_v29 = vld [vmem:[#allocation8 + $0x250] sm:$0xff]  ;;  %v884_v2 = vld [vmem:[#allocation8 + $0x3b8] sm:$0xff] }
 0x155   :  { %3285 = vmatprep.subr.bf16.mxu1 %v3284_v32  ;;  %v852_v32 = vld [vmem:[#allocation8 + $0x2b8] sm:$0xff]  ;;  %v3324_v4 = vpack.c.bf16 %v884_v2, %v880_v1  ;;  %v879_v5 = vld [vmem:[#allocation8 + $0x390] sm:$0xff]  ;;  %v921_v1 = vld [vmem:[#allocation8 + $0x4e0] sm:$0xff] }
 0x156   :  { %3043 = vmatpush1.bf16.msra.mxu0 %v3042_v43  ;;  %v3298_v43 = vpack.c.bf16 %v827_v8, %v823_v7  ;;  %v3308_v40 = vpack.c.bf16 %v852_v32, %v848_v31  ;;  %v888_v7 = vld [vmem:[#allocation8 + $0x3d8] sm:$0xff]  ;;  %v906_v31 = vld [vmem:[#allocation8 + $0x468] sm:$0xff] }
 0x157   :  { %3045 = vmatprep.subr.bf16.mxu0 %v3044_v15  ;;  %v878_v15 = vld [vmem:[#allocation8 + $0x388] sm:$0xff]  ;;  %v892_v8 = vld [vmem:[#allocation8 + $0x3f8] sm:$0xff] }
 0x158   :  { %3287 = vmatpush1.bf16.msra.mxu1 %v3286_v41  ;;  %v3068_v22 = vpack.c.bf16 %v882_v16, %v878_v15  ;;  %v847_v41 = vld [vmem:[#allocation8 + $0x290] sm:$0xff]  ;;  %v3328_v10 = vpack.c.bf16 %v892_v8, %v888_v7  ;;  %v3332_v15 = vpack.c.bf16 %v900_v14, %v896_v13  ;;  %v422_v16 = vlaneseq  ;;  %v904_v32 = vld [vmem:[#allocation8 + $0x458] sm:$0xff]  ;;  %v930_v7 = vld [vmem:[#allocation8 + $0x528] sm:$0xff] }
 0x159   :  { %3289 = vmatprep.subr.bf16.mxu1 %v3288_v46  ;;  %v860_v46 = vld [vmem:[#allocation8 + $0x2f8] sm:$0xff]  ;;  %v3310_v49 = vpack.c.bf16 %v851_v42, %v847_v41  ;;  %v903_v42 = vld [vmem:[#allocation8 + $0x450] sm:$0xff]  ;;  %v929_v13 = vld [vmem:[#allocation8 + $0x520] sm:$0xff] }
 0x15a   :  { %3047 = vmatpush1.bf16.msra.mxu0 %v3046_v25  ;;  %v3302_v25 = vpack.c.bf16 %v835_v19, %v831_v18  ;;  %v3312_v50 = vpack.c.bf16 %v860_v46, %v856_v44  ;;  %v4360_v19 = vld [vmem:[#allocation7] sm:$0xff]  ;;  %v907_v44 = vld [vmem:[#allocation8 + $0x470] sm:$0xff]  ;;  %v910_v46 = vld [vmem:[#allocation8 + $0x488] sm:$0xff] }
 0x15b   :  { %3049 = vmatprep.subr.bf16.mxu0 %v3048_v26  ;;  %v886_v26 = vld [vmem:[#allocation8 + $0x3c8] sm:$0xff]  ;;  %v928_v8 = vld [vmem:[#allocation8 + $0x518] sm:$0xff] }
 0x15c   :  { %3291 = vmatpush1.bf16.msra.mxu1 %v3290_v55  ;;  %v3072_v34 = vpack.c.bf16 %v890_v27, %v886_v26  ;;  %v895_v27 = vld [vmem:[#allocation8 + $0x410] sm:$0xff]  ;;  %v940_v24 = vld [vmem:[#allocation8 + $0x578] sm:$0xff] }
 0x15d   :  { %3293 = vmatprep.subr.bf16.mxu1 %v3292_v58  ;;  %v867_v58 = vld [vmem:[#allocation8 + $0x330] sm:$0xff] }
 0x15e   :  { %3051 = vmatpush1.bf16.msra.mxu0 %v3050_v37  ;;  %v3306_v37 = vpack.c.bf16 %v843_v30, %v839_v29  ;;  %v3318_v61 = vpack.c.bf16 %v867_v58, %v863_v57  ;;  %v902_v29 = vld [vmem:[#allocation8 + $0x448] sm:$0xff]  ;;  %v915_v57 = vld [vmem:[#allocation8 + $0x4b0] sm:$0xff] }
 0x15f   :  { %3053 = vmatprep.subr.bf16.mxu0 %v3052_v38  ;;  %v894_v38 = vld [vmem:[#allocation8 + $0x408] sm:$0xff] }
 0x160   :  { %3295 = vmatpush1.bf16.msra.mxu1 %v3294_v3  ;;  %v3076_v48 = vpack.c.bf16 %v898_v39, %v894_v38  ;;  %v905_v38 = vld [vmem:[#allocation8 + $0x460] sm:$0xff]  ;;  %v918_v58 = vld [vmem:[#allocation8 + $0x4c8] sm:$0xff] }
 0x161   :  { %3297 = vmatprep.subr.bf16.mxu1 %v3296_v6  ;;  %v883_v6 = vld [vmem:[#allocation8 + $0x3b0] sm:$0xff]  ;;  %v3088_v2 = vpack.c.bf16 %v922_v59, %v918_v58  ;;  %v949_v58 = vld [vmem:[#allocation8 + $0x5c0] sm:$0xff] }
 0x162   :  { %3055 = vmatpush1.bf16.msra.mxu0 %v3054_v51  ;;  %v855_v51 = vld [vmem:[#allocation8 + $0x2d0] sm:$0xff]  ;;  %v3326_v9 = vpack.c.bf16 %v883_v6, %v879_v5  ;;  %v926_v6 = vld [vmem:[#allocation8 + $0x508] sm:$0xff]  ;;  %v953_v59 = vld [vmem:[#allocation8 + $0x5e0] sm:$0xff] }
 0x163   :  { %3057 = vmatprep.subr.bf16.mxu0 %v3056_v52  ;;  %v859_v52 = vld [vmem:[#allocation8 + $0x2f0] sm:$0xff] }
 0x164   :  { %3299 = vmatpush1.bf16.msra.mxu1 %v3298_v43  ;;  %v3314_v55 = vpack.c.bf16 %v859_v52, %v855_v51  ;;  %v3338_v51 = vpack.c.bf16 %v907_v44, %v903_v42  ;;  %v909_v52 = vld [vmem:[#allocation8 + $0x480] sm:$0xff]  ;;  %v923_v5 = vld [vmem:[#allocation8 + $0x4f0] sm:$0xff] }
 0x165   :  { %3301 = vmatprep.subr.bf16.mxu1 %v3300_v17  ;;  %v4355_v17 = vshrl.u32 %v422_v16, 7  ;;  %v927_v16 = vld [vmem:[#allocation8 + $0x510] sm:$0xff]  ;;  %v941_v42 = vld [vmem:[#allocation8 + $0x580] sm:$0xff] }
 0x166   :  { %3059 = vmatpush1.bf16.msra.mxu0 %v3058_v63  ;;  %v871_v63 = vld [vmem:[#allocation8 + $0x350] sm:$0xff]  ;;  %v945_v44 = vld [vmem:[#allocation8 + $0x5a0] sm:$0xff] }
 0x167   :  { %3061 = vmatprep.subr.bf16.mxu0 %v3060_v0  ;;  %v875_v0 = vld [vmem:[#allocation8 + $0x370] sm:$0xff]  ;;  %v4358_v18 = vsub.s32 0, %v4355_v17  ;;  %v4363_v20 = vsub.s32 1, %v4355_v17  ;;  %v4370_v14 = vsub.s32 3, %v4355_v17 }
 0x168   :  { %3303 = vmatpush1.bf16.msra.mxu1 %v3302_v25  ;;  %v3322_v3 = vpack.c.bf16 %v875_v0, %v871_v63  ;;  %v917_v0 = vld [vmem:[#allocation8 + $0x4c0] sm:$0xff] }
 0x169   :  { %3305 = vmatprep.subr.bf16.mxu1 %v3304_v28  ;;  %v425_v45 = vrot.slane %v4360_v19, %v4358_v18  ;;  %v899_v28 = vld [vmem:[#allocation8 + $0x430] sm:$0xff] }
 0x16a   :  { %3063 = vmatpush1.bf16.msra.mxu0 %v3062_v11  ;;  %v887_v11 = vld [vmem:[#allocation8 + $0x3d0] sm:$0xff]  ;;  %v3334_v36 = vpack.c.bf16 %v899_v28, %v895_v27  ;;  %v933_v27 = vld [vmem:[#allocation8 + $0x540] sm:$0xff] }
 0x16b   :  { %3065 = vmatprep.subr.bf16.mxu0 %v3064_v12  ;;  %v891_v12 = vld [vmem:[#allocation8 + $0x3f0] sm:$0xff]  ;;  %v937_v28 = vld [vmem:[#allocation8 + $0x560] sm:$0xff] }
 0x16c   :  { %3307 = vmatpush1.bf16.msra.mxu1 %v3306_v37  ;;  %v3330_v43 = vpack.c.bf16 %v891_v12, %v887_v11  ;;  %v901_v37 = vld [vmem:[#allocation8 + $0x440] sm:$0xff] }
 0x16d   :  { %3309 = vmatprep.subr.bf16.mxu1 %v3308_v40  ;;  %v3080_v40 = vpack.c.bf16 %v906_v31, %v902_v29  ;;  %v925_v12 = vld [vmem:[#allocation8 + $0x500] sm:$0xff]  ;;  %v437_v29 = vrot.slane %v4360_v19, %v4370_v14  ;;  %v3352_v31 = vpack.c.bf16 %v940_v24, %v936_v23 }
 0x16e   :  { %3067 = vmatpush1.bf16.msra.mxu0 %v3066_v21  ;;  %v429_v21 = vrot.slane %v4360_v19, %v4363_v20 }
 0x16f   :  { %3069 = vmatprep.subr.bf16.mxu0 %v3068_v22 }
 0x170   :  { %3311 = vmatpush1.bf16.msra.mxu1 %v3310_v49  ;;  %v916_v49 = vld [vmem:[#allocation8 + $0x4b8] sm:$0xff] }
 0x171   :  { %3313 = vmatprep.subr.bf16.mxu1 %v3312_v50  ;;  %v3082_v50 = vpack.c.bf16 %v905_v38, %v901_v37  ;;  %v948_v37 = vld [vmem:[#allocation8 + $0x5b8] sm:$0xff] }
 0x172   :  { %3071 = vmatpush1.bf16.msra.mxu0 %v3070_v33  ;;  %v908_v33 = vld [vmem:[#allocation8 + $0x478] sm:$0xff] }
 0x173   :  { %3073 = vmatprep.subr.bf16.mxu0 %v3072_v34  ;;  %v3336_v41 = vpack.c.bf16 %v908_v33, %v904_v32  ;;  %v935_v32 = vld [vmem:[#allocation8 + $0x550] sm:$0xff] }
 0x174   :  { %3315 = vmatpush1.bf16.msra.mxu1 %v3314_v55  ;;  %v939_v33 = vld [vmem:[#allocation8 + $0x570] sm:$0xff] }
 0x175   :  { %3317 = vmatprep.subr.bf16.mxu1 %v3316_v56  ;;  %v911_v56 = vld [vmem:[#allocation8 + $0x490] sm:$0xff] }
 0x176   :  { %3075 = vmatpush1.bf16.msra.mxu0 %v3074_v47  ;;  %v914_v47 = vld [vmem:[#allocation8 + $0x4a8] sm:$0xff]  ;;  %v3342_v63 = vpack.c.bf16 %v915_v57, %v911_v56  ;;  %v3102_v56 = vpack.c.bf16 %v945_v44, %v941_v42  ;;  %v984_v42 = vld [vmem:[#allocation8 + $0x6d8] sm:$0xff] }
 0x177   :  { %3077 = vmatprep.subr.bf16.mxu0 %v3076_v48  ;;  %v912_v48 = vld [vmem:[#allocation8 + $0x498] sm:$0xff]  ;;  %v3084_v54 = vpack.c.bf16 %v914_v47, %v910_v46 }
 0x178   :  { %3319 = vmatpush1.bf16.msra.mxu1 %v3318_v61  ;;  %v3340_v55 = vpack.c.bf16 %v916_v49, %v912_v48  ;;  %v924_v61 = vld [vmem:[#allocation8 + $0x4f8] sm:$0xff]  ;;  %v943_v49 = vld [vmem:[#allocation8 + $0x590] sm:$0xff] }
 0x179   :  { %3321 = vmatprep.subr.bf16.mxu1 %v3320_v62  ;;  %v3086_v62 = vpack.c.bf16 %v913_v53, %v909_v52  ;;  %v954_v52 = vld [vmem:[#allocation8 + $0x5e8] sm:$0xff]  ;;  %v952_v53 = vld [vmem:[#allocation8 + $0x5d8] sm:$0xff] }
 0x17a   :  { %v988_v44 = vld [vmem:[#allocation8 + $0x6f8] sm:$0xff] }
 0x17c   :  { %3323 = vmatpush1.bf16.msra.mxu1 %v3322_v3  ;;  %v3344_v3 = vpack.c.bf16 %v924_v61, %v920_v60 }
 0x17d   :  { %3325 = vmatprep.subr.bf16.mxu1 %v3324_v4  ;;  %v919_v4 = vld [vmem:[#allocation8 + $0x4d0] sm:$0xff] }
 0x17e   :  { %v3346_v11 = vpack.c.bf16 %v923_v5, %v919_v4  ;;  %v3106_v4 = vpack.c.bf16 %v953_v59, %v949_v58 }
 0x180   :  { %3327 = vmatpush1.bf16.msra.mxu1 %v3326_v9  ;;  %v932_v9 = vld [vmem:[#allocation8 + $0x538] sm:$0xff] }
 0x181   :  { %3329 = vmatprep.subr.bf16.mxu1 %v3328_v10  ;;  %v3090_v10 = vpack.c.bf16 %v921_v1, %v917_v0  ;;  %v958_v0 = vld [vmem:[#allocation8 + $0x608] sm:$0xff] }
 0x182   :  { %v962_v1 = vld [vmem:[#allocation8 + $0x628] sm:$0xff] }
 0x184   :  { %3331 = vmatpush1.bf16.msra.mxu1 %v3330_v43  ;;  %v3092_v43 = vpack.c.bf16 %v930_v7, %v926_v6  ;;  %v957_v6 = vld [vmem:[#allocation8 + $0x600] sm:$0xff] }
 0x185   :  { %3333 = vmatprep.subr.bf16.mxu1 %v3332_v15  ;;  %v3348_v15 = vpack.c.bf16 %v932_v9, %v928_v8  ;;  %v961_v7 = vld [vmem:[#allocation8 + $0x620] sm:$0xff]  ;;  %v3108_v8 = vpack.c.bf16 %v962_v1, %v958_v0  ;;  %v991_v0 = vld [vmem:[#allocation8 + $0x710] sm:$0xff] }
 0x186   :  { %v995_v1 = vld [vmem:[#allocation8 + $0x730] sm:$0xff] }
 0x1cc   :  { %v539_v22 = vpop.f32.mrb[0].mxu0 }
 0x1cd   :  { %v540_v25 = vadd.f32 %v539_v22, %v425_v45  ;;  %v541_v26 = vpop.f32.mrb[1].mxu0  ;;  %v931_v45 = vld [vmem:[#allocation8 + $0x530] sm:$0xff]  ;;  %v938_v22 = vld [vmem:[#allocation8 + $0x568] sm:$0xff] }
 0x1ce   :  { %v542_v30 = vadd.f32 %v541_v26, %v429_v21  ;;  %v934_v21 = vld [vmem:[#allocation8 + $0x548] sm:$0xff]  ;;  %v3350_v26 = vpack.c.bf16 %v931_v45, %v927_v16  ;;  %v3110_v16 = vpack.c.bf16 %v961_v7, %v957_v6  ;;  %v3382_v7 = vpack.c.bf16 %v995_v1, %v991_v0  ;;  %v1036_v1 = vld [vmem:[#allocation8 + $0x878] sm:$0xff] }
 0x1cf   :  { %v757_v39 = vmax.f32 %v540_v25, 0.0  ;;  %v3094_v25 = vpack.c.bf16 %v929_v13, %v925_v12  ;;  %v4374_v38 = vpop.f32.mrb[0].mxu1  ;;  %v966_v12 = vld [vmem:[#allocation8 + $0x648] sm:$0xff] }
 0x1d0   :  { %v758_v34 = vmax.f32 %v542_v30, 0.0  ;;  %v3096_v30 = vpack.c.bf16 %v938_v22, %v934_v21  ;;  %v970_v13 = vld [vmem:[#allocation8 + $0x668] sm:$0xff]  ;;  %v965_v21 = vld [vmem:[#allocation8 + $0x640] sm:$0xff] }
 0x1d1   :  { %v969_v22 = vld [vmem:[#allocation8 + $0x660] sm:$0xff]  ;;  %v3112_v23 = vpack.c.bf16 %v970_v13, %v966_v12  ;;  %v999_v12 = vld [vmem:[#allocation8 + $0x750] sm:$0xff]  ;;  %v1034_v0 = vld [vmem:[#allocation8 + $0x868] sm:$0xff] }
 0x1d2   :  { %1363 = vmatprep.mubr.f32.mxu0 %v758_v34  ;;  %1647 = vmatprep.mubr.f32.mxu1 %v758_v34  ;;  %v942_v34 = vld [vmem:[#allocation8 + $0x588] sm:$0xff]  ;;  %v1003_v13 = vld [vmem:[#allocation8 + $0x770] sm:$0xff] }
 0x1d3   :  { %1364 = vmatmul.mubr.f32.vlgmr.msra.gmra.mrb[4].mxu0 %v757_v39  ;;  %1648 = vmatmul.mubr.f32.vlgmr.msra.gmra.mrb[4].mxu1 %v757_v39  ;;  %v612_v39 = vpop.f32.mrb[1].mxu1 }
 0x1d4   :  { %3079 = vmatpush1.bf16.msra.mxu0 %v3078_v35  ;;  %3335 = vmatpush1.bf16.msra.mxu1 %v3334_v36  ;;  %v946_v35 = vld [vmem:[#allocation8 + $0x5a8] sm:$0xff]  ;;  %v944_v36 = vld [vmem:[#allocation8 + $0x598] sm:$0xff]  ;;  %v613_v46 = vadd.f32 %v612_v39, %v437_v29  ;;  %v979_v39 = vld [vmem:[#allocation8 + $0x6b0] sm:$0xff] }
 0x1d5   :  { %3081 = vmatprep.subr.bf16.mxu0 %v3080_v40  ;;  %3337 = vmatprep.subr.bf16.mxu1 %v3336_v41  ;;  %v3098_v40 = vpack.c.bf16 %v937_v28, %v933_v27  ;;  %v3354_v41 = vpack.c.bf16 %v939_v33, %v935_v32  ;;  %v3100_v47 = vpack.c.bf16 %v946_v35, %v942_v34  ;;  %v974_v27 = vld [vmem:[#allocation8 + $0x688] sm:$0xff]  ;;  %v976_v29 = vld [vmem:[#allocation8 + $0x698] sm:$0xff]  ;;  %v973_v33 = vld [vmem:[#allocation8 + $0x680] sm:$0xff] }
 0x1d6   :  { %v3356_v48 = vpack.c.bf16 %v948_v37, %v944_v36  ;;  %v978_v28 = vld [vmem:[#allocation8 + $0x6a8] sm:$0xff]  ;;  %v977_v34 = vld [vmem:[#allocation8 + $0x6a0] sm:$0xff]  ;;  %v975_v37 = vld [vmem:[#allocation8 + $0x690] sm:$0xff] }
 0x1d7   :  { %v3116_v35 = vpack.c.bf16 %v978_v28, %v974_v27  ;;  %v1007_v28 = vld [vmem:[#allocation8 + $0x790] sm:$0xff] }
 0x1d8   :  { %3083 = vmatpush1.bf16.msra.mxu0 %v3082_v50  ;;  %3339 = vmatpush1.bf16.msra.mxu1 %v3338_v51  ;;  %v947_v50 = vld [vmem:[#allocation8 + $0x5b0] sm:$0xff]  ;;  %v950_v51 = vld [vmem:[#allocation8 + $0x5c8] sm:$0xff] }
 0x1d9   :  { %3085 = vmatprep.subr.bf16.mxu0 %v3084_v54  ;;  %3341 = vmatprep.subr.bf16.mxu1 %v3340_v55  ;;  %v956_v54 = vld [vmem:[#allocation8 + $0x5f8] sm:$0xff]  ;;  %v760_v55 = vmax.f32 %v613_v46, 0.0  ;;  %v3358_v57 = vpack.c.bf16 %v947_v50, %v943_v49  ;;  %v3104_v60 = vpack.c.bf16 %v954_v52, %v950_v51  ;;  %v3118_v46 = vpack.c.bf16 %v977_v34, %v973_v33  ;;  %v985_v49 = vld [vmem:[#allocation8 + $0x6e0] sm:$0xff]  ;;  %v983_v52 = vld [vmem:[#allocation8 + $0x6d0] sm:$0xff] }
 0x1da   :  { %v3360_v61 = vpack.c.bf16 %v956_v54, %v952_v53  ;;  %v3376_v51 = vpack.c.bf16 %v988_v44, %v984_v42  ;;  %v987_v53 = vld [vmem:[#allocation8 + $0x6f0] sm:$0xff]  ;;  %v990_v54 = vld [vmem:[#allocation8 + $0x708] sm:$0xff]  ;;  %v1020_v33 = vld [vmem:[#allocation8 + $0x7f8] sm:$0xff]  ;;  %v444_v34 = vsub.s32 5, %v4355_v17 }
 0x1db   :  { %1434 = vmatprep.mubr.f32.mxu0 %v760_v55  ;;  %1718 = vmatprep.mubr.f32.mxu1 %v760_v55  ;;  %v994_v55 = vld [vmem:[#allocation8 + $0x728] sm:$0xff]  ;;  %v3378_v59 = vpack.c.bf16 %v987_v53, %v983_v52  ;;  %v1015_v44 = vld [vmem:[#allocation8 + $0x7d0] sm:$0xff] }
 0x1dc   :  { %3087 = vmatpush1.bf16.msra.mxu0 %v3086_v62  ;;  %3343 = vmatpush1.bf16.msra.mxu1 %v3342_v63  ;;  %v951_v62 = vld [vmem:[#allocation8 + $0x5d0] sm:$0xff] }
 0x1dd   :  { %3089 = vmatprep.subr.bf16.mxu0 %v3088_v2  ;;  %3345 = vmatprep.subr.bf16.mxu1 %v3344_v3  ;;  %v955_v63 = vld [vmem:[#allocation8 + $0x5f0] sm:$0xff]  ;;  %v960_v2 = vld [vmem:[#allocation8 + $0x618] sm:$0xff] }
 0x1de   :  { %v964_v3 = vld [vmem:[#allocation8 + $0x638] sm:$0xff]  ;;  %v3362_v5 = vpack.c.bf16 %v955_v63, %v951_v62  ;;  %v3124_v62 = vpack.c.bf16 %v994_v55, %v990_v54  ;;  %v1021_v55 = vld [vmem:[#allocation8 + $0x800] sm:$0xff] }
 0x1df   :  { %v3364_v9 = vpack.c.bf16 %v964_v3, %v960_v2  ;;  %v998_v2 = vld [vmem:[#allocation8 + $0x748] sm:$0xff] }
 0x1e0   :  { %3091 = vmatpush1.bf16.msra.mxu0 %v3090_v10  ;;  %3347 = vmatpush1.bf16.msra.mxu1 %v3346_v11  ;;  %v959_v10 = vld [vmem:[#allocation8 + $0x610] sm:$0xff]  ;;  %v1002_v3 = vld [vmem:[#allocation8 + $0x768] sm:$0xff] }
 0x1e1   :  { %3093 = vmatprep.subr.bf16.mxu0 %v3092_v43  ;;  %3349 = vmatprep.subr.bf16.mxu1 %v3348_v15  ;;  %v963_v11 = vld [vmem:[#allocation8 + $0x630] sm:$0xff]  ;;  %v968_v43 = vld [vmem:[#allocation8 + $0x658] sm:$0xff] }
 0x1e2   :  { %v972_v15 = vld [vmem:[#allocation8 + $0x678] sm:$0xff]  ;;  %v3366_v45 = vpack.c.bf16 %v963_v11, %v959_v10  ;;  %v3128_v10 = vpack.c.bf16 %v1002_v3, %v998_v2 }
 0x1e3   :  { %v3368_v24 = vpack.c.bf16 %v972_v15, %v968_v43  ;;  %v1006_v43 = vld [vmem:[#allocation8 + $0x788] sm:$0xff] }
 0x1e4   :  { %3095 = vmatpush1.bf16.msra.mxu0 %v3094_v25  ;;  %3351 = vmatpush1.bf16.msra.mxu1 %v3350_v26  ;;  %v967_v25 = vld [vmem:[#allocation8 + $0x650] sm:$0xff]  ;;  %v1010_v15 = vld [vmem:[#allocation8 + $0x7a8] sm:$0xff] }
 0x1e5   :  { %3097 = vmatprep.subr.bf16.mxu0 %v3096_v30  ;;  %3353 = vmatprep.subr.bf16.mxu1 %v3352_v31  ;;  %v971_v26 = vld [vmem:[#allocation8 + $0x670] sm:$0xff]  ;;  %v980_v30 = vld [vmem:[#allocation8 + $0x6b8] sm:$0xff]  ;;  %v3114_v31 = vpack.c.bf16 %v969_v22, %v965_v21  ;;  %v4377_v21 = vsub.s32 2, %v4355_v17 }
 0x1e6   :  { %v3370_v32 = vpack.c.bf16 %v971_v26, %v967_v25  ;;  %v3372_v36 = vpack.c.bf16 %v980_v30, %v976_v29  ;;  %v1009_v25 = vld [vmem:[#allocation8 + $0x7a0] sm:$0xff]  ;;  %v3132_v26 = vpack.c.bf16 %v1010_v15, %v1006_v43  ;;  %v1011_v29 = vld [vmem:[#allocation8 + $0x7b0] sm:$0xff]  ;;  %v1014_v30 = vld [vmem:[#allocation8 + $0x7c8] sm:$0xff] }
 0x1e7   :  { %v1044_v43 = vld [vmem:[#allocation8 + $0x8b8] sm:$0xff] }
 0x1e8   :  { %3099 = vmatpush1.bf16.msra.mxu0 %v3098_v40  ;;  %3355 = vmatpush1.bf16.msra.mxu1 %v3354_v41  ;;  %v982_v40 = vld [vmem:[#allocation8 + $0x6c8] sm:$0xff] }
 0x1e9   :  { %3101 = vmatprep.subr.bf16.mxu0 %v3100_v47  ;;  %3357 = vmatprep.subr.bf16.mxu1 %v3356_v48  ;;  %v986_v41 = vld [vmem:[#allocation8 + $0x6e8] sm:$0xff]  ;;  %v3374_v47 = vpack.c.bf16 %v979_v39, %v975_v37  ;;  %v981_v48 = vld [vmem:[#allocation8 + $0x6c0] sm:$0xff]  ;;  %v3390_v37 = vpack.c.bf16 %v1011_v29, %v1007_v28 }
 0x1ea   :  { %v3120_v50 = vpack.c.bf16 %v986_v41, %v982_v40  ;;  %v3122_v58 = vpack.c.bf16 %v985_v49, %v981_v48  ;;  %v1013_v39 = vld [vmem:[#allocation8 + $0x7c0] sm:$0xff]  ;;  %v1026_v48 = vld [vmem:[#allocation8 + $0x828] sm:$0xff]  ;;  %v1024_v49 = vld [vmem:[#allocation8 + $0x818] sm:$0xff] }
 0x1eb   :  { %v1017_v40 = vld [vmem:[#allocation8 + $0x7e0] sm:$0xff]  ;;  %v1046_v28 = vld [vmem:[#allocation8 + $0x8c8] sm:$0xff] }
 0x1ec   :  { %3103 = vmatpush1.bf16.msra.mxu0 %v3102_v56  ;;  %3359 = vmatpush1.bf16.msra.mxu1 %v3358_v57  ;;  %v992_v56 = vld [vmem:[#allocation8 + $0x718] sm:$0xff]  ;;  %v3138_v53 = vpack.c.bf16 %v1017_v40, %v1013_v39  ;;  %v1050_v29 = vld [vmem:[#allocation8 + $0x8e8] sm:$0xff]  ;;  %v1047_v39 = vld [vmem:[#allocation8 + $0x8d0] sm:$0xff] }
 0x1ed   :  { %3105 = vmatprep.subr.bf16.mxu0 %v3104_v60  ;;  %3361 = vmatprep.subr.bf16.mxu1 %v3360_v61  ;;  %v996_v57 = vld [vmem:[#allocation8 + $0x738] sm:$0xff]  ;;  %v989_v60 = vld [vmem:[#allocation8 + $0x700] sm:$0xff]  ;;  %v1051_v40 = vld [vmem:[#allocation8 + $0x8f0] sm:$0xff] }
 0x1ee   :  { %v993_v61 = vld [vmem:[#allocation8 + $0x720] sm:$0xff]  ;;  %v3380_v63 = vpack.c.bf16 %v996_v57, %v992_v56 }
 0x1ef   :  { %v3126_v6 = vpack.c.bf16 %v993_v61, %v989_v60  ;;  %v1025_v56 = vld [vmem:[#allocation8 + $0x820] sm:$0xff]  ;;  %v1023_v60 = vld [vmem:[#allocation8 + $0x810] sm:$0xff] }
 0x1f0   :  { %3107 = vmatpush1.bf16.msra.mxu0 %v3106_v4  ;;  %3363 = vmatpush1.bf16.msra.mxu1 %v3362_v5  ;;  %v1000_v4 = vld [vmem:[#allocation8 + $0x758] sm:$0xff]  ;;  %v1027_v61 = vld [vmem:[#allocation8 + $0x830] sm:$0xff]  ;;  %v3142_v3 = vpack.c.bf16 %v1025_v56, %v1021_v55  ;;  %v1062_v55 = vld [vmem:[#allocation8 + $0x948] sm:$0xff] }
 0x1f1   :  { %3109 = vmatprep.subr.bf16.mxu0 %v3108_v8  ;;  %3365 = vmatprep.subr.bf16.mxu1 %v3364_v9  ;;  %v1004_v5 = vld [vmem:[#allocation8 + $0x778] sm:$0xff]  ;;  %v997_v8 = vld [vmem:[#allocation8 + $0x740] sm:$0xff]  ;;  %v1066_v56 = vld [vmem:[#allocation8 + $0x968] sm:$0xff] }
 0x1f2   :  { %v1001_v9 = vld [vmem:[#allocation8 + $0x760] sm:$0xff]  ;;  %v3384_v11 = vpack.c.bf16 %v1004_v5, %v1000_v4  ;;  %v3398_v4 = vpack.c.bf16 %v1027_v61, %v1023_v60 }
 0x1f3   :  { %v3130_v22 = vpack.c.bf16 %v1001_v9, %v997_v8  ;;  %v1029_v5 = vld [vmem:[#allocation8 + $0x840] sm:$0xff]  ;;  %v1031_v9 = vld [vmem:[#allocation8 + $0x850] sm:$0xff] }
 0x1f4   :  { %3111 = vmatpush1.bf16.msra.mxu0 %v3110_v16  ;;  %3367 = vmatpush1.bf16.msra.mxu1 %v3366_v45  ;;  %v1008_v16 = vld [vmem:[#allocation8 + $0x798] sm:$0xff] }
 0x1f5   :  { %3113 = vmatprep.subr.bf16.mxu0 %v3112_v23  ;;  %3369 = vmatprep.subr.bf16.mxu1 %v3368_v24  ;;  %v1012_v45 = vld [vmem:[#allocation8 + $0x7b8] sm:$0xff]  ;;  %v3386_v23 = vpack.c.bf16 %v1003_v13, %v999_v12  ;;  %v1005_v24 = vld [vmem:[#allocation8 + $0x780] sm:$0xff]  ;;  %v1042_v12 = vld [vmem:[#allocation8 + $0x8a8] sm:$0xff] }
 0x1f6   :  { %v3388_v27 = vpack.c.bf16 %v1012_v45, %v1008_v16  ;;  %v1040_v13 = vld [vmem:[#allocation8 + $0x898] sm:$0xff] }
 0x1f8   :  { %3115 = vmatpush1.bf16.msra.mxu0 %v3114_v31  ;;  %3371 = vmatpush1.bf16.msra.mxu1 %v3370_v32  ;;  %v1018_v31 = vld [vmem:[#allocation8 + $0x7e8] sm:$0xff]  ;;  %v1016_v32 = vld [vmem:[#allocation8 + $0x7d8] sm:$0xff] }
 0x1f9   :  { %3117 = vmatprep.subr.bf16.mxu0 %v3116_v35  ;;  %3373 = vmatprep.subr.bf16.mxu1 %v3372_v36  ;;  %v433_v35 = vrot.slane %v4360_v19, %v4377_v21  ;;  %v3134_v36 = vpack.c.bf16 %v1009_v25, %v1005_v24  ;;  %v3136_v41 = vpack.c.bf16 %v1018_v31, %v1014_v30  ;;  %v1048_v30 = vld [vmem:[#allocation8 + $0x8d8] sm:$0xff] }
 0x1fa   :  { %v3392_v42 = vpack.c.bf16 %v1020_v33, %v1016_v32  ;;  %v3404_v25 = vpack.c.bf16 %v1044_v43, %v1040_v13  ;;  %v1052_v31 = vld [vmem:[#allocation8 + $0x8f8] sm:$0xff]  ;;  %v1071_v43 = vld [vmem:[#allocation8 + $0x990] sm:$0xff] }
 0x1fb   :  { %v611_v52 = vadd.f32 %v4374_v38, %v433_v35  ;;  %v1049_v35 = vld [vmem:[#allocation8 + $0x8e0] sm:$0xff] }
 0x1fc   :  { %3119 = vmatpush1.bf16.msra.mxu0 %v3118_v46  ;;  %3375 = vmatpush1.bf16.msra.mxu1 %v3374_v47  ;;  %v1019_v46 = vld [vmem:[#allocation8 + $0x7f0] sm:$0xff]  ;;  %v1022_v47 = vld [vmem:[#allocation8 + $0x808] sm:$0xff] }
 0x1fd   :  { %3121 = vmatprep.subr.bf16.mxu0 %v3120_v50  ;;  %3377 = vmatprep.subr.bf16.mxu1 %v3376_v51  ;;  %v1028_v50 = vld [vmem:[#allocation8 + $0x838] sm:$0xff]  ;;  %v445_v51 = vrot.slane %v4360_v19, %v444_v34  ;;  %v3394_v54 = vpack.c.bf16 %v1019_v46, %v1015_v44  ;;  %v759_v2 = vmax.f32 %v611_v52, 0.0  ;;  %v1045_v34 = vld [vmem:[#allocation8 + $0x8c0] sm:$0xff] }
 0x1fe   :  { %v1032_v19 = vld [vmem:[#allocation8 + $0x858] sm:$0xff] }
 0x1ff   :  { %v3400_v8 = vpack.c.bf16 %v1036_v1, %v1032_v19  ;;  %v1056_v44 = vld [vmem:[#allocation8 + $0x918] sm:$0xff]  ;;  %v1063_v1 = vld [vmem:[#allocation8 + $0x950] sm:$0xff] }
 0x200   :  { %3123 = vmatpush1.bf16.msra.mxu0 %v3122_v58  ;;  %3379 = vmatpush1.bf16.msra.mxu1 %v3378_v59  ;;  %v3140_v58 = vpack.c.bf16 %v1026_v48, %v1022_v47  ;;  %v3396_v59 = vpack.c.bf16 %v1028_v50, %v1024_v49  ;;  %v1060_v46 = vld [vmem:[#allocation8 + $0x938] sm:$0xff]  ;;  %v3154_v47 = vpack.c.bf16 %v1049_v35, %v1045_v34  ;;  %v1053_v49 = vld [vmem:[#allocation8 + $0x900] sm:$0xff] }
 0x201   :  { %3125 = vmatprep.subr.bf16.mxu0 %v3124_v62  ;;  %3381 = vmatprep.subr.bf16.mxu1 %v3380_v63  ;;  %v1030_v62 = vld [vmem:[#allocation8 + $0x848] sm:$0xff]  ;;  %v3410_v48 = vpack.c.bf16 %v1051_v40, %v1047_v39  ;;  %v1057_v50 = vld [vmem:[#allocation8 + $0x920] sm:$0xff]  ;;  %v3412_v52 = vpack.c.bf16 %v1060_v46, %v1056_v44  ;;  %v1088_v34 = vld [vmem:[#allocation8 + $0xa18] sm:$0xff] }
 0x202   :  { %v3158_v60 = vpack.c.bf16 %v1057_v50, %v1053_v49  ;;  %v1092_v35 = vld [vmem:[#allocation8 + $0xa38] sm:$0xff]  ;;  %v1085_v39 = vld [vmem:[#allocation8 + $0xa00] sm:$0xff]  ;;  %v1087_v44 = vld [vmem:[#allocation8 + $0xa10] sm:$0xff] }
 0x203   :  { %v1089_v40 = vld [vmem:[#allocation8 + $0xa20] sm:$0xff]  ;;  %v1091_v46 = vld [vmem:[#allocation8 + $0xa30] sm:$0xff]  ;;  %v1096_v49 = vld [vmem:[#allocation8 + $0xa58] sm:$0xff] }
 0x204   :  { %3127 = vmatpush1.bf16.msra.mxu0 %v3126_v6  ;;  %3383 = vmatpush1.bf16.msra.mxu1 %v3382_v7  ;;  %v1033_v6 = vld [vmem:[#allocation8 + $0x860] sm:$0xff]  ;;  %v3144_v7 = vpack.c.bf16 %v1034_v0, %v1030_v62  ;;  %v3160_v0 = vpack.c.bf16 %v1066_v56, %v1062_v55  ;;  %v1100_v50 = vld [vmem:[#allocation8 + $0xa78] sm:$0xff] }
 0x205   :  { %3129 = vmatprep.subr.bf16.mxu0 %v3128_v10  ;;  %3385 = vmatprep.subr.bf16.mxu1 %v3384_v11  ;;  %v1035_v10 = vld [vmem:[#allocation8 + $0x870] sm:$0xff]  ;;  %v1038_v11 = vld [vmem:[#allocation8 + $0x888] sm:$0xff]  ;;  %v3146_v16 = vpack.c.bf16 %v1033_v6, %v1029_v5  ;;  %v1061_v62 = vld [vmem:[#allocation8 + $0x940] sm:$0xff]  ;;  %v3432_v56 = vpack.c.bf16 %v1100_v50, %v1096_v49 }
 0x206   :  { %v3402_v45 = vpack.c.bf16 %v1035_v10, %v1031_v9  ;;  %v3148_v24 = vpack.c.bf16 %v1042_v12, %v1038_v11  ;;  %v1076_v5 = vld [vmem:[#allocation8 + $0x9b8] sm:$0xff]  ;;  %v1069_v10 = vld [vmem:[#allocation8 + $0x980] sm:$0xff]  ;;  %v1127_v49 = vld [vmem:[#allocation8 + $0xb50] sm:$0xff] }
 0x207   :  { %v1073_v11 = vld [vmem:[#allocation8 + $0x9a0] sm:$0xff]  ;;  %v1131_v50 = vld [vmem:[#allocation8 + $0xb70] sm:$0xff] }
 0x208   :  { %3131 = vmatpush1.bf16.msra.mxu0 %v3130_v22  ;;  %3387 = vmatpush1.bf16.msra.mxu1 %v3386_v23  ;;  %v1037_v22 = vld [vmem:[#allocation8 + $0x880] sm:$0xff] }
 0x209   :  { %3133 = vmatprep.subr.bf16.mxu0 %v3132_v26  ;;  %3389 = vmatprep.subr.bf16.mxu1 %v3388_v27  ;;  %v1041_v23 = vld [vmem:[#allocation8 + $0x8a0] sm:$0xff]  ;;  %v1039_v26 = vld [vmem:[#allocation8 + $0x890] sm:$0xff] }
 0x20a   :  { %v1043_v27 = vld [vmem:[#allocation8 + $0x8b0] sm:$0xff]  ;;  %v3150_v32 = vpack.c.bf16 %v1041_v23, %v1037_v22  ;;  %v1080_v22 = vld [vmem:[#allocation8 + $0x9d8] sm:$0xff] }
 0x20b   :  { %v3406_v33 = vpack.c.bf16 %v1043_v27, %v1039_v26  ;;  %v1084_v23 = vld [vmem:[#allocation8 + $0x9f8] sm:$0xff]  ;;  %v1077_v26 = vld [vmem:[#allocation8 + $0x9c0] sm:$0xff] }
 0x20c   :  { %3135 = vmatpush1.bf16.msra.mxu0 %v3134_v36  ;;  %3391 = vmatpush1.bf16.msra.mxu1 %v3390_v37  ;;  %v4384_v57 = vpop.f32.mrb[2].mxu0  ;;  %v3152_v36 = vpack.c.bf16 %v1050_v29, %v1046_v28  ;;  %v3408_v37 = vpack.c.bf16 %v1052_v31, %v1048_v30  ;;  %v1081_v27 = vld [vmem:[#allocation8 + $0x9e0] sm:$0xff]  ;;  %v3424_v29 = vpack.c.bf16 %v1084_v23, %v1080_v22  ;;  %v1079_v30 = vld [vmem:[#allocation8 + $0x9d0] sm:$0xff] }
 0x20d   :  { %3137 = vmatprep.subr.bf16.mxu0 %v3136_v41  ;;  %3393 = vmatprep.subr.bf16.mxu1 %v3392_v42  ;;  %v683_v63 = vpop.f32.mrb[3].mxu0  ;;  %v1054_v41 = vld [vmem:[#allocation8 + $0x908] sm:$0xff]  ;;  %v1083_v31 = vld [vmem:[#allocation8 + $0x9f0] sm:$0xff] }
 0x20e   :  { %v684_v38 = vadd.f32 %v683_v63, %v445_v51  ;;  %v1058_v42 = vld [vmem:[#allocation8 + $0x928] sm:$0xff]  ;;  %v1065_v63 = vld [vmem:[#allocation8 + $0x960] sm:$0xff]  ;;  %v1111_v22 = vld [vmem:[#allocation8 + $0xad0] sm:$0xff] }
 0x20f   :  { %v3156_v51 = vpack.c.bf16 %v1058_v42, %v1054_v41  ;;  %v3428_v42 = vpack.c.bf16 %v1092_v35, %v1088_v34  ;;  %v1115_v23 = vld [vmem:[#allocation8 + $0xaf0] sm:$0xff] }
 0x210   :  { %3139 = vmatpush1.bf16.msra.mxu0 %v3138_v53  ;;  %3395 = vmatpush1.bf16.msra.mxu1 %v3394_v54  ;;  %v762_v15 = vmax.f32 %v684_v38, 0.0  ;;  %v1055_v53 = vld [vmem:[#allocation8 + $0x910] sm:$0xff] }
 0x211   :  { %3141 = vmatprep.subr.bf16.mxu0 %v3140_v58  ;;  %3397 = vmatprep.subr.bf16.mxu1 %v3396_v59  ;;  %v1059_v54 = vld [vmem:[#allocation8 + $0x930] sm:$0xff]  ;;  %v1064_v58 = vld [vmem:[#allocation8 + $0x958] sm:$0xff] }
 0x212   :  { %v1068_v59 = vld [vmem:[#allocation8 + $0x978] sm:$0xff]  ;;  %v3414_v61 = vpack.c.bf16 %v1059_v54, %v1055_v53  ;;  %v1067_v38 = vld [vmem:[#allocation8 + $0x970] sm:$0xff]  ;;  %v1093_v53 = vld [vmem:[#allocation8 + $0xa40] sm:$0xff] }
 0x213   :  { %1435 = vmatmul.mubr.f32.vlgmr.msra.gmra.mrb[4].mxu0 %v759_v2  ;;  %1719 = vmatmul.mubr.f32.vlgmr.msra.gmra.mrb[4].mxu1 %v759_v2  ;;  %v3416_v19 = vpack.c.bf16 %v1068_v59, %v1064_v58  ;;  %v1070_v2 = vld [vmem:[#allocation8 + $0x988] sm:$0xff]  ;;  %v3418_v9 = vpack.c.bf16 %v1067_v38, %v1063_v1  ;;  %v1097_v54 = vld [vmem:[#allocation8 + $0xa60] sm:$0xff]  ;;  %v1095_v58 = vld [vmem:[#allocation8 + $0xa50] sm:$0xff] }
 0x214   :  { %3143 = vmatpush1.bf16.msra.mxu0 %v3142_v3  ;;  %3399 = vmatpush1.bf16.msra.mxu1 %v3398_v4  ;;  %v1074_v3 = vld [vmem:[#allocation8 + $0x9a8] sm:$0xff]  ;;  %v1072_v4 = vld [vmem:[#allocation8 + $0x998] sm:$0xff]  ;;  %v1099_v59 = vld [vmem:[#allocation8 + $0xa70] sm:$0xff] }
 0x215   :  { %3145 = vmatprep.subr.bf16.mxu0 %v3144_v7  ;;  %3401 = vmatprep.subr.bf16.mxu1 %v3400_v8  ;;  %v3162_v8 = vpack.c.bf16 %v1065_v63, %v1061_v62  ;;  %v3164_v12 = vpack.c.bf16 %v1074_v3, %v1070_v2  ;;  %v3420_v13 = vpack.c.bf16 %v1076_v5, %v1072_v4  ;;  %v1104_v62 = vld [vmem:[#allocation8 + $0xa98] sm:$0xff]  ;;  %v1101_v1 = vld [vmem:[#allocation8 + $0xa80] sm:$0xff]  ;;  %v1103_v4 = vld [vmem:[#allocation8 + $0xa90] sm:$0xff] }
 0x216   :  { %1505 = vmatprep.mubr.f32.mxu0 %v762_v15  ;;  %1789 = vmatprep.mubr.f32.mxu1 %v762_v15  ;;  %v1075_v15 = vld [vmem:[#allocation8 + $0x9b0] sm:$0xff]  ;;  %v1108_v63 = vld [vmem:[#allocation8 + $0xab8] sm:$0xff]  ;;  %v1105_v38 = vld [vmem:[#allocation8 + $0xaa0] sm:$0xff] }
 0x217   :  { %v3436_v3 = vpack.c.bf16 %v1108_v63, %v1104_v62  ;;  %v1107_v5 = vld [vmem:[#allocation8 + $0xab0] sm:$0xff] }
 0x218   :  { %3147 = vmatpush1.bf16.msra.mxu0 %v3146_v16  ;;  %3403 = vmatpush1.bf16.msra.mxu1 %v3402_v45  ;;  %v1078_v16 = vld [vmem:[#allocation8 + $0x9c8] sm:$0xff]  ;;  %v1119_v34 = vld [vmem:[#allocation8 + $0xb10] sm:$0xff] }
 0x219   :  { %3149 = vmatprep.subr.bf16.mxu0 %v3148_v24  ;;  %3405 = vmatprep.subr.bf16.mxu1 %v3404_v25  ;;  %v1082_v45 = vld [vmem:[#allocation8 + $0x9e8] sm:$0xff]  ;;  %v3166_v24 = vpack.c.bf16 %v1073_v11, %v1069_v10  ;;  %v3422_v25 = vpack.c.bf16 %v1075_v15, %v1071_v43  ;;  %v1112_v10 = vld [vmem:[#allocation8 + $0xad8] sm:$0xff]  ;;  %v1109_v43 = vld [vmem:[#allocation8 + $0xac0] sm:$0xff] }
 0x21a   :  { %v4386_v6 = vpop.f32.mrb[2].mxu1  ;;  %v3168_v28 = vpack.c.bf16 %v1082_v45, %v1078_v16  ;;  %v1116_v11 = vld [vmem:[#allocation8 + $0xaf8] sm:$0xff]  ;;  %v1113_v15 = vld [vmem:[#allocation8 + $0xae0] sm:$0xff]  ;;  %v1123_v35 = vld [vmem:[#allocation8 + $0xb30] sm:$0xff] }
 0x21b   :  { %v4388_v7 = vpop.f32.mrb[3].mxu1  ;;  %v3440_v45 = vpack.c.bf16 %v1116_v11, %v1112_v10  ;;  %v1135_v63 = vld [vmem:[#allocation8 + $0xb90] sm:$0xff]  ;;  %v1141_v10 = vld [vmem:[#allocation8 + $0xbc0] sm:$0xff] }
 0x21c   :  { %3151 = vmatpush1.bf16.msra.mxu0 %v3150_v32  ;;  %3407 = vmatpush1.bf16.msra.mxu1 %v3406_v33  ;;  %v1086_v32 = vld [vmem:[#allocation8 + $0xa08] sm:$0xff]  ;;  %v1145_v11 = vld [vmem:[#allocation8 + $0xbe0] sm:$0xff] }
 0x21d   :  { %3153 = vmatprep.subr.bf16.mxu0 %v3152_v36  ;;  %3409 = vmatprep.subr.bf16.mxu1 %v3408_v37  ;;  %v1090_v33 = vld [vmem:[#allocation8 + $0xa28] sm:$0xff]  ;;  %v3170_v36 = vpack.c.bf16 %v1081_v27, %v1077_v26  ;;  %v3426_v37 = vpack.c.bf16 %v1083_v31, %v1079_v30  ;;  %v1120_v26 = vld [vmem:[#allocation8 + $0xb18] sm:$0xff]  ;;  %v1117_v30 = vld [vmem:[#allocation8 + $0xb00] sm:$0xff] }
 0x21e   :  { %v3172_v41 = vpack.c.bf16 %v1090_v33, %v1086_v32  ;;  %v1124_v27 = vld [vmem:[#allocation8 + $0xb38] sm:$0xff]  ;;  %v1121_v31 = vld [vmem:[#allocation8 + $0xb20] sm:$0xff] }
 0x21f   :  { %v3444_v33 = vpack.c.bf16 %v1124_v27, %v1120_v26  ;;  %v3202_v26 = vpack.c.bf16 %v1145_v11, %v1141_v10  ;;  %v1175_v10 = vld [vmem:[#allocation8 + $0xcd0] sm:$0xff] }
 0x220   :  { %3155 = vmatpush1.bf16.msra.mxu0 %v3154_v47  ;;  %3411 = vmatpush1.bf16.msra.mxu1 %v3410_v48  ;;  %v1094_v47 = vld [vmem:[#allocation8 + $0xa48] sm:$0xff]  ;;  %v1179_v11 = vld [vmem:[#allocation8 + $0xcf0] sm:$0xff] }
 0x221   :  { %3157 = vmatprep.subr.bf16.mxu0 %v3156_v51  ;;  %3413 = vmatprep.subr.bf16.mxu1 %v3412_v52  ;;  %v1098_v48 = vld [vmem:[#allocation8 + $0xa68] sm:$0xff]  ;;  %v3174_v51 = vpack.c.bf16 %v1089_v40, %v1085_v39  ;;  %v3430_v52 = vpack.c.bf16 %v1091_v46, %v1087_v44  ;;  %v1128_v39 = vld [vmem:[#allocation8 + $0xb58] sm:$0xff]  ;;  %v1125_v44 = vld [vmem:[#allocation8 + $0xb40] sm:$0xff] }
 0x222   :  { %v3176_v55 = vpack.c.bf16 %v1098_v48, %v1094_v47  ;;  %v1132_v40 = vld [vmem:[#allocation8 + $0xb78] sm:$0xff]  ;;  %v1129_v46 = vld [vmem:[#allocation8 + $0xb60] sm:$0xff] }
 0x223   :  { %v3448_v48 = vpack.c.bf16 %v1132_v40, %v1128_v39 }
 0x224   :  { %3159 = vmatpush1.bf16.msra.mxu0 %v3158_v60  ;;  %3415 = vmatpush1.bf16.msra.mxu1 %v3414_v61  ;;  %v1102_v60 = vld [vmem:[#allocation8 + $0xa88] sm:$0xff] }
 0x225   :  { %3161 = vmatprep.subr.bf16.mxu0 %v3160_v0  ;;  %3417 = vmatprep.subr.bf16.mxu1 %v3416_v19  ;;  %v1106_v61 = vld [vmem:[#allocation8 + $0xaa8] sm:$0xff]  ;;  %v3178_v0 = vpack.c.bf16 %v1097_v54, %v1093_v53  ;;  %v3434_v19 = vpack.c.bf16 %v1099_v59, %v1095_v58  ;;  %v1136_v53 = vld [vmem:[#allocation8 + $0xb98] sm:$0xff]  ;;  %v3450_v58 = vpack.c.bf16 %v1131_v50, %v1127_v49  ;;  %v1133_v59 = vld [vmem:[#allocation8 + $0xb80] sm:$0xff] }
 0x226   :  { %v3180_v2 = vpack.c.bf16 %v1106_v61, %v1102_v60  ;;  %v1140_v54 = vld [vmem:[#allocation8 + $0xbb8] sm:$0xff]  ;;  %v1137_v60 = vld [vmem:[#allocation8 + $0xba0] sm:$0xff]  ;;  %v1163_v49 = vld [vmem:[#allocation8 + $0xc70] sm:$0xff] }
 0x227   :  { %v3452_v62 = vpack.c.bf16 %v1140_v54, %v1136_v53  ;;  %v1166_v50 = vld [vmem:[#allocation8 + $0xc88] sm:$0xff]  ;;  %v1172_v53 = vld [vmem:[#allocation8 + $0xcb8] sm:$0xff] }
 0x228   :  { %3163 = vmatpush1.bf16.msra.mxu0 %v3162_v8  ;;  %3419 = vmatpush1.bf16.msra.mxu1 %v3418_v9  ;;  %v1110_v8 = vld [vmem:[#allocation8 + $0xac8] sm:$0xff] }
 0x229   :  { %3165 = vmatprep.subr.bf16.mxu0 %v3164_v12  ;;  %3421 = vmatprep.subr.bf16.mxu1 %v3420_v13  ;;  %v1114_v9 = vld [vmem:[#allocation8 + $0xae8] sm:$0xff]  ;;  %v3182_v12 = vpack.c.bf16 %v1105_v38, %v1101_v1  ;;  %v3438_v13 = vpack.c.bf16 %v1107_v5, %v1103_v4  ;;  %v1144_v38 = vld [vmem:[#allocation8 + $0xbd8] sm:$0xff] }
 0x22a   :  { %v3184_v16 = vpack.c.bf16 %v1114_v9, %v1110_v8  ;;  %v1146_v1 = vld [vmem:[#allocation8 + $0xbe8] sm:$0xff]  ;;  %v4392_v4 = vld [vmem:[#allocation7] sm:$0xff]  ;;  %v3198_v8 = vpack.c.bf16 %v1137_v60, %v1133_v59 }
 0x22c   :  { %3167 = vmatpush1.bf16.msra.mxu0 %v3166_v24  ;;  %3423 = vmatpush1.bf16.msra.mxu1 %v3422_v25  ;;  %v1118_v24 = vld [vmem:[#allocation8 + $0xb08] sm:$0xff] }
 0x22d   :  { %3169 = vmatprep.subr.bf16.mxu0 %v3168_v28  ;;  %3425 = vmatprep.subr.bf16.mxu1 %v3424_v29  ;;  %v1122_v25 = vld [vmem:[#allocation8 + $0xb28] sm:$0xff]  ;;  %v3186_v28 = vpack.c.bf16 %v1113_v15, %v1109_v43  ;;  %v3442_v29 = vpack.c.bf16 %v1115_v23, %v1111_v22  ;;  %v1143_v43 = vld [vmem:[#allocation8 + $0xbd0] sm:$0xff]  ;;  %v1152_v22 = vld [vmem:[#allocation8 + $0xc18] sm:$0xff] }
 0x22e   :  { %v3188_v32 = vpack.c.bf16 %v1122_v25, %v1118_v24  ;;  %v1147_v15 = vld [vmem:[#allocation8 + $0xbf0] sm:$0xff]  ;;  %v1156_v23 = vld [vmem:[#allocation8 + $0xc38] sm:$0xff] }
 0x22f   :  { %v3458_v27 = vpack.c.bf16 %v1147_v15, %v1143_v43  ;;  %v1184_v43 = vld [vmem:[#allocation8 + $0xd18] sm:$0xff] }
 0x230   :  { %3171 = vmatpush1.bf16.msra.mxu0 %v3170_v36  ;;  %3427 = vmatpush1.bf16.msra.mxu1 %v3426_v37  ;;  %v1126_v36 = vld [vmem:[#allocation8 + $0xb48] sm:$0xff]  ;;  %v1188_v15 = vld [vmem:[#allocation8 + $0xd38] sm:$0xff] }
 0x231   :  { %3173 = vmatprep.subr.bf16.mxu0 %v3172_v41  ;;  %3429 = vmatprep.subr.bf16.mxu1 %v3428_v42  ;;  %v1130_v37 = vld [vmem:[#allocation8 + $0xb68] sm:$0xff]  ;;  %v3190_v41 = vpack.c.bf16 %v1121_v31, %v1117_v30  ;;  %v3446_v42 = vpack.c.bf16 %v1123_v35, %v1119_v34  ;;  %v3460_v31 = vpack.c.bf16 %v1156_v23, %v1152_v22  ;;  %v1181_v22 = vld [vmem:[#allocation8 + $0xd00] sm:$0xff] }
 0x232   :  { %v3192_v47 = vpack.c.bf16 %v1130_v37, %v1126_v36  ;;  %v1158_v34 = vld [vmem:[#allocation8 + $0xc48] sm:$0xff]  ;;  %v1160_v36 = vld [vmem:[#allocation8 + $0xc58] sm:$0xff]  ;;  %v1185_v23 = vld [vmem:[#allocation8 + $0xd20] sm:$0xff] }
 0x233   :  { %v1162_v35 = vld [vmem:[#allocation8 + $0xc68] sm:$0xff]  ;;  %v1164_v37 = vld [vmem:[#allocation8 + $0xc78] sm:$0xff] }
 0x234   :  { %3175 = vmatpush1.bf16.msra.mxu0 %v3174_v51  ;;  %3431 = vmatpush1.bf16.msra.mxu1 %v3430_v52  ;;  %v1134_v51 = vld [vmem:[#allocation8 + $0xb88] sm:$0xff] }
 0x235   :  { %3177 = vmatprep.subr.bf16.mxu0 %v3176_v55  ;;  %3433 = vmatprep.subr.bf16.mxu1 %v3432_v56  ;;  %v1138_v52 = vld [vmem:[#allocation8 + $0xba8] sm:$0xff]  ;;  %v440_v55 = vsub.s32 4, %v4355_v17  ;;  %v3194_v56 = vpack.c.bf16 %v1129_v46, %v1125_v44  ;;  %v1161_v44 = vld [vmem:[#allocation8 + $0xc60] sm:$0xff]  ;;  %v3208_v46 = vpack.c.bf16 %v1162_v35, %v1158_v34 }
 0x236   :  { %v3196_v61 = vpack.c.bf16 %v1138_v52, %v1134_v51  ;;  %v1170_v51 = vld [vmem:[#allocation8 + $0xca8] sm:$0xff]  ;;  %v1168_v52 = vld [vmem:[#allocation8 + $0xc98] sm:$0xff]  ;;  %v1189_v34 = vld [vmem:[#allocation8 + $0xd40] sm:$0xff] }
 0x237   :  { %v441_v5 = vrot.slane %v4392_v4, %v440_v55  ;;  %v3212_v59 = vpack.c.bf16 %v1170_v51, %v1166_v50  ;;  %v3468_v60 = vpack.c.bf16 %v1172_v53, %v1168_v52  ;;  %v1193_v35 = vld [vmem:[#allocation8 + $0xd60] sm:$0xff]  ;;  %v1199_v52 = vld [vmem:[#allocation8 + $0xd90] sm:$0xff] }
 0x238   :  { %3179 = vmatpush1.bf16.msra.mxu0 %v3178_v0  ;;  %3435 = vmatpush1.bf16.msra.mxu1 %v3434_v19  ;;  %v1139_v0 = vld [vmem:[#allocation8 + $0xbb0] sm:$0xff]  ;;  %v1142_v19 = vld [vmem:[#allocation8 + $0xbc8] sm:$0xff] }
 0x239   :  { %3181 = vmatprep.subr.bf16.mxu0 %v3180_v2  ;;  %3437 = vmatprep.subr.bf16.mxu1 %v3436_v3  ;;  %v1148_v2 = vld [vmem:[#allocation8 + $0xbf8] sm:$0xff]  ;;  %v452_v3 = vsub.s32 7, %v4355_v17  ;;  %v3454_v9 = vpack.c.bf16 %v1139_v0, %v1135_v63  ;;  %v682_v25 = vadd.f32 %v4384_v57, %v441_v5  ;;  %v1174_v63 = vld [vmem:[#allocation8 + $0xcc8] sm:$0xff]  ;;  %v1177_v5 = vld [vmem:[#allocation8 + $0xce0] sm:$0xff] }
 0x23a   :  { %v1178_v0 = vld [vmem:[#allocation8 + $0xce8] sm:$0xff]  ;;  %v1203_v53 = vld [vmem:[#allocation8 + $0xdb0] sm:$0xff] }
 0x23b   :  { %v453_v24 = vrot.slane %v4392_v4, %v452_v3  ;;  %v761_v40 = vmax.f32 %v682_v25, 0.0  ;;  %v1173_v3 = vld [vmem:[#allocation8 + $0xcc0] sm:$0xff]  ;;  %v3476_v25 = vpack.c.bf16 %v1188_v15, %v1184_v43  ;;  %v1219_v43 = vld [vmem:[#allocation8 + $0xe30] sm:$0xff]  ;;  %v1222_v15 = vld [vmem:[#allocation8 + $0xe48] sm:$0xff] }
 0x23c   :  { %3183 = vmatpush1.bf16.msra.mxu0 %v3182_v12  ;;  %3439 = vmatpush1.bf16.msra.mxu1 %v3438_v13  ;;  %v3200_v12 = vpack.c.bf16 %v1146_v1, %v1142_v19  ;;  %v3456_v13 = vpack.c.bf16 %v1148_v2, %v1144_v38  ;;  %v1176_v19 = vld [vmem:[#allocation8 + $0xcd8] sm:$0xff] }
 0x23d   :  { %3185 = vmatprep.subr.bf16.mxu0 %v3184_v16  ;;  %3441 = vmatprep.subr.bf16.mxu1 %v3440_v45  ;;  %v1150_v16 = vld [vmem:[#allocation8 + $0xc08] sm:$0xff]  ;;  %v755_v39 = vadd.f32 %v4388_v7, %v453_v24  ;;  %v1180_v1 = vld [vmem:[#allocation8 + $0xcf8] sm:$0xff] }
 0x23e   :  { %v1154_v45 = vld [vmem:[#allocation8 + $0xc28] sm:$0xff] }
 0x23f   :  { %v3204_v30 = vpack.c.bf16 %v1154_v45, %v1150_v16  ;;  %v764_v54 = vmax.f32 %v755_v39, 0.0  ;;  %v3218_v16 = vpack.c.bf16 %v1177_v5, %v1173_v3  ;;  %v3474_v45 = vpack.c.bf16 %v1179_v11, %v1175_v10  ;;  %v1191_v39 = vld [vmem:[#allocation8 + $0xd50] sm:$0xff]  ;;  %v1220_v3 = vld [vmem:[#allocation8 + $0xe38] sm:$0xff]  ;;  %v1217_v10 = vld [vmem:[#allocation8 + $0xe20] sm:$0xff] }
 0x240   :  { %3187 = vmatpush1.bf16.msra.mxu0 %v3186_v28  ;;  %3443 = vmatpush1.bf16.msra.mxu1 %v3442_v29  ;;  %v1149_v28 = vld [vmem:[#allocation8 + $0xc00] sm:$0xff] }
 0x241   :  { %3189 = vmatprep.subr.bf16.mxu0 %v3188_v32  ;;  %3445 = vmatprep.subr.bf16.mxu1 %v3444_v33  ;;  %v1153_v29 = vld [vmem:[#allocation8 + $0xc20] sm:$0xff]  ;;  %v1151_v32 = vld [vmem:[#allocation8 + $0xc10] sm:$0xff] }
 0x242   :  { %v1155_v33 = vld [vmem:[#allocation8 + $0xc30] sm:$0xff]  ;;  %v3206_v57 = vpack.c.bf16 %v1153_v29, %v1149_v28  ;;  %v1190_v28 = vld [vmem:[#allocation8 + $0xd48] sm:$0xff] }
 0x243   :  { %v1194_v29 = vld [vmem:[#allocation8 + $0xd68] sm:$0xff] }
 0x244   :  { %3191 = vmatpush1.bf16.msra.mxu0 %v3190_v41  ;;  %3447 = vmatpush1.bf16.msra.mxu1 %v3446_v42  ;;  %v3462_v41 = vpack.c.bf16 %v1155_v33, %v1151_v32  ;;  %v1157_v42 = vld [vmem:[#allocation8 + $0xc40] sm:$0xff]  ;;  %v3222_v32 = vpack.c.bf16 %v1185_v23, %v1181_v22  ;;  %v1228_v22 = vld [vmem:[#allocation8 + $0xe78] sm:$0xff] }
 0x245   :  { %3193 = vmatprep.subr.bf16.mxu0 %v3192_v47  ;;  %3449 = vmatprep.subr.bf16.mxu1 %v3448_v48  ;;  %v3464_v47 = vpack.c.bf16 %v1164_v37, %v1160_v36  ;;  %v1159_v48 = vld [vmem:[#allocation8 + $0xc50] sm:$0xff]  ;;  %v3210_v7 = vpack.c.bf16 %v1161_v44, %v1157_v42  ;;  %v3224_v36 = vpack.c.bf16 %v1194_v29, %v1190_v28  ;;  %v1200_v42 = vld [vmem:[#allocation8 + $0xd98] sm:$0xff] }
 0x246   :  { %v3466_v55 = vpack.c.bf16 %v1163_v49, %v1159_v48  ;;  %v1204_v44 = vld [vmem:[#allocation8 + $0xdb8] sm:$0xff]  ;;  %v1197_v48 = vld [vmem:[#allocation8 + $0xd80] sm:$0xff]  ;;  %v1223_v29 = vld [vmem:[#allocation8 + $0xe50] sm:$0xff] }
 0x247   :  { %v1201_v49 = vld [vmem:[#allocation8 + $0xda0] sm:$0xff]  ;;  %v3484_v51 = vpack.c.bf16 %v1204_v44, %v1200_v42  ;;  %v1235_v42 = vld [vmem:[#allocation8 + $0xeb0] sm:$0xff]  ;;  %v1238_v44 = vld [vmem:[#allocation8 + $0xec8] sm:$0xff] }
 0x248   :  { %3195 = vmatpush1.bf16.msra.mxu0 %v3194_v56  ;;  %3451 = vmatpush1.bf16.msra.mxu1 %v3450_v58  ;;  %v1165_v56 = vld [vmem:[#allocation8 + $0xc80] sm:$0xff] }
 0x249   :  { %3197 = vmatprep.subr.bf16.mxu0 %v3196_v61  ;;  %3453 = vmatprep.subr.bf16.mxu1 %v3452_v62  ;;  %v1169_v58 = vld [vmem:[#allocation8 + $0xca0] sm:$0xff]  ;;  %v1167_v61 = vld [vmem:[#allocation8 + $0xc90] sm:$0xff] }
 0x24a   :  { %v1171_v62 = vld [vmem:[#allocation8 + $0xcb0] sm:$0xff]  ;;  %v3214_v38 = vpack.c.bf16 %v1169_v58, %v1165_v56  ;;  %v1212_v56 = vld [vmem:[#allocation8 + $0xdf8] sm:$0xff]  ;;  %v3230_v58 = vpack.c.bf16 %v1201_v49, %v1197_v48 }
 0x24b   :  { %v3470_v2 = vpack.c.bf16 %v1171_v62, %v1167_v61  ;;  %v1209_v61 = vld [vmem:[#allocation8 + $0xde0] sm:$0xff]  ;;  %v1244_v48 = vld [vmem:[#allocation8 + $0xef8] sm:$0xff] }
 0x24c   :  { %3199 = vmatpush1.bf16.msra.mxu0 %v3198_v8  ;;  %3455 = vmatpush1.bf16.msra.mxu1 %v3454_v9  ;;  %v3216_v8 = vpack.c.bf16 %v1178_v0, %v1174_v63  ;;  %v3472_v9 = vpack.c.bf16 %v1180_v1, %v1176_v19  ;;  %v1207_v0 = vld [vmem:[#allocation8 + $0xdd0] sm:$0xff]  ;;  %v1214_v1 = vld [vmem:[#allocation8 + $0xe08] sm:$0xff] }
 0x24d   :  { %3201 = vmatprep.subr.bf16.mxu0 %v3200_v12  ;;  %3457 = vmatprep.subr.bf16.mxu1 %v3456_v13  ;;  %v1182_v12 = vld [vmem:[#allocation8 + $0xd08] sm:$0xff]  ;;  %v1211_v19 = vld [vmem:[#allocation8 + $0xdf0] sm:$0xff] }
 0x24e   :  { %v1186_v13 = vld [vmem:[#allocation8 + $0xd28] sm:$0xff] }
 0x24f   :  { %v3220_v24 = vpack.c.bf16 %v1186_v13, %v1182_v12  ;;  %v1215_v13 = vld [vmem:[#allocation8 + $0xe10] sm:$0xff] }
 0x250   :  { %3203 = vmatpush1.bf16.msra.mxu0 %v3202_v26  ;;  %3459 = vmatpush1.bf16.msra.mxu1 %v3458_v27  ;;  %v1183_v26 = vld [vmem:[#allocation8 + $0xd10] sm:$0xff] }
 0x251   :  { %3205 = vmatprep.subr.bf16.mxu0 %v3204_v30  ;;  %3461 = vmatprep.subr.bf16.mxu1 %v3460_v31  ;;  %v1187_v27 = vld [vmem:[#allocation8 + $0xd30] sm:$0xff]  ;;  %v1192_v30 = vld [vmem:[#allocation8 + $0xd58] sm:$0xff] }
 0x252   :  { %v1196_v31 = vld [vmem:[#allocation8 + $0xd78] sm:$0xff]  ;;  %v3478_v33 = vpack.c.bf16 %v1187_v27, %v1183_v26  ;;  %v1225_v26 = vld [vmem:[#allocation8 + $0xe60] sm:$0xff] }
 0x253   :  { %1506 = vmatmul.mubr.f32.vlgmr.msra.gmra.mrb[4].mxu0 %v761_v40  ;;  %1790 = vmatmul.mubr.f32.vlgmr.msra.gmra.mrb[4].mxu1 %v761_v40  ;;  %v3480_v37 = vpack.c.bf16 %v1196_v31, %v1192_v30  ;;  %v1195_v40 = vld [vmem:[#allocation8 + $0xd70] sm:$0xff]  ;;  %v1230_v31 = vld [vmem:[#allocation8 + $0xe88] sm:$0xff] }
 0x254   :  { %3207 = vmatpush1.bf16.msra.mxu0 %v3206_v57  ;;  %3463 = vmatpush1.bf16.msra.mxu1 %v3462_v41  ;;  %v1198_v57 = vld [vmem:[#allocation8 + $0xd88] sm:$0xff]  ;;  %v1227_v30 = vld [vmem:[#allocation8 + $0xe70] sm:$0xff] }
 0x255   :  { %3209 = vmatprep.subr.bf16.mxu0 %v3208_v46  ;;  %3465 = vmatprep.subr.bf16.mxu1 %v3464_v47  ;;  %v1202_v41 = vld [vmem:[#allocation8 + $0xda8] sm:$0xff]  ;;  %v3226_v46 = vpack.c.bf16 %v1193_v35, %v1189_v34  ;;  %v3482_v47 = vpack.c.bf16 %v1195_v40, %v1191_v39  ;;  %v1236_v34 = vld [vmem:[#allocation8 + $0xeb8] sm:$0xff]  ;;  %v1233_v39 = vld [vmem:[#allocation8 + $0xea0] sm:$0xff] }
 0x256   :  { %1576 = vmatprep.mubr.f32.mxu0 %v764_v54  ;;  %1860 = vmatprep.mubr.f32.mxu1 %v764_v54  ;;  %v3228_v50 = vpack.c.bf16 %v1202_v41, %v1198_v57  ;;  %v1206_v54 = vld [vmem:[#allocation8 + $0xdc8] sm:$0xff]  ;;  %v1231_v41 = vld [vmem:[#allocation8 + $0xe90] sm:$0xff] }
 0x258   :  { %3211 = vmatpush1.bf16.msra.mxu0 %v3210_v7  ;;  %3467 = vmatpush1.bf16.msra.mxu1 %v3466_v55  ;;  %v1210_v7 = vld [vmem:[#allocation8 + $0xde8] sm:$0xff]  ;;  %v1208_v55 = vld [vmem:[#allocation8 + $0xdd8] sm:$0xff] }
 0x259   :  { %3213 = vmatprep.subr.bf16.mxu0 %v3212_v59  ;;  %3469 = vmatprep.subr.bf16.mxu1 %v3468_v60  ;;  %v3486_v59 = vpack.c.bf16 %v1203_v53, %v1199_v52  ;;  %v1205_v60 = vld [vmem:[#allocation8 + $0xdc0] sm:$0xff]  ;;  %v3232_v62 = vpack.c.bf16 %v1210_v7, %v1206_v54  ;;  %v3488_v63 = vpack.c.bf16 %v1212_v56, %v1208_v55  ;;  %v1239_v7 = vld [vmem:[#allocation8 + $0xed0] sm:$0xff]  ;;  %v1246_v56 = vld [vmem:[#allocation8 + $0xf08] sm:$0xff] }
 0x25a   :  { %v3234_v5 = vpack.c.bf16 %v1209_v61, %v1205_v60  ;;  %v1241_v52 = vld [vmem:[#allocation8 + $0xee0] sm:$0xff]  ;;  %v1243_v55 = vld [vmem:[#allocation8 + $0xef0] sm:$0xff]  ;;  %v1252_v60 = vld [vmem:[#allocation8 + $0xf38] sm:$0xff] }
 0x25c   :  { %3215 = vmatpush1.bf16.msra.mxu0 %v3214_v38  ;;  %3471 = vmatpush1.bf16.msra.mxu1 %v3470_v2  ;;  %v1218_v38 = vld [vmem:[#allocation8 + $0xe28] sm:$0xff]  ;;  %v1216_v2 = vld [vmem:[#allocation8 + $0xe18] sm:$0xff] }
 0x25d   :  { %3217 = vmatprep.subr.bf16.mxu0 %v3216_v8  ;;  %3473 = vmatprep.subr.bf16.mxu1 %v3472_v9  ;;  %v3490_v8 = vpack.c.bf16 %v1211_v19, %v1207_v0  ;;  %v1213_v9 = vld [vmem:[#allocation8 + $0xe00] sm:$0xff]  ;;  %v3236_v11 = vpack.c.bf16 %v1218_v38, %v1214_v1  ;;  %v3492_v12 = vpack.c.bf16 %v1220_v3, %v1216_v2  ;;  %v1247_v38 = vld [vmem:[#allocation8 + $0xf10] sm:$0xff]  ;;  %v1254_v3 = vld [vmem:[#allocation8 + $0xf48] sm:$0xff] }
 0x25e   :  { %v3238_v23 = vpack.c.bf16 %v1217_v10, %v1213_v9  ;;  %v1249_v0 = vld [vmem:[#allocation8 + $0xf20] sm:$0xff]  ;;  %v1251_v2 = vld [vmem:[#allocation8 + $0xf30] sm:$0xff]  ;;  %v1260_v9 = vld [vmem:[#allocation8 + $0xf78] sm:$0xff] }
 0x260   :  { %3219 = vmatpush1.bf16.msra.mxu0 %v3218_v16  ;;  %3475 = vmatpush1.bf16.msra.mxu1 %v3474_v45  ;;  %v1226_v16 = vld [vmem:[#allocation8 + $0xe68] sm:$0xff]  ;;  %v1224_v45 = vld [vmem:[#allocation8 + $0xe58] sm:$0xff] }
 0x261   :  { %3221 = vmatprep.subr.bf16.mxu0 %v3220_v24  ;;  %3477 = vmatprep.subr.bf16.mxu1 %v3476_v25  ;;  %v3494_v24 = vpack.c.bf16 %v1219_v43, %v1215_v13  ;;  %v1221_v25 = vld [vmem:[#allocation8 + $0xe40] sm:$0xff]  ;;  %v3240_v27 = vpack.c.bf16 %v1226_v16, %v1222_v15  ;;  %v3496_v28 = vpack.c.bf16 %v1228_v22, %v1224_v45  ;;  %v1255_v16 = vld [vmem:[#allocation8 + $0xf50] sm:$0xff]  ;;  %v1262_v22 = vld [vmem:[#allocation8 + $0xf88] sm:$0xff] }
 0x262   :  { %v3242_v35 = vpack.c.bf16 %v1225_v26, %v1221_v25  ;;  %v1257_v13 = vld [vmem:[#allocation8 + $0xf60] sm:$0xff]  ;;  %v1259_v45 = vld [vmem:[#allocation8 + $0xf70] sm:$0xff]  ;;  %v1268_v25 = vld [vmem:[#allocation8 + $0xfb8] sm:$0xff] }
 0x264   :  { %3223 = vmatpush1.bf16.msra.mxu0 %v3222_v32  ;;  %3479 = vmatpush1.bf16.msra.mxu1 %v3478_v33  ;;  %v1234_v32 = vld [vmem:[#allocation8 + $0xea8] sm:$0xff]  ;;  %v1232_v33 = vld [vmem:[#allocation8 + $0xe98] sm:$0xff] }
 0x265   :  { %3225 = vmatprep.subr.bf16.mxu0 %v3224_v36  ;;  %3481 = vmatprep.subr.bf16.mxu1 %v3480_v37  ;;  %v3498_v36 = vpack.c.bf16 %v1227_v30, %v1223_v29  ;;  %v1229_v37 = vld [vmem:[#allocation8 + $0xe80] sm:$0xff]  ;;  %v3244_v40 = vpack.c.bf16 %v1234_v32, %v1230_v31  ;;  %v3500_v57 = vpack.c.bf16 %v1236_v34, %v1232_v33  ;;  %v448_v30 = vsub.s32 6, %v4355_v17  ;;  %v1263_v33 = vld [vmem:[#allocation8 + $0xf90] sm:$0xff] }
 0x266   :  { %v3246_v49 = vpack.c.bf16 %v1233_v39, %v1229_v37  ;;  %v1265_v29 = vld [vmem:[#allocation8 + $0xfa0] sm:$0xff]  ;;  %v1267_v34 = vld [vmem:[#allocation8 + $0xfb0] sm:$0xff]  ;;  %v1272_v37 = vld [vmem:[#allocation8 + $0xfd8] sm:$0xff] }
 0x267   :  { %v1276_v39 = vld [vmem:[#allocation8 + $0xff8] sm:$0xff]  ;;  %v1273_v17 = vld [vmem:[#allocation8 + $0xfe0] sm:$0xff] }
 0x268   :  { %3227 = vmatpush1.bf16.msra.mxu0 %v3226_v46  ;;  %3483 = vmatpush1.bf16.msra.mxu1 %v3482_v47  ;;  %v1242_v46 = vld [vmem:[#allocation8 + $0xee8] sm:$0xff]  ;;  %v1240_v47 = vld [vmem:[#allocation8 + $0xed8] sm:$0xff] }
 0x269   :  { %3229 = vmatprep.subr.bf16.mxu0 %v3228_v50  ;;  %3485 = vmatprep.subr.bf16.mxu1 %v3484_v51  ;;  %v3502_v50 = vpack.c.bf16 %v1235_v42, %v1231_v41  ;;  %v1237_v51 = vld [vmem:[#allocation8 + $0xec0] sm:$0xff]  ;;  %v3248_v53 = vpack.c.bf16 %v1242_v46, %v1238_v44  ;;  %v3504_v54 = vpack.c.bf16 %v1244_v48, %v1240_v47  ;;  %v1271_v47 = vld [vmem:[#allocation8 + $0xfd0] sm:$0xff] }
 0x26a   :  { %v3250_v61 = vpack.c.bf16 %v1241_v52, %v1237_v51  ;;  %v1269_v41 = vld [vmem:[#allocation8 + $0xfc0] sm:$0xff]  ;;  %v449_v42 = vrot.slane %v4392_v4, %v448_v30  ;;  %v3520_v46 = vpack.c.bf16 %v1276_v39, %v1272_v37  ;;  %v1275_v48 = vld [vmem:[#allocation8 + $0xff0] sm:$0xff] }
 0x26b   :  { %v3266_v51 = vpack.c.bf16 %v1273_v17, %v1269_v41  ;;  %v3522_v52 = vpack.c.bf16 %v1275_v48, %v1271_v47  ;;  %v1873_v4 = vld [vmem:[#allocation11 + $0x10] sm:$0xff]  ;;  %v1899_v37 = vld [vmem:[#allocation11 + $0xe0] sm:$0xff]  ;;  %v1908_v17 = vld [vmem:[#allocation11 + $0x128] sm:$0xff] }
 0x26c   :  { %3231 = vmatpush1.bf16.msra.mxu0 %v3230_v58  ;;  %3487 = vmatpush1.bf16.msra.mxu1 %v3486_v59  ;;  %v1250_v58 = vld [vmem:[#allocation8 + $0xf28] sm:$0xff]  ;;  %v1248_v59 = vld [vmem:[#allocation8 + $0xf18] sm:$0xff] }
 0x26d   :  { %3233 = vmatprep.subr.bf16.mxu0 %v3232_v62  ;;  %3489 = vmatprep.subr.bf16.mxu1 %v3488_v63  ;;  %v3506_v62 = vpack.c.bf16 %v1243_v55, %v1239_v7  ;;  %v1245_v63 = vld [vmem:[#allocation8 + $0xf00] sm:$0xff]  ;;  %v3252_v19 = vpack.c.bf16 %v1250_v58, %v1246_v56  ;;  %v3508_v1 = vpack.c.bf16 %v1252_v60, %v1248_v59  ;;  %v1876_v55 = vld [vmem:[#allocation11 + $0x28] sm:$0xff]  ;;  %v1901_v39 = vld [vmem:[#allocation11 + $0xf0] sm:$0xff] }
 0x26e   :  { %v3254_v10 = vpack.c.bf16 %v1249_v0, %v1245_v63  ;;  %v1871_v7 = vld [vmem:[#allocation11] sm:$0xff]  ;;  %v1878_v56 = vld [vmem:[#allocation11 + $0x38] sm:$0xff]  ;;  %v1880_v63 = vld [vmem:[#allocation11 + $0x48] sm:$0xff]  ;;  %v3554_v41 = vpack.c.bf16 %v1901_v39, %v1899_v37 }
 0x26f   :  { %v3526_v58 = vpack.c.bf16 %v1873_v4, %v1871_v7  ;;  %v3528_v60 = vpack.c.bf16 %v1878_v56, %v1876_v55  ;;  %v1882_v0 = vld [vmem:[#allocation11 + $0x58] sm:$0xff]  ;;  %v1911_v4 = vld [vmem:[#allocation11 + $0x140] sm:$0xff]  ;;  %v1913_v55 = vld [vmem:[#allocation11 + $0x150] sm:$0xff] }
 0x270   :  { %3235 = vmatpush1.bf16.msra.mxu0 %v3234_v5  ;;  %3491 = vmatpush1.bf16.msra.mxu1 %v3490_v8  ;;  %v1258_v5 = vld [vmem:[#allocation8 + $0xf68] sm:$0xff]  ;;  %v1256_v8 = vld [vmem:[#allocation8 + $0xf58] sm:$0xff] }
 0x271   :  { %3237 = vmatprep.subr.bf16.mxu0 %v3236_v11  ;;  %3493 = vmatprep.subr.bf16.mxu1 %v3492_v12  ;;  %v3510_v11 = vpack.c.bf16 %v1251_v2, %v1247_v38  ;;  %v1253_v12 = vld [vmem:[#allocation8 + $0xf40] sm:$0xff]  ;;  %v3256_v43 = vpack.c.bf16 %v1258_v5, %v1254_v3  ;;  %v3512_v15 = vpack.c.bf16 %v1260_v9, %v1256_v8  ;;  %v1881_v38 = vld [vmem:[#allocation11 + $0x50] sm:$0xff]  ;;  %v1884_v2 = vld [vmem:[#allocation11 + $0x68] sm:$0xff] }
 0x272   :  { %v3258_v26 = vpack.c.bf16 %v1257_v13, %v1253_v12  ;;  %v1886_v3 = vld [vmem:[#allocation11 + $0x78] sm:$0xff]  ;;  %v1883_v9 = vld [vmem:[#allocation11 + $0x60] sm:$0xff]  ;;  %v1916_v56 = vld [vmem:[#allocation11 + $0x168] sm:$0xff] }
 0x273   :  { %v3536_v8 = vpack.c.bf16 %v1886_v3, %v1884_v2  ;;  %v1890_v12 = vld [vmem:[#allocation11 + $0x98] sm:$0xff]  ;;  %v1924_v2 = vld [vmem:[#allocation11 + $0x1a8] sm:$0xff] }
 0x274   :  { %3239 = vmatpush1.bf16.msra.mxu0 %v3238_v23  ;;  %3495 = vmatpush1.bf16.msra.mxu1 %v3494_v24  ;;  %v1266_v23 = vld [vmem:[#allocation8 + $0xfa8] sm:$0xff]  ;;  %v1264_v24 = vld [vmem:[#allocation8 + $0xf98] sm:$0xff] }
 0x275   :  { %3241 = vmatprep.subr.bf16.mxu0 %v3240_v27  ;;  %3497 = vmatprep.subr.bf16.mxu1 %v3496_v28  ;;  %v3514_v27 = vpack.c.bf16 %v1259_v45, %v1255_v16  ;;  %v1261_v28 = vld [vmem:[#allocation8 + $0xf80] sm:$0xff]  ;;  %v3260_v31 = vpack.c.bf16 %v1266_v23, %v1262_v22  ;;  %v3516_v32 = vpack.c.bf16 %v1268_v25, %v1264_v24  ;;  %v1889_v16 = vld [vmem:[#allocation11 + $0x90] sm:$0xff]  ;;  %v1892_v45 = vld [vmem:[#allocation11 + $0xa8] sm:$0xff] }
 0x276   :  { %v1894_v22 = vld [vmem:[#allocation11 + $0xb8] sm:$0xff]  ;;  %v1891_v25 = vld [vmem:[#allocation11 + $0xa0] sm:$0xff]  ;;  %v2168_v37 = vld [vmem:[#allocation14 + $0x68] sm:$0xff] }
 0x277   :  { %v3544_v24 = vpack.c.bf16 %v1894_v22, %v1892_v45  ;;  %v1910_v47 = vld [vmem:[#allocation11 + $0x138] sm:$0xff]  ;;  %v1932_v22 = vld [vmem:[#allocation11 + $0x1e8] sm:$0xff] }
 0x278   :  { %3243 = vmatpush1.bf16.msra.mxu0 %v3242_v35  ;;  %3499 = vmatpush1.bf16.msra.mxu1 %v3498_v36  ;;  %v1270_v35 = vld [vmem:[#allocation8 + $0xfc8] sm:$0xff]  ;;  %v1926_v3 = vld [vmem:[#allocation11 + $0x1b8] sm:$0xff] }
 0x279   :  { %3245 = vmatprep.subr.bf16.mxu0 %v3244_v40  ;;  %3501 = vmatprep.subr.bf16.mxu1 %v3500_v57  ;;  %v1274_v36 = vld [vmem:[#allocation8 + $0xfe8] sm:$0xff]  ;;  %v3262_v40 = vpack.c.bf16 %v1265_v29, %v1261_v28  ;;  %v3518_v57 = vpack.c.bf16 %v1267_v34, %v1263_v33  ;;  %v1898_v28 = vld [vmem:[#allocation11 + $0xd8] sm:$0xff] }
 0x27a   :  { %v3264_v44 = vpack.c.bf16 %v1274_v36, %v1270_v35  ;;  %v1900_v33 = vld [vmem:[#allocation11 + $0xe8] sm:$0xff]  ;;  %v1902_v34 = vld [vmem:[#allocation11 + $0xf8] sm:$0xff] }
 0x27b   :  { %v3552_v36 = vpack.c.bf16 %v1902_v34, %v1900_v33  ;;  %v2155_v33 = vld [vmem:[#allocation14] sm:$0xff] }
 0x27c   :  { %3247 = vmatpush1.bf16.msra.mxu0 %v3246_v49  ;;  %3503 = vmatpush1.bf16.msra.mxu1 %v3502_v50  ;;  %v1872_v49 = vld [vmem:[#allocation11 + $0x8] sm:$0xff]  ;;  %v1874_v50 = vld [vmem:[#allocation11 + $0x18] sm:$0xff] }
 0x27d   :  { %3249 = vmatprep.subr.bf16.mxu0 %v3248_v53  ;;  %3505 = vmatprep.subr.bf16.mxu1 %v3504_v54  ;;  %v753_v53 = vadd.f32 %v4386_v6, %v449_v42  ;;  %v3524_v54 = vpack.c.bf16 %v1874_v50, %v1872_v49  ;;  %v3560_v49 = vpack.c.bf16 %v1910_v47, %v1908_v17  ;;  %v1907_v50 = vld [vmem:[#allocation11 + $0x120] sm:$0xff] }
 0x27e   :  { %v2171_v47 = vld [vmem:[#allocation14 + $0x80] sm:$0xff] }
 0x27f   :  { %v763_v59 = vmax.f32 %v753_v53, 0.0  ;;  %v1914_v53 = vld [vmem:[#allocation11 + $0x158] sm:$0xff] }
 0x280   :  { %3251 = vmatpush1.bf16.msra.mxu0 %v3250_v61  ;;  %3507 = vmatpush1.bf16.msra.mxu1 %v3506_v62  ;;  %v1875_v61 = vld [vmem:[#allocation11 + $0x20] sm:$0xff]  ;;  %v1877_v62 = vld [vmem:[#allocation11 + $0x30] sm:$0xff] }
 0x281   :  { %3253 = vmatprep.subr.bf16.mxu0 %v3252_v19  ;;  %3509 = vmatprep.subr.bf16.mxu1 %v3508_v1  ;;  %v3530_v6 = vpack.c.bf16 %v1877_v62, %v1875_v61  ;;  %v3532_v19 = vpack.c.bf16 %v1882_v0, %v1880_v63  ;;  %v1879_v1 = vld [vmem:[#allocation11 + $0x40] sm:$0xff]  ;;  %v1917_v62 = vld [vmem:[#allocation11 + $0x170] sm:$0xff]  ;;  %v1920_v63 = vld [vmem:[#allocation11 + $0x188] sm:$0xff] }
 0x282   :  { %v3534_v5 = vpack.c.bf16 %v1881_v38, %v1879_v1  ;;  %v1915_v61 = vld [vmem:[#allocation11 + $0x160] sm:$0xff]  ;;  %v1922_v0 = vld [vmem:[#allocation11 + $0x198] sm:$0xff]  ;;  %v1921_v38 = vld [vmem:[#allocation11 + $0x190] sm:$0xff] }
 0x283   :  { %v1919_v1 = vld [vmem:[#allocation11 + $0x180] sm:$0xff] }
 0x284   :  { %3255 = vmatpush1.bf16.msra.mxu0 %v3254_v10  ;;  %3511 = vmatpush1.bf16.msra.mxu1 %v3510_v11  ;;  %v1885_v10 = vld [vmem:[#allocation11 + $0x70] sm:$0xff]  ;;  %v1888_v11 = vld [vmem:[#allocation11 + $0x88] sm:$0xff] }
 0x285   :  { %3257 = vmatprep.subr.bf16.mxu0 %v3256_v43  ;;  %3513 = vmatprep.subr.bf16.mxu1 %v3512_v15  ;;  %v3538_v13 = vpack.c.bf16 %v1885_v10, %v1883_v9  ;;  %v3540_v43 = vpack.c.bf16 %v1890_v12, %v1888_v11  ;;  %v1887_v15 = vld [vmem:[#allocation11 + $0x80] sm:$0xff]  ;;  %v1925_v10 = vld [vmem:[#allocation11 + $0x1b0] sm:$0xff]  ;;  %v1928_v11 = vld [vmem:[#allocation11 + $0x1c8] sm:$0xff] }
 0x286   :  { %v3542_v23 = vpack.c.bf16 %v1889_v16, %v1887_v15  ;;  %v1923_v9 = vld [vmem:[#allocation11 + $0x1a0] sm:$0xff]  ;;  %v1930_v12 = vld [vmem:[#allocation11 + $0x1d8] sm:$0xff]  ;;  %v1929_v16 = vld [vmem:[#allocation11 + $0x1d0] sm:$0xff] }
 0x287   :  { %v1927_v15 = vld [vmem:[#allocation11 + $0x1c0] sm:$0xff] }
 0x288   :  { %3259 = vmatpush1.bf16.msra.mxu0 %v3258_v26  ;;  %3515 = vmatpush1.bf16.msra.mxu1 %v3514_v27  ;;  %v1893_v26 = vld [vmem:[#allocation11 + $0xb0] sm:$0xff]  ;;  %v1896_v27 = vld [vmem:[#allocation11 + $0xc8] sm:$0xff]  ;;  %v3582_v45 = vpack.c.bf16 %v1929_v16, %v1927_v15 }
 0x289   :  { %3261 = vmatprep.subr.bf16.mxu0 %v3260_v31  ;;  %3517 = vmatprep.subr.bf16.mxu1 %v3516_v32  ;;  %v3546_v29 = vpack.c.bf16 %v1893_v26, %v1891_v25  ;;  %v3548_v30 = vpack.c.bf16 %v1898_v28, %v1896_v27  ;;  %v1895_v31 = vld [vmem:[#allocation11 + $0xc0] sm:$0xff]  ;;  %v1897_v32 = vld [vmem:[#allocation11 + $0xd0] sm:$0xff]  ;;  %v1936_v28 = vld [vmem:[#allocation11 + $0x208] sm:$0xff] }
 0x28a   :  { %v3550_v35 = vpack.c.bf16 %v1897_v32, %v1895_v31  ;;  %v1931_v25 = vld [vmem:[#allocation11 + $0x1e0] sm:$0xff]  ;;  %v1933_v26 = vld [vmem:[#allocation11 + $0x1f0] sm:$0xff] }
 0x28b   :  { %v3586_v27 = vpack.c.bf16 %v1933_v26, %v1931_v25  ;;  %v2156_v31 = vld [vmem:[#allocation14 + $0x8] sm:$0xff] }
 0x28c   :  { %3263 = vmatpush1.bf16.msra.mxu0 %v3262_v40  ;;  %3519 = vmatpush1.bf16.msra.mxu1 %v3518_v57  ;;  %v1904_v40 = vld [vmem:[#allocation11 + $0x108] sm:$0xff]  ;;  %v1906_v57 = vld [vmem:[#allocation11 + $0x118] sm:$0xff] }
 0x28d   :  { %3265 = vmatprep.subr.bf16.mxu0 %v3264_v44  ;;  %3521 = vmatprep.subr.bf16.mxu1 %v3520_v46  ;;  %v3556_v42 = vpack.c.bf16 %v1906_v57, %v1904_v40  ;;  %v1903_v44 = vld [vmem:[#allocation11 + $0x100] sm:$0xff]  ;;  %v1905_v46 = vld [vmem:[#allocation11 + $0x110] sm:$0xff] }
 0x28e   :  { %v3558_v48 = vpack.c.bf16 %v1905_v46, %v1903_v44  ;;  %v2160_v32 = vld [vmem:[#allocation14 + $0x28] sm:$0xff]  ;;  %v2163_v57 = vld [vmem:[#allocation14 + $0x40] sm:$0xff] }
 0x28f   :  { %v3652_v34 = vpack.c.bf16 %v2160_v32, %v2156_v31  ;;  %v2176_v44 = vld [vmem:[#allocation14 + $0xa8] sm:$0xff] }
 0x290   :  { %3267 = vmatpush1.bf16.msra.mxu0 %v3266_v51  ;;  %3523 = vmatpush1.bf16.msra.mxu1 %v3522_v52  ;;  %v1909_v51 = vld [vmem:[#allocation11 + $0x130] sm:$0xff]  ;;  %v1912_v52 = vld [vmem:[#allocation11 + $0x148] sm:$0xff] }
 0x291   :  { %3525 = vmatprep.subr.bf16.mxu0 %v3524_v54  ;;  %v3562_v54 = vpack.c.bf16 %v1909_v51, %v1907_v50  ;;  %v3564_v7 = vpack.c.bf16 %v1914_v53, %v1912_v52  ;;  %3653 = vmatprep.subr.bf16.mxu1 %v3652_v34  ;;  %v2184_v50 = vld [vmem:[#allocation14 + $0xe8] sm:$0xff]  ;;  %v2179_v53 = vld [vmem:[#allocation14 + $0xc0] sm:$0xff] }
 0x292   :  { %v2224_v15 = vld [vmem:[#allocation14 + $0x228] sm:$0xff]  ;;  %v2235_v34 = vld [vmem:[#allocation14 + $0x280] sm:$0xff] }
 0x293   :  { %1577 = vmatmul.mubr.f32.vlgmr.msra.gmra.mrb[4].mxu0 %v763_v59  ;;  %1861 = vmatmul.mubr.f32.vlgmr.msra.gmra.mrb[4].mxu1 %v763_v59  ;;  %v3566_v59 = vpack.c.bf16 %v1913_v55, %v1911_v4  ;;  %v2192_v4 = vld [vmem:[#allocation14 + $0x128] sm:$0xff] }
 0x294   :  { %3527 = vmatpush1.bf16.msra.mxu0 %v3526_v58  ;;  %v1918_v58 = vld [vmem:[#allocation11 + $0x178] sm:$0xff]  ;;  %v2232_v25 = vld [vmem:[#allocation14 + $0x268] sm:$0xff] }
 0x295   :  { %3529 = vmatprep.subr.bf16.mxu0 %v3528_v60  ;;  %v3568_v60 = vpack.c.bf16 %v1918_v58, %v1916_v56  ;;  %v2187_v58 = vld [vmem:[#allocation14 + $0x100] sm:$0xff]  ;;  %v2240_v31 = vld [vmem:[#allocation14 + $0x2a8] sm:$0xff] }
 0x298   :  { %3531 = vmatpush1.bf16.msra.mxu0 %v3530_v6  ;;  %v3570_v6 = vpack.c.bf16 %v1917_v62, %v1915_v61  ;;  %v2200_v61 = vld [vmem:[#allocation14 + $0x168] sm:$0xff] }
 0x299   :  { %3533 = vmatprep.subr.bf16.mxu0 %v3532_v19  ;;  %v3572_v19 = vpack.c.bf16 %v1922_v0, %v1920_v63  ;;  %v2195_v0 = vld [vmem:[#allocation14 + $0x140] sm:$0xff] }
 0x29c   :  { %3535 = vmatpush1.bf16.msra.mxu0 %v3534_v5  ;;  %v3574_v5 = vpack.c.bf16 %v1921_v38, %v1919_v1  ;;  %v2208_v1 = vld [vmem:[#allocation14 + $0x1a8] sm:$0xff] }
 0x29d   :  { %3537 = vmatprep.subr.bf16.mxu0 %v3536_v8  ;;  %v3576_v8 = vpack.c.bf16 %v1926_v3, %v1924_v2  ;;  %v2203_v3 = vld [vmem:[#allocation14 + $0x180] sm:$0xff] }
 0x2a0   :  { %3539 = vmatpush1.bf16.msra.mxu0 %v3538_v13  ;;  %v3578_v13 = vpack.c.bf16 %v1925_v10, %v1923_v9  ;;  %v2216_v9 = vld [vmem:[#allocation14 + $0x1e8] sm:$0xff] }
 0x2a1   :  { %3541 = vmatprep.subr.bf16.mxu0 %v3540_v43  ;;  %v3580_v43 = vpack.c.bf16 %v1930_v12, %v1928_v11  ;;  %v2211_v12 = vld [vmem:[#allocation14 + $0x1c0] sm:$0xff] }
 0x2a4   :  { %3543 = vmatpush1.bf16.msra.mxu0 %v3542_v23  ;;  %v1934_v23 = vld [vmem:[#allocation11 + $0x1f8] sm:$0xff] }
 0x2a5   :  { %3545 = vmatprep.subr.bf16.mxu0 %v3544_v24  ;;  %v3584_v24 = vpack.c.bf16 %v1934_v23, %v1932_v22  ;;  %v2219_v22 = vld [vmem:[#allocation14 + $0x200] sm:$0xff] }
 0x2a6   :  { %v2223_v23 = vld [vmem:[#allocation14 + $0x220] sm:$0xff] }
 0x2a7   :  { %v3686_v26 = vpack.c.bf16 %v2223_v23, %v2219_v22  ;;  %v1944_v23 = vld [vmem:[#allocation11 + $0x248] sm:$0xff] }
 0x2a8   :  { %3547 = vmatpush1.bf16.msra.mxu0 %v3546_v29  ;;  %v1938_v29 = vld [vmem:[#allocation11 + $0x218] sm:$0xff] }
 0x2a9   :  { %3549 = vmatprep.subr.bf16.mxu0 %v3548_v30  ;;  %v3588_v30 = vpack.c.bf16 %v1938_v29, %v1936_v28  ;;  %v2227_v28 = vld [vmem:[#allocation14 + $0x240] sm:$0xff] }
 0x2aa   :  { %v2231_v29 = vld [vmem:[#allocation14 + $0x260] sm:$0xff] }
 0x2ab   :  { %v3690_v32 = vpack.c.bf16 %v2231_v29, %v2227_v28  ;;  %v1945_v28 = vld [vmem:[#allocation11 + $0x250] sm:$0xff]  ;;  %v1948_v29 = vld [vmem:[#allocation11 + $0x268] sm:$0xff] }
 0x2ac   :  { %3551 = vmatpush1.bf16.msra.mxu0 %v3550_v35  ;;  %v2159_v35 = vld [vmem:[#allocation14 + $0x20] sm:$0xff] }
 0x2ad   :  { %3553 = vmatprep.subr.bf16.mxu0 %v3552_v36  ;;  %v2164_v36 = vld [vmem:[#allocation14 + $0x48] sm:$0xff]  ;;  %v3654_v39 = vpack.c.bf16 %v2159_v35, %v2155_v33  ;;  %v2239_v35 = vld [vmem:[#allocation14 + $0x2a0] sm:$0xff] }
 0x2ae   :  { %v3656_v40 = vpack.c.bf16 %v2168_v37, %v2164_v36  ;;  %v2244_v36 = vld [vmem:[#allocation14 + $0x2c8] sm:$0xff] }
 0x2af   :  { %3655 = vmatpush1.bf16.msra.mxu1 %v3654_v39  ;;  %v2248_v37 = vld [vmem:[#allocation14 + $0x2e8] sm:$0xff]  ;;  %v3694_v39 = vpack.c.bf16 %v2239_v35, %v2235_v34 }
 0x2b0   :  { %3555 = vmatpush1.bf16.msra.mxu0 %v3554_v41  ;;  %v2167_v41 = vld [vmem:[#allocation14 + $0x60] sm:$0xff]  ;;  %3657 = vmatprep.subr.bf16.mxu1 %v3656_v40  ;;  %v3696_v40 = vpack.c.bf16 %v2248_v37, %v2244_v36  ;;  %v1949_v34 = vld [vmem:[#allocation11 + $0x270] sm:$0xff]  ;;  %v1954_v36 = vld [vmem:[#allocation11 + $0x298] sm:$0xff] }
 0x2b1   :  { %3557 = vmatprep.subr.bf16.mxu0 %v3556_v42  ;;  %v2172_v42 = vld [vmem:[#allocation14 + $0x88] sm:$0xff]  ;;  %v3658_v46 = vpack.c.bf16 %v2167_v41, %v2163_v57  ;;  %v2243_v57 = vld [vmem:[#allocation14 + $0x2c0] sm:$0xff] }
 0x2b2   :  { %v3660_v17 = vpack.c.bf16 %v2176_v44, %v2172_v42  ;;  %v2247_v41 = vld [vmem:[#allocation14 + $0x2e0] sm:$0xff]  ;;  %v2252_v42 = vld [vmem:[#allocation14 + $0x308] sm:$0xff] }
 0x2b3   :  { %3659 = vmatpush1.bf16.msra.mxu1 %v3658_v46  ;;  %v2256_v44 = vld [vmem:[#allocation14 + $0x328] sm:$0xff]  ;;  %v3698_v46 = vpack.c.bf16 %v2247_v41, %v2243_v57 }
 0x2b4   :  { %3559 = vmatpush1.bf16.msra.mxu0 %v3558_v48  ;;  %v2175_v48 = vld [vmem:[#allocation14 + $0xa0] sm:$0xff]  ;;  %3661 = vmatprep.subr.bf16.mxu1 %v3660_v17  ;;  %v3700_v17 = vpack.c.bf16 %v2256_v44, %v2252_v42  ;;  %v1953_v57 = vld [vmem:[#allocation11 + $0x290] sm:$0xff]  ;;  %v1958_v42 = vld [vmem:[#allocation11 + $0x2b8] sm:$0xff] }
 0x2b5   :  { %3561 = vmatprep.subr.bf16.mxu0 %v3560_v49  ;;  %v2180_v49 = vld [vmem:[#allocation14 + $0xc8] sm:$0xff]  ;;  %v3662_v51 = vpack.c.bf16 %v2175_v48, %v2171_v47  ;;  %v2251_v47 = vld [vmem:[#allocation14 + $0x300] sm:$0xff] }
 0x2b6   :  { %v3664_v52 = vpack.c.bf16 %v2184_v50, %v2180_v49  ;;  %v2255_v48 = vld [vmem:[#allocation14 + $0x320] sm:$0xff]  ;;  %v2260_v49 = vld [vmem:[#allocation14 + $0x348] sm:$0xff] }
 0x2b7   :  { %3663 = vmatpush1.bf16.msra.mxu1 %v3662_v51  ;;  %v2264_v50 = vld [vmem:[#allocation14 + $0x368] sm:$0xff]  ;;  %v3702_v51 = vpack.c.bf16 %v2255_v48, %v2251_v47 }
 0x2b8   :  { %3563 = vmatpush1.bf16.msra.mxu0 %v3562_v54  ;;  %v2183_v54 = vld [vmem:[#allocation14 + $0xe0] sm:$0xff]  ;;  %3665 = vmatprep.subr.bf16.mxu1 %v3664_v52  ;;  %v3704_v52 = vpack.c.bf16 %v2264_v50, %v2260_v49  ;;  %v1957_v47 = vld [vmem:[#allocation11 + $0x2b0] sm:$0xff]  ;;  %v1962_v49 = vld [vmem:[#allocation11 + $0x2d8] sm:$0xff] }
 0x2b9   :  { %3565 = vmatprep.subr.bf16.mxu0 %v3564_v7  ;;  %v2188_v7 = vld [vmem:[#allocation14 + $0x108] sm:$0xff]  ;;  %v3666_v55 = vpack.c.bf16 %v2183_v54, %v2179_v53  ;;  %v2259_v53 = vld [vmem:[#allocation14 + $0x340] sm:$0xff] }
 0x2ba   :  { %v3668_v56 = vpack.c.bf16 %v2192_v4, %v2188_v7  ;;  %v2263_v54 = vld [vmem:[#allocation14 + $0x360] sm:$0xff]  ;;  %v2268_v7 = vld [vmem:[#allocation14 + $0x388] sm:$0xff] }
 0x2bb   :  { %3667 = vmatpush1.bf16.msra.mxu1 %v3666_v55  ;;  %v2272_v4 = vld [vmem:[#allocation14 + $0x3a8] sm:$0xff]  ;;  %v4401_v55 = vld [vmem:[#allocation10] sm:$0xf] }
 0x2bc   :  { %3567 = vmatpush1.bf16.msra.mxu0 %v3566_v59  ;;  %v2191_v59 = vld [vmem:[#allocation14 + $0x120] sm:$0xff]  ;;  %3669 = vmatprep.subr.bf16.mxu1 %v3668_v56  ;;  %v3706_v56 = vpack.c.bf16 %v2263_v54, %v2259_v53  ;;  %v1961_v53 = vld [vmem:[#allocation11 + $0x2d0] sm:$0xff] }
 0x2bd   :  { %3569 = vmatprep.subr.bf16.mxu0 %v3568_v60  ;;  %v2196_v60 = vld [vmem:[#allocation14 + $0x148] sm:$0xff]  ;;  %v3670_v62 = vpack.c.bf16 %v2191_v59, %v2187_v58  ;;  %v3708_v58 = vpack.c.bf16 %v2272_v4, %v2268_v7  ;;  %v2267_v59 = vld [vmem:[#allocation14 + $0x380] sm:$0xff]  ;;  %v1966_v7 = vld [vmem:[#allocation11 + $0x2f8] sm:$0xff] }
 0x2be   :  { %v3672_v63 = vpack.c.bf16 %v2200_v61, %v2196_v60  ;;  %v2271_v60 = vld [vmem:[#allocation14 + $0x3a0] sm:$0xff]  ;;  %v1282_v61 = vrot.slane %v4401_v55, %v4358_v18 }
 0x2bf   :  { %3671 = vmatpush1.bf16.msra.mxu1 %v3670_v62  ;;  %v1286_v62 = vrot.slane %v4401_v55, %v4363_v20  ;;  %v1952_v35 = vld [vmem:[#allocation11 + $0x288] sm:$0xff] }
 0x2c0   :  { %3571 = vmatpush1.bf16.msra.mxu0 %v3570_v6  ;;  %v2199_v6 = vld [vmem:[#allocation14 + $0x160] sm:$0xff]  ;;  %3673 = vmatprep.subr.bf16.mxu1 %v3672_v63  ;;  %v1294_v63 = vrot.slane %v4401_v55, %v4370_v14 }
 0x2c1   :  { %3573 = vmatprep.subr.bf16.mxu0 %v3572_v19  ;;  %v2204_v19 = vld [vmem:[#allocation14 + $0x188] sm:$0xff]  ;;  %v3674_v38 = vpack.c.bf16 %v2199_v6, %v2195_v0  ;;  %v3710_v0 = vpack.c.bf16 %v2271_v60, %v2267_v59 }
 0x2c2   :  { %v3676_v2 = vpack.c.bf16 %v2208_v1, %v2204_v19  ;;  %v1956_v41 = vld [vmem:[#allocation11 + $0x2a8] sm:$0xff]  ;;  %v1965_v59 = vld [vmem:[#allocation11 + $0x2f0] sm:$0xff] }
 0x2c3   :  { %3675 = vmatpush1.bf16.msra.mxu1 %v3674_v38  ;;  %v1960_v48 = vld [vmem:[#allocation11 + $0x2c8] sm:$0xff] }
 0x2c4   :  { %3575 = vmatpush1.bf16.msra.mxu0 %v3574_v5  ;;  %v2207_v5 = vld [vmem:[#allocation14 + $0x1a0] sm:$0xff]  ;;  %3677 = vmatprep.subr.bf16.mxu1 %v3676_v2 }
 0x2c5   :  { %3577 = vmatprep.subr.bf16.mxu0 %v3576_v8  ;;  %v2212_v8 = vld [vmem:[#allocation14 + $0x1c8] sm:$0xff]  ;;  %v3678_v10 = vpack.c.bf16 %v2207_v5, %v2203_v3  ;;  %v1935_v3 = vld [vmem:[#allocation11 + $0x200] sm:$0xff] }
 0x2c6   :  { %v3680_v11 = vpack.c.bf16 %v2216_v9, %v2212_v8  ;;  %v1937_v5 = vld [vmem:[#allocation11 + $0x210] sm:$0xff]  ;;  %v1964_v54 = vld [vmem:[#allocation11 + $0x2e8] sm:$0xff] }
 0x2c7   :  { %3679 = vmatpush1.bf16.msra.mxu1 %v3678_v10  ;;  %v1940_v10 = vld [vmem:[#allocation11 + $0x228] sm:$0xff] }
 0x2c8   :  { %3579 = vmatpush1.bf16.msra.mxu0 %v3578_v13  ;;  %v2215_v13 = vld [vmem:[#allocation14 + $0x1e0] sm:$0xff]  ;;  %3681 = vmatprep.subr.bf16.mxu1 %v3680_v11  ;;  %v1942_v11 = vld [vmem:[#allocation11 + $0x238] sm:$0xff] }
 0x2c9   :  { %3581 = vmatprep.subr.bf16.mxu0 %v3580_v43  ;;  %v2220_v43 = vld [vmem:[#allocation14 + $0x208] sm:$0xff]  ;;  %v3682_v16 = vpack.c.bf16 %v2215_v13, %v2211_v12  ;;  %v3590_v13 = vpack.c.bf16 %v1937_v5, %v1935_v3  ;;  %v1971_v5 = vld [vmem:[#allocation11 + $0x320] sm:$0xff] }
 0x2ca   :  { %v1968_v60 = vld [vmem:[#allocation11 + $0x308] sm:$0xff] }
 0x2cb   :  { %3683 = vmatpush1.bf16.msra.mxu1 %v3682_v16  ;;  %v1939_v16 = vld [vmem:[#allocation11 + $0x220] sm:$0xff] }
 0x2cc   :  { %3583 = vmatpush1.bf16.msra.mxu0 %v3582_v45  ;;  %v3684_v45 = vpack.c.bf16 %v2224_v15, %v2220_v43  ;;  %v3592_v15 = vpack.c.bf16 %v1942_v11, %v1940_v10  ;;  %v1978_v10 = vld [vmem:[#allocation11 + $0x358] sm:$0xff] }
 0x2cd   :  { %3585 = vmatprep.subr.bf16.mxu0 %v3584_v24  ;;  %v2228_v24 = vld [vmem:[#allocation14 + $0x248] sm:$0xff] }
 0x2ce   :  { %3685 = vmatprep.subr.bf16.mxu1 %v3684_v45  ;;  %v1941_v45 = vld [vmem:[#allocation11 + $0x230] sm:$0xff] }
 0x2cf   :  { %3687 = vmatpush1.bf16.msra.mxu1 %v3686_v26 }
 0x2d0   :  { %3587 = vmatpush1.bf16.msra.mxu0 %v3586_v27  ;;  %v3688_v27 = vpack.c.bf16 %v2232_v25, %v2228_v24  ;;  %v1946_v24 = vld [vmem:[#allocation11 + $0x258] sm:$0xff]  ;;  %v3594_v25 = vpack.c.bf16 %v1941_v45, %v1939_v16 }
 0x2d1   :  { %3589 = vmatprep.subr.bf16.mxu0 %v3588_v30  ;;  %v2236_v30 = vld [vmem:[#allocation14 + $0x288] sm:$0xff]  ;;  %v3596_v26 = vpack.c.bf16 %v1946_v24, %v1944_v23  ;;  %v1982_v16 = vld [vmem:[#allocation11 + $0x378] sm:$0xff]  ;;  %v1979_v23 = vld [vmem:[#allocation11 + $0x360] sm:$0xff] }
 0x2d2   :  { %3689 = vmatprep.subr.bf16.mxu1 %v3688_v27  ;;  %v3692_v33 = vpack.c.bf16 %v2240_v31, %v2236_v30  ;;  %v1943_v27 = vld [vmem:[#allocation11 + $0x240] sm:$0xff]  ;;  %v1950_v30 = vld [vmem:[#allocation11 + $0x278] sm:$0xff]  ;;  %v1981_v24 = vld [vmem:[#allocation11 + $0x370] sm:$0xff] }
 0x2d3   :  { %3691 = vmatpush1.bf16.msra.mxu1 %v3690_v32  ;;  %v3598_v31 = vpack.c.bf16 %v1945_v28, %v1943_v27  ;;  %v3600_v32 = vpack.c.bf16 %v1950_v30, %v1948_v29  ;;  %v3634_v27 = vpack.c.bf16 %v1981_v24, %v1979_v23  ;;  %v1983_v29 = vld [vmem:[#allocation11 + $0x380] sm:$0xff]  ;;  %v1985_v30 = vld [vmem:[#allocation11 + $0x390] sm:$0xff]  ;;  %v2458_v24 = vld [vmem:[%s4640_s9 + $0x38] sm:$0xff] }
 0x2d4   :  { %3693 = vmatprep.subr.bf16.mxu1 %v3692_v33  ;;  %v1947_v33 = vld [vmem:[#allocation11 + $0x260] sm:$0xff] }
 0x2d5   :  { %v3602_v37 = vpack.c.bf16 %v1949_v34, %v1947_v33  ;;  %v3638_v33 = vpack.c.bf16 %v1985_v30, %v1983_v29  ;;  %v2457_v23 = vld [vmem:[%s4640_s9 + $0x30] sm:$0xff]  ;;  %v2459_v29 = vld [vmem:[%s4640_s9 + $0x40] sm:$0xff]  ;;  %v2460_v30 = vld [vmem:[%s4640_s9 + $0x48] sm:$0xff] }
 0x2d7   :  { %3695 = vmatpush1.bf16.msra.mxu1 %v3694_v39  ;;  %v3604_v39 = vpack.c.bf16 %v1954_v36, %v1952_v35  ;;  %v1987_v35 = vld [vmem:[#allocation11 + $0x3a0] sm:$0xff]  ;;  %v1989_v36 = vld [vmem:[#allocation11 + $0x3b0] sm:$0xff] }
 0x2d8   :  { %3697 = vmatprep.subr.bf16.mxu1 %v3696_v40  ;;  %v1951_v40 = vld [vmem:[#allocation11 + $0x280] sm:$0xff] }
 0x2d9   :  { %v3606_v44 = vpack.c.bf16 %v1953_v57, %v1951_v40  ;;  %v3642_v40 = vpack.c.bf16 %v1989_v36, %v1987_v35  ;;  %v2461_v35 = vld [vmem:[%s4640_s9 + $0x50] sm:$0xff]  ;;  %v2462_v36 = vld [vmem:[%s4640_s9 + $0x58] sm:$0xff] }
 0x2db   :  { %3699 = vmatpush1.bf16.msra.mxu1 %v3698_v46  ;;  %v3608_v46 = vpack.c.bf16 %v1958_v42, %v1956_v41  ;;  %v1991_v41 = vld [vmem:[#allocation11 + $0x3c0] sm:$0xff]  ;;  %v1993_v42 = vld [vmem:[#allocation11 + $0x3d0] sm:$0xff] }
 0x2dc   :  { %3701 = vmatprep.subr.bf16.mxu1 %v3700_v17  ;;  %v1955_v17 = vld [vmem:[#allocation11 + $0x2a0] sm:$0xff] }
 0x2dd   :  { %v3610_v50 = vpack.c.bf16 %v1957_v47, %v1955_v17  ;;  %v3646_v17 = vpack.c.bf16 %v1993_v42, %v1991_v41  ;;  %v1290_v47 = vrot.slane %v4401_v55, %v4377_v21  ;;  %v2158_v55 = vld [vmem:[#allocation14 + $0x18] sm:$0xff] }
 0x2de   :  { %v1999_v41 = vld [vmem:[#allocation13] sm:$0x3] }
 0x2df   :  { %3703 = vmatpush1.bf16.msra.mxu1 %v3702_v51  ;;  %v3612_v51 = vpack.c.bf16 %v1962_v49, %v1960_v48  ;;  %v1995_v49 = vld [vmem:[#allocation11 + $0x3e0] sm:$0xff]  ;;  %v2004_v42 = vrot.slane %v1999_v41, %v4358_v18 }
 0x2e0   :  { %3705 = vmatprep.subr.bf16.mxu1 %v3704_v52  ;;  %v1959_v52 = vld [vmem:[#allocation11 + $0x2c0] sm:$0xff] }
 0x2e1   :  { %v3614_v4 = vpack.c.bf16 %v1961_v53, %v1959_v52 }
 0x2e3   :  { %3707 = vmatpush1.bf16.msra.mxu1 %v3706_v56  ;;  %v3616_v56 = vpack.c.bf16 %v1966_v7, %v1964_v54  ;;  %v2276_v54 = vld [vmem:[#allocation14 + $0x3c8] sm:$0xff] }
 0x2e4   :  { %3709 = vmatprep.subr.bf16.mxu1 %v3708_v58  ;;  %v1963_v58 = vld [vmem:[#allocation11 + $0x2e0] sm:$0xff]  ;;  %v2280_v7 = vld [vmem:[#allocation14 + $0x3e8] sm:$0xff] }
 0x2e7   :  { %3711 = vmatpush1.bf16.msra.mxu1 %v3710_v0  ;;  %v1967_v0 = vld [vmem:[#allocation11 + $0x300] sm:$0xff] }
 0x366   :  { %v1578_v6 = vpop.f32.mrb[4].mxu0  ;;  %v4409_v19 = vpop.f32.mrb[4].mxu1 }
 0x367   :  { %v3844_v1 = vadd.f32 %v1578_v6, %v1282_v61  ;;  %v1580_v38 = vpop.f32.mrb[5].mxu0  ;;  %v1864_v2 = vpop.f32.mrb[5].mxu1  ;;  %v1970_v61 = vld [vmem:[#allocation11 + $0x318] sm:$0xff]  ;;  %v1969_v6 = vld [vmem:[#allocation11 + $0x310] sm:$0xff]  ;;  %v3846_v52 = vadd.f32 %v4409_v19, %v1290_v47 }
 0x368   :  { %v3845_v8 = vadd.f32 %v1580_v38, %v1286_v62  ;;  %v3847_v9 = vadd.f32 %v1864_v2, %v1294_v63  ;;  %v3618_v62 = vpack.c.bf16 %v1965_v59, %v1963_v58  ;;  %v3620_v63 = vpack.c.bf16 %v1970_v61, %v1968_v60  ;;  %v1974_v38 = vld [vmem:[#allocation11 + $0x338] sm:$0xff]  ;;  %v2279_v58 = vld [vmem:[#allocation14 + $0x3e0] sm:$0xff]  ;;  %v2467_v19 = vld [vmem:[%s4640_s9 + $0x80] sm:$0xff] }
 0x369   :  { %v1867_v43 = vmax.f32 %v3844_v1, 0.0  ;;  %v1972_v1 = vld [vmem:[#allocation11 + $0x328] sm:$0xff]  ;;  %v3622_v2 = vpack.c.bf16 %v1969_v6, %v1967_v0  ;;  %v1869_v53 = vmax.f32 %v3846_v52, 0.0  ;;  %v2162_v60 = vld [vmem:[#allocation14 + $0x38] sm:$0xff] }
 0x36a   :  { %v1868_v12 = vmax.f32 %v3845_v8, 0.0  ;;  %v1870_v22 = vmax.f32 %v3847_v9, 0.0  ;;  %v3624_v3 = vpack.c.bf16 %v1974_v38, %v1972_v1  ;;  %v1973_v8 = vld [vmem:[#allocation11 + $0x330] sm:$0xff]  ;;  %v1976_v9 = vld [vmem:[#allocation11 + $0x348] sm:$0xff]  ;;  %v3716_v61 = vpack.c.bf16 %v2162_v60, %v2158_v55  ;;  %v2452_v6 = vld [vmem:[%s4640_s9 + $0x8] sm:$0xff] }
 0x36b   :  { %v3626_v11 = vpack.c.bf16 %v1973_v8, %v1971_v5  ;;  %v2469_v1 = vld [vmem:[%s4640_s9 + $0x90] sm:$0xff]  ;;  %v2470_v38 = vld [vmem:[%s4640_s9 + $0x98] sm:$0xff] }
 0x36c   :  { %2075 = vmatprep.mubr.f32.mxu0 %v1868_v12  ;;  %v3628_v12 = vpack.c.bf16 %v1978_v10, %v1976_v9  ;;  %v2453_v5 = vld [vmem:[%s4640_s9 + $0x10] sm:$0xff]  ;;  %v2454_v8 = vld [vmem:[%s4640_s9 + $0x18] sm:$0xff]  ;;  %v2471_v9 = vld [vmem:[%s4640_s9 + $0xa0] sm:$0xff] }
 0x36d   :  { %2076 = vmatmul.mubr.f32.vlgmr.msra.gmra.mrb[6].mxu0 %v1867_v43  ;;  %v1977_v43 = vld [vmem:[#allocation11 + $0x350] sm:$0xff]  ;;  %v2472_v10 = vld [vmem:[%s4640_s9 + $0xa8] sm:$0xff] }
 0x36e   :  { %3591 = vmatpush1.bf16.msra.mxu0 %v3590_v13  ;;  %2146 = vmatprep.mubr.f32.mxu0 %v1870_v22  ;;  %v1975_v13 = vld [vmem:[#allocation11 + $0x340] sm:$0xff] }
 0x36f   :  { %3593 = vmatprep.subr.bf16.mxu0 %v3592_v15  ;;  %v1980_v15 = vld [vmem:[#allocation11 + $0x368] sm:$0xff]  ;;  %v3630_v45 = vpack.c.bf16 %v1977_v43, %v1975_v13  ;;  %v2455_v13 = vld [vmem:[%s4640_s9 + $0x20] sm:$0xff]  ;;  %v2456_v43 = vld [vmem:[%s4640_s9 + $0x28] sm:$0xff] }
 0x370   :  { %v3632_v22 = vpack.c.bf16 %v1982_v16, %v1980_v15  ;;  %v2473_v15 = vld [vmem:[%s4640_s9 + $0xb0] sm:$0xff]  ;;  %v2474_v16 = vld [vmem:[%s4640_s9 + $0xb8] sm:$0xff] }
 0x371   :  { %v2170_v52 = vld [vmem:[#allocation14 + $0x78] sm:$0xff] }
 0x372   :  { %3595 = vmatpush1.bf16.msra.mxu0 %v3594_v25  ;;  %v1984_v25 = vld [vmem:[#allocation11 + $0x388] sm:$0xff]  ;;  %v2178_v55 = vld [vmem:[#allocation14 + $0xb8] sm:$0xff] }
 0x373   :  { %3597 = vmatprep.subr.bf16.mxu0 %v3596_v26  ;;  %v1986_v26 = vld [vmem:[#allocation11 + $0x398] sm:$0xff] }
 0x374   :  { %v3636_v28 = vpack.c.bf16 %v1986_v26, %v1984_v25  ;;  %v2475_v25 = vld [vmem:[%s4640_s9 + $0xc0] sm:$0xff]  ;;  %v2476_v26 = vld [vmem:[%s4640_s9 + $0xc8] sm:$0xff] }
 0x376   :  { %3599 = vmatpush1.bf16.msra.mxu0 %v3598_v31  ;;  %v1988_v31 = vld [vmem:[#allocation11 + $0x3a8] sm:$0xff] }
 0x377   :  { %3601 = vmatprep.subr.bf16.mxu0 %v3600_v32  ;;  %v1990_v32 = vld [vmem:[#allocation11 + $0x3b8] sm:$0xff] }
 0x378   :  { %v3640_v34 = vpack.c.bf16 %v1990_v32, %v1988_v31  ;;  %v2477_v31 = vld [vmem:[%s4640_s9 + $0xd0] sm:$0xff]  ;;  %v2478_v32 = vld [vmem:[%s4640_s9 + $0xd8] sm:$0xff] }
 0x37a   :  { %3603 = vmatpush1.bf16.msra.mxu0 %v3602_v37  ;;  %v1992_v37 = vld [vmem:[#allocation11 + $0x3c8] sm:$0xff] }
 0x37b   :  { %3605 = vmatprep.subr.bf16.mxu0 %v3604_v39  ;;  %v1994_v39 = vld [vmem:[#allocation11 + $0x3d8] sm:$0xff] }
 0x37c   :  { %v3644_v57 = vpack.c.bf16 %v1994_v39, %v1992_v37  ;;  %v2479_v37 = vld [vmem:[%s4640_s9 + $0xe0] sm:$0xff]  ;;  %v2480_v39 = vld [vmem:[%s4640_s9 + $0xe8] sm:$0xff] }
 0x37e   :  { %3607 = vmatpush1.bf16.msra.mxu0 %v3606_v44  ;;  %v1996_v44 = vld [vmem:[#allocation11 + $0x3e8] sm:$0xff] }
 0x37f   :  { %3609 = vmatprep.subr.bf16.mxu0 %v3608_v46  ;;  %v1998_v46 = vld [vmem:[#allocation11 + $0x3f8] sm:$0xff] }
 0x380   :  { %v3648_v48 = vpack.c.bf16 %v1998_v46, %v1996_v44  ;;  %v2008_v44 = vrot.slane %v1999_v41, %v4363_v20  ;;  %v2234_v41 = vld [vmem:[#allocation14 + $0x278] sm:$0xff] }
 0x382   :  { %3611 = vmatpush1.bf16.msra.mxu0 %v3610_v50  ;;  %v1997_v50 = vld [vmem:[#allocation11 + $0x3f0] sm:$0xff] }
 0x383   :  { %3613 = vmatprep.subr.bf16.mxu0 %v3612_v51  ;;  %v3650_v51 = vpack.c.bf16 %v1997_v50, %v1995_v49  ;;  %v2161_v49 = vld [vmem:[#allocation14 + $0x30] sm:$0xff] }
 0x386   :  { %3615 = vmatpush1.bf16.msra.mxu0 %v3614_v4  ;;  %v3712_v4 = vpack.c.bf16 %v2280_v7, %v2276_v54 }
 0x387   :  { %3617 = vmatprep.subr.bf16.mxu0 %v3616_v56  ;;  %v2275_v56 = vld [vmem:[#allocation14 + $0x3c0] sm:$0xff] }
 0x388   :  { %v3714_v59 = vpack.c.bf16 %v2279_v58, %v2275_v56  ;;  %3713 = vmatprep.subr.bf16.mxu1 %v3712_v4  ;;  %v2165_v56 = vld [vmem:[#allocation14 + $0x50] sm:$0xff] }
 0x389   :  { %v2169_v58 = vld [vmem:[#allocation14 + $0x70] sm:$0xff] }
 0x38a   :  { %3619 = vmatpush1.bf16.msra.mxu0 %v3618_v62  ;;  %3715 = vmatpush1.bf16.msra.mxu1 %v3714_v59  ;;  %v2468_v62 = vld [vmem:[%s4640_s9 + $0x88] sm:$0xff]  ;;  %v3722_v60 = vpack.c.bf16 %v2169_v58, %v2165_v56 }
 0x38b   :  { %3621 = vmatprep.subr.bf16.mxu0 %v3620_v63  ;;  %3717 = vmatprep.subr.bf16.mxu1 %v3716_v61  ;;  %v2451_v63 = vld [vmem:[%s4640_s9] sm:$0xff]  ;;  %v3780_v0 = vpack.c.bf16 %v2468_v62, %v2467_v19  ;;  %v2174_v59 = vld [vmem:[#allocation14 + $0x98] sm:$0xff] }
 0x38c   :  { %v3724_v61 = vpack.c.bf16 %v2178_v55, %v2174_v59  ;;  %v2173_v19 = vld [vmem:[#allocation14 + $0x90] sm:$0xff] }
 0x38d   :  { %v2177_v62 = vld [vmem:[#allocation14 + $0xb0] sm:$0xff] }
 0x38e   :  { %3623 = vmatpush1.bf16.msra.mxu0 %v3622_v2  ;;  %v3782_v2 = vpack.c.bf16 %v2452_v6, %v2451_v63  ;;  %v2182_v63 = vld [vmem:[#allocation14 + $0xd8] sm:$0xff]  ;;  %v3726_v6 = vpack.c.bf16 %v2177_v62, %v2173_v19  ;;  %v2245_v59 = vld [vmem:[#allocation14 + $0x2d0] sm:$0xff] }
 0x38f   :  { %3625 = vmatprep.subr.bf16.mxu0 %v3624_v3  ;;  %v3784_v3 = vpack.c.bf16 %v2470_v38, %v2469_v1  ;;  %v2181_v38 = vld [vmem:[#allocation14 + $0xd0] sm:$0xff] }
 0x390   :  { %v2249_v55 = vld [vmem:[#allocation14 + $0x2f0] sm:$0xff] }
 0x391   :  { %v3762_v19 = vpack.c.bf16 %v2249_v55, %v2245_v59  ;;  %v2508_v59 = vld [vmem:[%s4640_s9 + $0x1c8] sm:$0xff] }
 0x392   :  { %3627 = vmatpush1.bf16.msra.mxu0 %v3626_v11  ;;  %v3786_v11 = vpack.c.bf16 %v2454_v8, %v2453_v5  ;;  %v2194_v5 = vld [vmem:[#allocation14 + $0x138] sm:$0xff] }
 0x393   :  { %3629 = vmatprep.subr.bf16.mxu0 %v3628_v12  ;;  %v3788_v12 = vpack.c.bf16 %v2472_v10, %v2471_v9  ;;  %v2189_v10 = vld [vmem:[#allocation14 + $0x110] sm:$0xff] }
 0x396   :  { %3631 = vmatpush1.bf16.msra.mxu0 %v3630_v45  ;;  %v3790_v45 = vpack.c.bf16 %v2456_v43, %v2455_v13  ;;  %v2202_v13 = vld [vmem:[#allocation14 + $0x178] sm:$0xff] }
 0x397   :  { %3633 = vmatprep.subr.bf16.mxu0 %v3632_v22  ;;  %v3792_v22 = vpack.c.bf16 %v2474_v16, %v2473_v15  ;;  %v2197_v16 = vld [vmem:[#allocation14 + $0x150] sm:$0xff] }
 0x39a   :  { %3635 = vmatpush1.bf16.msra.mxu0 %v3634_v27  ;;  %v3794_v27 = vpack.c.bf16 %v2458_v24, %v2457_v23  ;;  %v2210_v23 = vld [vmem:[#allocation14 + $0x1b8] sm:$0xff] }
 0x39b   :  { %3637 = vmatprep.subr.bf16.mxu0 %v3636_v28  ;;  %v3796_v28 = vpack.c.bf16 %v2476_v26, %v2475_v25  ;;  %v2205_v26 = vld [vmem:[#allocation14 + $0x190] sm:$0xff] }
 0x39e   :  { %3639 = vmatpush1.bf16.msra.mxu0 %v3638_v33  ;;  %v3798_v33 = vpack.c.bf16 %v2460_v30, %v2459_v29  ;;  %v2218_v29 = vld [vmem:[#allocation14 + $0x1f8] sm:$0xff] }
 0x39f   :  { %3641 = vmatprep.subr.bf16.mxu0 %v3640_v34  ;;  %v3800_v34 = vpack.c.bf16 %v2478_v32, %v2477_v31  ;;  %v2213_v32 = vld [vmem:[#allocation14 + $0x1d0] sm:$0xff] }
 0x3a2   :  { %3643 = vmatpush1.bf16.msra.mxu0 %v3642_v40  ;;  %v3802_v40 = vpack.c.bf16 %v2462_v36, %v2461_v35  ;;  %v2226_v35 = vld [vmem:[#allocation14 + $0x238] sm:$0xff] }
 0x3a3   :  { %3645 = vmatprep.subr.bf16.mxu0 %v3644_v57  ;;  %v3804_v57 = vpack.c.bf16 %v2480_v39, %v2479_v37  ;;  %v2221_v39 = vld [vmem:[#allocation14 + $0x210] sm:$0xff] }
 0x3a6   :  { %3647 = vmatpush1.bf16.msra.mxu0 %v3646_v17 }
 0x3a7   :  { %3649 = vmatprep.subr.bf16.mxu0 %v3648_v48  ;;  %v2157_v48 = vld [vmem:[#allocation14 + $0x10] sm:$0xff] }
 0x3a8   :  { %v3718_v54 = vpack.c.bf16 %v2161_v49, %v2157_v48  ;;  %v2238_v48 = vld [vmem:[#allocation14 + $0x298] sm:$0xff] }
 0x3a9   :  { %v2242_v49 = vld [vmem:[#allocation14 + $0x2b8] sm:$0xff] }
 0x3aa   :  { %3651 = vmatpush1.bf16.msra.mxu0 %v3650_v51  ;;  %v2166_v51 = vld [vmem:[#allocation14 + $0x58] sm:$0xff] }
 0x3ab   :  { %3781 = vmatprep.subr.bf16.mxu0 %v3780_v0  ;;  %v3720_v4 = vpack.c.bf16 %v2170_v52, %v2166_v51  ;;  %v2186_v0 = vld [vmem:[#allocation14 + $0xf8] sm:$0xff]  ;;  %v3756_v51 = vpack.c.bf16 %v2242_v49, %v2238_v48  ;;  %v2237_v52 = vld [vmem:[#allocation14 + $0x290] sm:$0xff] }
 0x3ac   :  { %v3728_v1 = vpack.c.bf16 %v2186_v0, %v2182_v63  ;;  %v2253_v63 = vld [vmem:[#allocation14 + $0x310] sm:$0xff] }
 0x3ad   :  { %2147 = vmatmul.mubr.f32.vlgmr.msra.gmra.mrb[6].mxu0 %v1869_v53  ;;  %v2257_v0 = vld [vmem:[#allocation14 + $0x330] sm:$0xff] }
 0x3ae   :  { %3783 = vmatpush3.bf16.msra.mxu0 %v3782_v2  ;;  %v2185_v2 = vld [vmem:[#allocation14 + $0xf0] sm:$0xff] }
 0x3af   :  { %3785 = vmatprep.subr.bf16.mxu0 %v3784_v3  ;;  %v2190_v3 = vld [vmem:[#allocation14 + $0x118] sm:$0xff]  ;;  %v3730_v8 = vpack.c.bf16 %v2185_v2, %v2181_v38  ;;  %v3766_v38 = vpack.c.bf16 %v2257_v0, %v2253_v63  ;;  %v2487_v49 = vld [vmem:[%s4640_s9 + $0x120] sm:$0xff]  ;;  %v2510_v63 = vld [vmem:[%s4640_s9 + $0x1d8] sm:$0xff] }
 0x3b0   :  { %v3732_v9 = vpack.c.bf16 %v2194_v5, %v2190_v3  ;;  %v2261_v3 = vld [vmem:[#allocation14 + $0x350] sm:$0xff] }
 0x3b1   :  { %v2265_v5 = vld [vmem:[#allocation14 + $0x370] sm:$0xff] }
 0x3b2   :  { %3787 = vmatpush3.bf16.msra.mxu0 %v3786_v11  ;;  %v2193_v11 = vld [vmem:[#allocation14 + $0x130] sm:$0xff] }
 0x3b3   :  { %3789 = vmatprep.subr.bf16.mxu0 %v3788_v12  ;;  %v2198_v12 = vld [vmem:[#allocation14 + $0x158] sm:$0xff]  ;;  %v3734_v43 = vpack.c.bf16 %v2193_v11, %v2189_v10  ;;  %v3770_v10 = vpack.c.bf16 %v2265_v5, %v2261_v3 }
 0x3b4   :  { %v3736_v15 = vpack.c.bf16 %v2202_v13, %v2198_v12  ;;  %v2269_v12 = vld [vmem:[#allocation14 + $0x390] sm:$0xff] }
 0x3b5   :  { %v2273_v13 = vld [vmem:[#allocation14 + $0x3b0] sm:$0xff] }
 0x3b6   :  { %3791 = vmatpush3.bf16.msra.mxu0 %v3790_v45  ;;  %v2201_v45 = vld [vmem:[#allocation14 + $0x170] sm:$0xff] }
 0x3b7   :  { %3793 = vmatprep.subr.bf16.mxu0 %v3792_v22  ;;  %v2206_v22 = vld [vmem:[#allocation14 + $0x198] sm:$0xff]  ;;  %v3738_v24 = vpack.c.bf16 %v2201_v45, %v2197_v16  ;;  %v3774_v16 = vpack.c.bf16 %v2273_v13, %v2269_v12  ;;  %v2514_v13 = vld [vmem:[%s4640_s9 + $0x1f8] sm:$0xff] }
 0x3b8   :  { %v3740_v25 = vpack.c.bf16 %v2210_v23, %v2206_v22  ;;  %v2277_v22 = vld [vmem:[#allocation14 + $0x3d0] sm:$0xff]  ;;  %v2513_v12 = vld [vmem:[%s4640_s9 + $0x1f0] sm:$0xff] }
 0x3b9   :  { %v2281_v23 = vld [vmem:[#allocation14 + $0x3f0] sm:$0xff] }
 0x3ba   :  { %3795 = vmatpush3.bf16.msra.mxu0 %v3794_v27  ;;  %v2209_v27 = vld [vmem:[#allocation14 + $0x1b0] sm:$0xff] }
 0x3bb   :  { %3797 = vmatprep.subr.bf16.mxu0 %v3796_v28  ;;  %v2214_v28 = vld [vmem:[#allocation14 + $0x1d8] sm:$0xff]  ;;  %v3742_v30 = vpack.c.bf16 %v2209_v27, %v2205_v26 }
 0x3bc   :  { %v3744_v31 = vpack.c.bf16 %v2218_v29, %v2214_v28  ;;  %v2464_v26 = vld [vmem:[%s4640_s9 + $0x68] sm:$0xff]  ;;  %v2481_v28 = vld [vmem:[%s4640_s9 + $0xf0] sm:$0xff]  ;;  %v2482_v29 = vld [vmem:[%s4640_s9 + $0xf8] sm:$0xff] }
 0x3bd   :  { %v2512_v3 = vld [vmem:[%s4640_s9 + $0x1e8] sm:$0xff] }
 0x3be   :  { %3799 = vmatpush3.bf16.msra.mxu0 %v3798_v33  ;;  %v2217_v33 = vld [vmem:[#allocation14 + $0x1f0] sm:$0xff] }
 0x3bf   :  { %3801 = vmatprep.subr.bf16.mxu0 %v3800_v34  ;;  %v2222_v34 = vld [vmem:[#allocation14 + $0x218] sm:$0xff]  ;;  %v3746_v36 = vpack.c.bf16 %v2217_v33, %v2213_v32  ;;  %v2499_v32 = vld [vmem:[%s4640_s9 + $0x180] sm:$0xff] }
 0x3c0   :  { %v3748_v37 = vpack.c.bf16 %v2226_v35, %v2222_v34  ;;  %v2500_v33 = vld [vmem:[%s4640_s9 + $0x188] sm:$0xff]  ;;  %v2483_v34 = vld [vmem:[%s4640_s9 + $0x100] sm:$0xff] }
 0x3c1   :  { %v3812_v35 = vpack.c.bf16 %v2500_v33, %v2499_v32 }
 0x3c2   :  { %3803 = vmatpush3.bf16.msra.mxu0 %v3802_v40  ;;  %v2225_v40 = vld [vmem:[#allocation14 + $0x230] sm:$0xff] }
 0x3c3   :  { %3805 = vmatprep.subr.bf16.mxu0 %v3804_v57  ;;  %v2230_v57 = vld [vmem:[#allocation14 + $0x258] sm:$0xff] }
 0x480   :  { %v2148_v46 = vpop.f32.mrb[6].mxu0 }
 0x481   :  { %v4494_v17 = vadd.f32 %v2148_v46, %v2004_v42  ;;  %v2150_v47 = vpop.f32.mrb[7].mxu0  ;;  %v3750_v42 = vpack.c.bf16 %v2225_v40, %v2221_v39  ;;  %v2229_v46 = vld [vmem:[#allocation14 + $0x250] sm:$0xff]  ;;  %v2502_v39 = vld [vmem:[%s4640_s9 + $0x198] sm:$0xff] }
 0x482   :  { %v3849_v50 = vadd.f32 %v2150_v47, %v2008_v44  ;;  %v3752_v44 = vpack.c.bf16 %v2234_v41, %v2230_v57  ;;  %v2233_v47 = vld [vmem:[#allocation14 + $0x270] sm:$0xff]  ;;  %v2485_v41 = vld [vmem:[%s4640_s9 + $0x110] sm:$0xff] }
 0x483   :  { %v2153_v7 = vmax.f32 %v4494_v17, 0.0  ;;  %v3808_v17 = vpack.c.bf16 %v2482_v29, %v2481_v28 }
 0x484   :  { %v2154_v53 = vmax.f32 %v3849_v50, 0.0  ;;  %v3754_v50 = vpack.c.bf16 %v2233_v47, %v2229_v46  ;;  %v2504_v46 = vld [vmem:[%s4640_s9 + $0x1a8] sm:$0xff] }
 0x486   :  { %2369 = vmatprep.mubr.f32.mxu1 %v2154_v53 }
 0x487   :  { %2370 = vmatmul.mubr.f32.vlgmr.msra.gmra.mrb[6].mxu1 %v2153_v7 }
 0x488   :  { %3719 = vmatpush1.bf16.msra.mxu1 %v3718_v54  ;;  %2440 = vmatprep.mubr.f32.mxu1 %v2154_v53  ;;  %v2241_v53 = vld [vmem:[#allocation14 + $0x2b0] sm:$0xff]  ;;  %v2246_v54 = vld [vmem:[#allocation14 + $0x2d8] sm:$0xff] }
 0x489   :  { %3721 = vmatprep.subr.bf16.mxu1 %v3720_v4  ;;  %v2250_v4 = vld [vmem:[#allocation14 + $0x2f8] sm:$0xff]  ;;  %v3758_v56 = vpack.c.bf16 %v2241_v53, %v2237_v52  ;;  %v2506_v52 = vld [vmem:[%s4640_s9 + $0x1b8] sm:$0xff] }
 0x48a   :  { %v3760_v58 = vpack.c.bf16 %v2250_v4, %v2246_v54  ;;  %v2489_v4 = vld [vmem:[%s4640_s9 + $0x130] sm:$0xff] }
 0x48c   :  { %3723 = vmatpush1.bf16.msra.mxu1 %v3722_v60  ;;  %v2254_v60 = vld [vmem:[#allocation14 + $0x318] sm:$0xff] }
 0x48d   :  { %3725 = vmatprep.subr.bf16.mxu1 %v3724_v61  ;;  %v2258_v61 = vld [vmem:[#allocation14 + $0x338] sm:$0xff] }
 0x48e   :  { %v3764_v62 = vpack.c.bf16 %v2258_v61, %v2254_v60  ;;  %v2491_v61 = vld [vmem:[%s4640_s9 + $0x140] sm:$0xff] }
 0x490   :  { %3727 = vmatpush1.bf16.msra.mxu1 %v3726_v6  ;;  %v2262_v6 = vld [vmem:[#allocation14 + $0x358] sm:$0xff] }
 0x491   :  { %3729 = vmatprep.subr.bf16.mxu1 %v3728_v1  ;;  %v2266_v1 = vld [vmem:[#allocation14 + $0x378] sm:$0xff] }
 0x492   :  { %v3768_v2 = vpack.c.bf16 %v2266_v1, %v2262_v6  ;;  %v2493_v1 = vld [vmem:[%s4640_s9 + $0x150] sm:$0xff] }
 0x494   :  { %3731 = vmatpush1.bf16.msra.mxu1 %v3730_v8  ;;  %v2270_v8 = vld [vmem:[#allocation14 + $0x398] sm:$0xff] }
 0x495   :  { %3733 = vmatprep.subr.bf16.mxu1 %v3732_v9  ;;  %v2274_v9 = vld [vmem:[#allocation14 + $0x3b8] sm:$0xff] }
 0x496   :  { %v3772_v11 = vpack.c.bf16 %v2274_v9, %v2270_v8  ;;  %v2495_v9 = vld [vmem:[%s4640_s9 + $0x160] sm:$0xff] }
 0x498   :  { %3735 = vmatpush1.bf16.msra.mxu1 %v3734_v43  ;;  %v2278_v43 = vld [vmem:[#allocation14 + $0x3d8] sm:$0xff] }
 0x499   :  { %3737 = vmatprep.subr.bf16.mxu1 %v3736_v15  ;;  %v2282_v15 = vld [vmem:[#allocation14 + $0x3f8] sm:$0xff] }
 0x49a   :  { %v3776_v45 = vpack.c.bf16 %v2282_v15, %v2278_v43  ;;  %v3840_v43 = vpack.c.bf16 %v2514_v13, %v2513_v12  ;;  %v2497_v15 = vld [vmem:[%s4640_s9 + $0x170] sm:$0xff] }
 0x49c   :  { %3739 = vmatpush1.bf16.msra.mxu1 %v3738_v24  ;;  %v3778_v24 = vpack.c.bf16 %v2281_v23, %v2277_v22  ;;  %v2283_v22 = vld [vmem:[#allocation16] sm:$0xf] }
 0x49d   :  { %3741 = vmatprep.subr.bf16.mxu1 %v3740_v25  ;;  %v2463_v25 = vld [vmem:[%s4640_s9 + $0x60] sm:$0xff]  ;;  %v2288_v23 = vrot.slane %v2283_v22, %v4358_v18 }
 0x49e   :  { %v3806_v27 = vpack.c.bf16 %v2464_v26, %v2463_v25 }
 0x4a0   :  { %3743 = vmatpush1.bf16.msra.mxu1 %v3742_v30  ;;  %3807 = vmatpush3.bf16.msra.mxu0 %v3806_v27  ;;  %v2466_v30 = vld [vmem:[%s4640_s9 + $0x78] sm:$0xff] }
 0x4a1   :  { %3745 = vmatprep.subr.bf16.mxu1 %v3744_v31  ;;  %3809 = vmatprep.subr.bf16.mxu0 %v3808_v17 }
 0x4a4   :  { %3747 = vmatpush1.bf16.msra.mxu1 %v3746_v36  ;;  %v2484_v36 = vld [vmem:[%s4640_s9 + $0x108] sm:$0xff] }
 0x4a5   :  { %3749 = vmatprep.subr.bf16.mxu1 %v3748_v37  ;;  %v2501_v37 = vld [vmem:[%s4640_s9 + $0x190] sm:$0xff]  ;;  %v3814_v40 = vpack.c.bf16 %v2484_v36, %v2483_v34 }
 0x4a6   :  { %v3816_v57 = vpack.c.bf16 %v2502_v39, %v2501_v37  ;;  %v2685_v39 = vld [vmem:[#allocation17] ss:$0 sm:$0xff] }
 0x4a8   :  { %3751 = vmatpush1.bf16.msra.mxu1 %v3750_v42  ;;  %v2486_v42 = vld [vmem:[%s4640_s9 + $0x118] sm:$0xff] }
 0x4a9   :  { %3753 = vmatprep.subr.bf16.mxu1 %v3752_v44  ;;  %v2503_v44 = vld [vmem:[%s4640_s9 + $0x1a0] sm:$0xff]  ;;  %v3818_v47 = vpack.c.bf16 %v2486_v42, %v2485_v41 }
 0x4aa   :  { %v3820_v48 = vpack.c.bf16 %v2504_v46, %v2503_v44 }
 0x4ac   :  { %3755 = vmatpush1.bf16.msra.mxu1 %v3754_v50  ;;  %v2488_v50 = vld [vmem:[%s4640_s9 + $0x128] sm:$0xff] }
 0x4ad   :  { %3757 = vmatprep.subr.bf16.mxu1 %v3756_v51  ;;  %v2505_v51 = vld [vmem:[%s4640_s9 + $0x1b0] sm:$0xff]  ;;  %v3822_v53 = vpack.c.bf16 %v2488_v50, %v2487_v49 }
 0x4ae   :  { %v3824_v54 = vpack.c.bf16 %v2506_v52, %v2505_v51 }
 0x4b0   :  { %3759 = vmatpush1.bf16.msra.mxu1 %v3758_v56  ;;  %v2490_v56 = vld [vmem:[%s4640_s9 + $0x138] sm:$0xff] }
 0x4b1   :  { %3761 = vmatprep.subr.bf16.mxu1 %v3760_v58  ;;  %v2507_v58 = vld [vmem:[%s4640_s9 + $0x1c0] sm:$0xff]  ;;  %v3826_v55 = vpack.c.bf16 %v2490_v56, %v2489_v4 }
 0x4b2   :  { %v3828_v60 = vpack.c.bf16 %v2508_v59, %v2507_v58 }
 0x4b4   :  { %3763 = vmatpush1.bf16.msra.mxu1 %v3762_v19  ;;  %v2492_v19 = vld [vmem:[%s4640_s9 + $0x148] sm:$0xff] }
 0x4b5   :  { %3765 = vmatprep.subr.bf16.mxu1 %v3764_v62  ;;  %v2509_v62 = vld [vmem:[%s4640_s9 + $0x1d0] sm:$0xff]  ;;  %v3830_v0 = vpack.c.bf16 %v2492_v19, %v2491_v61 }
 0x4b6   :  { %v3832_v6 = vpack.c.bf16 %v2510_v63, %v2509_v62 }
 0x4b8   :  { %3767 = vmatpush1.bf16.msra.mxu1 %v3766_v38  ;;  %v2494_v38 = vld [vmem:[%s4640_s9 + $0x158] sm:$0xff] }
 0x4b9   :  { %3769 = vmatprep.subr.bf16.mxu1 %v3768_v2  ;;  %v2511_v2 = vld [vmem:[%s4640_s9 + $0x1e0] sm:$0xff]  ;;  %v3834_v5 = vpack.c.bf16 %v2494_v38, %v2493_v1 }
 0x4ba   :  { %v3836_v8 = vpack.c.bf16 %v2512_v3, %v2511_v2 }
 0x4bc   :  { %3771 = vmatpush1.bf16.msra.mxu1 %v3770_v10  ;;  %v2496_v10 = vld [vmem:[%s4640_s9 + $0x168] sm:$0xff] }
 0x4bd   :  { %3773 = vmatprep.subr.bf16.mxu1 %v3772_v11  ;;  %v3838_v11 = vpack.c.bf16 %v2496_v10, %v2495_v9 }
 0x4c0   :  { %3775 = vmatpush1.bf16.msra.mxu1 %v3774_v16  ;;  %v2498_v16 = vld [vmem:[%s4640_s9 + $0x178] sm:$0xff] }
 0x4c1   :  { %3777 = vmatprep.subr.bf16.mxu1 %v3776_v45  ;;  %v3842_v45 = vpack.c.bf16 %v2498_v16, %v2497_v15 }
 0x4c4   :  { %3779 = vmatpush1.bf16.msra.mxu1 %v3778_v24  ;;  %v2292_v24 = vrot.slane %v2283_v22, %v4363_v20 }
 0x4c5   :  { %3813 = vmatprep.subr.bf16.mxu1 %v3812_v35 }
 0x4c7   :  { %2441 = vmatmul.mubr.f32.vlgmr.msra.gmra.mrb[8].mxu1 %v2153_v7  ;;  %v2465_v7 = vld [vmem:[%s4640_s9 + $0x70] sm:$0xff]  ;;  %s4155_s9 = smov [#allocation19]  }
 0x4c8   :  { %v3810_v31 = vpack.c.bf16 %v2466_v30, %v2465_v7  ;;  %3815 = vmatpush3.bf16.msra.mxu1 %v3814_v40  ;;  %v2296_v7 = vrot.slane %v2283_v22, %v4377_v21  ;;  %v2300_v30 = vrot.slane %v2283_v22, %v4370_v14  ;;  %s2670_s17 = sshll.u32 %s4155_s9, 4  ;;  %s2671_s17 = int_to_ptr.vmem [resolvable:$true] %s2670_s17 }
 0x4c9   :  { %3817 = vmatprep.subr.bf16.mxu1 %v3816_v57  ;;  %s4103_s19 = scalar_lea.vmem %s2671_s17, 32  ;;  %p4108_p11 = scmp.lt.s32.totalorder %s2671_s17, %s2671_s17 }
 0x4ca   :  { %3811 = vmatpush3.bf16.msra.mxu0 %v3810_v31  ;;  %p4104_p10 = scmp.ne.s32.totalorder %s2671_s17, %s4103_s19  ;;  %p4109_p12 = scmp.lt.s32.totalorder %s4103_s19, %s4103_s19 }
 0x4cc   :  { %3819 = vmatpush3.bf16.msra.mxu1 %v3818_v47  ;;  %p4110_p13 = por %p4109_p12, %p4108_p11 }
 0x4cd   :  { %3821 = vmatprep.subr.bf16.mxu1 %v3820_v48 }
 0x4ce   :  { %p4111_p0 = pnand %p4110_p13, %p4104_p10 }
 0x4d0   :  { %3823 = vmatpush3.bf16.msra.mxu1 %v3822_v53 }
 0x4d1   :  { %3825 = vmatprep.subr.bf16.mxu1 %v3824_v54 }
 0x4d4   :  { %3827 = vmatpush3.bf16.msra.mxu1 %v3826_v55 }
 0x4d5   :  { %3829 = vmatprep.subr.bf16.mxu1 %v3828_v60 }
 0x4d8   :  { %3831 = vmatpush3.bf16.msra.mxu1 %v3830_v0 }
 0x4d9   :  { %3833 = vmatprep.subr.bf16.mxu1 %v3832_v6 }
 0x4dc   :  { %3835 = vmatpush3.bf16.msra.mxu1 %v3834_v5 }
 0x4dd   :  { %3837 = vmatprep.subr.bf16.mxu1 %v3836_v8 }
 0x4e0   :  { %3839 = vmatpush3.bf16.msra.mxu1 %v3838_v11 }
 0x4e1   :  { %3841 = vmatprep.subr.bf16.mxu1 %v3840_v43 }
 0x4e4   :  { %3843 = vmatpush3.bf16.msra.mxu1 %v3842_v45 }
 0x55a   :  { %v2371_v25 = vpop.f32.mrb[6].mxu1 }
 0x55b   :  { %v2372_v26 = vadd.f32 %v2371_v25, %v2288_v23  ;;  %v2373_v27 = vpop.f32.mrb[7].mxu1 }
 0x55c   :  { %v2374_v28 = vadd.f32 %v2373_v27, %v2292_v24 }
 0x55d   :  { %v2447_v17 = vmax.f32 %v2372_v26, 0.0 }
 0x55e   :  { %v2448_v29 = vmax.f32 %v2374_v28, 0.0 }
 0x560   :  { %2586 = vmatprep.mubr.f32.mxu0 %v2448_v29 }
 0x561   :  { %2587 = vmatmul.mubr.f32.vlgmr.msra.gmra.mrb[8].mxu0 %v2447_v17 }
 0x59a   :  { %v2442_v31 = vpop.f32.mrb[8].mxu1 }
 0x59b   :  { %v2443_v32 = vadd.f32 %v2442_v31, %v2296_v7  ;;  %v2444_v33 = vpop.f32.mrb[9].mxu1 }
 0x59c   :  { %v2445_v34 = vadd.f32 %v2444_v33, %v2300_v30 }
 0x59d   :  { %v2449_v18 = vmax.f32 %v2443_v32, 0.0 }
 0x59e   :  { %v2450_v35 = vmax.f32 %v2445_v34, 0.0 }
 0x5a0   :  { %2656 = vmatprep.mubr.f32.mxu1 %v2450_v35 }
 0x5a1   :  { %2657 = vmatmul.mubr.f32.vlgmr.msra.gmra.mrb[10].mxu1 %v2449_v18 }
 0x634   :  { %v2718_v20 = vpop.f32.mrb[8].mxu0 }
 0x635   :  { %v2719_v36 = vpop.f32.mrb[9].mxu0 }
 0x636   :  { %v2720_v37 = vadd.f32 %v2719_v36, %v2718_v20 }
 0x638   :  { %v2589_v41 = vadd.f32 %v2720_v37, %v2685_v39 }
 0x674   :  { %v2753_v40 = vpop.f32.mrb[10].mxu1 }
 0x675   :  { %v2754_v57 = vpop.f32.mrb[11].mxu1 }
 0x676   :  { %v2755_v21 = vadd.f32 %v2754_v57, %v2753_v40 }
 0x678   :  { %v2659_v14 = vadd.f32 %v2755_v21, %v2589_v41 }
 0x67a   :  { %2663 = vst.msk [vmem:[#allocation19] sm:$0x3] %vm2662_vm0, %v2659_v14 }
 0x67b   :  { %4114 = shalt.err (!%p4111_p0)
}
 0x67c   :  { %s4115_s22 = scalar_lea.hbm %s4642_s11, 32 }
 0x67d   :  { %p4116_p1 = scmp.ne.s32.totalorder %s4642_s11, %s4115_s22  ;;  %p4119_p2 = scmp.lt.u32.totalorder %s4115_s22, %s4642_s11 }
 0x67f   :  { %p4121_p3 = pnand %p4119_p2, %p4116_p1 }
 0x681   :  { %4124 = shalt.err (!%p4121_p3)
}
 0x682   :  { %2673 = dma.vmem_to_hbm [thread:$0]  %s2671_s17, 32, %s4642_s11, [#allocation4]  }
 0x683   :  { %4137 = dma.done.wait [#allocation4], 32  }
 0x684   :  { %4138 = vsyncadd [#allocation4], 4294967264 }
 0x685   :  { %2677 = vsyncpa [#allocation3], 1 }
 0x686   :  { %2678 = vsyncpa [#allocation6], 1 }
 0x687   :  { %2679 = vsyncpa [#allocation9], 1 }
 0x688   :  { %2680 = vsyncpa [#allocation12], 1 }
 0x689   :  { %2681 = vsyncpa [#allocation15], 1 }
 0x68a   :  { %2682 = vsyncpa [#allocation18], 1 }
 0x68b   :  { %2683 = vsyncpa [#allocation4], 1 }

</bundles_post_ra>
